<compile_context>
chip_gen: v5e
topology: v5e:2x2
jax: 0.10.0
libtpu: 0.0.40
codegen_flags: <defaults>
</compile_context>

<pallas_src>
import math
import functools

import jax
import jax.numpy as jnp
from jax import lax
from jax.experimental import pallas as pl
from jax.experimental.pallas import tpu as pltpu

NUM_HEADS = 16  # fixed by the module


# --------------------------------------------------------------------------
# Fused per-sample forward kernel
# --------------------------------------------------------------------------
def _marea_kernel(
    # ---- inputs -----------------------------------------------------------
    x_ref,                                       # (1, T, F) one sample (grid over B)
    g1w0, g1u0, g1bi0, g1bh0,                    # GRU1 layer 0: W_ih^T, W_hh^T, b_ih, b_hh
    g1w1, g1u1, g1bi1, g1bh1,                    # GRU1 layer 1
    g1w2, g1u2, g1bi2, g1bh2,                    # GRU1 layer 2
    wqkv, bqkv, wo, bo,                          # MHA: in_proj^T, in_proj bias, out_proj^T, bias
    g2w0, g2u0, g2bi0, g2bh0,                    # GRU2 layer 0
    g2w1, g2u1, g2bi1, g2bh1,                    # GRU2 layer 1 (last)
    w1, b1, gm1, bt1,                            # feature extractor (Linear + eval-BN) x3
    w2, b2, gm2, bt2,
    w3, b3, gm3, bt3,
    w4, b4,                                      # Linear(128, 64)
    hw, hb,                                      # 4 prediction heads packed as (64, 4)
    # ---- outputs ------------------------------------------------------------
    out_ref,                                     # (1, 1, 1)
    # ---- scratch (VMEM) -------------------------------------------------------
    seq_h,                                       # (T, H)   sequence buffer (GRU1 / attn / GRU2-in)
    seq_h2,                                      # (T, H2)  sequence buffer (GRU2 layer-0 output)
    gi1,                                         # (T, 3H)  hoisted input gates, GRU1 width
    gi2,                                         # (T, 3H2) hoisted input gates, GRU2 width
    *, num_heads):

    T = seq_h.shape[0]
    H = seq_h.shape[1]
    H2 = seq_h2.shape[1]

    # ---------------- GRU layer with hoisted input projection ----------------
    def gru_layer(x_all, hdim, w_ih_ref, w_hh_ref, b_ih_ref, b_hh_ref,
                  gi_ref, out_seq_ref):
        # x_all: (T, Din) value.  One big (T, Din) @ (Din, 3*hdim) matmul up
        # front; the serial loop only does h @ W_hh.  Per-step hidden states
        # are written into out_seq_ref (T, hdim).  Returns final hidden (1, hdim).
        gi_all = jnp.dot(x_all, w_ih_ref[...],
                         preferred_element_type=jnp.float32) + b_ih_ref[...]
        gi_ref[...] = gi_all                                     # stage in VMEM
        w_hh = w_hh_ref[...]
        b_hh = b_hh_ref[...]

        def step(t, h):
            gi = gi_ref[pl.ds(t, 1), :]                          # (1, 3*hdim)
            gh = jnp.dot(h, w_hh, preferred_element_type=jnp.float32) + b_hh
            r = jax.nn.sigmoid(gi[:, 0:hdim] + gh[:, 0:hdim])
            z = jax.nn.sigmoid(gi[:, hdim:2 * hdim] + gh[:, hdim:2 * hdim])
            n = jnp.tanh(gi[:, 2 * hdim:] + r * gh[:, 2 * hdim:])
            h_new = (1.0 - z) * n + z * h
            out_seq_ref[pl.ds(t, 1), :] = h_new
            return h_new

        return lax.fori_loop(0, T, step, jnp.zeros((1, hdim), jnp.float32))

    def gru_layer_reduce(x_all, hdim, w_ih_ref, w_hh_ref, b_ih_ref, b_hh_ref,
                         gi_ref):
        # Last GRU layer: never materializes its (T, hdim) output; returns
        # (final_hidden, mean over time) directly.
        gi_all = jnp.dot(x_all, w_ih_ref[...],
                         preferred_element_type=jnp.float32) + b_ih_ref[...]
        gi_ref[...] = gi_all
        w_hh = w_hh_ref[...]
        b_hh = b_hh_ref[...]

        def step(t, carry):
            h, acc = carry
            gi = gi_ref[pl.ds(t, 1), :]
            gh = jnp.dot(h, w_hh, preferred_element_type=jnp.float32) + b_hh
            r = jax.nn.sigmoid(gi[:, 0:hdim] + gh[:, 0:hdim])
            z = jax.nn.sigmoid(gi[:, hdim:2 * hdim] + gh[:, hdim:2 * hdim])
            n = jnp.tanh(gi[:, 2 * hdim:] + r * gh[:, 2 * hdim:])
            h_new = (1.0 - z) * n + z * h
            return h_new, acc + h_new

        init = (jnp.zeros((1, hdim), jnp.float32),
                jnp.zeros((1, hdim), jnp.float32))
        h_fin, acc = lax.fori_loop(0, T, step, init)
        return h_fin, acc * (1.0 / T)

    # ---------------- 3-layer GRU #1 (width H), in-place in seq_h -------------
    x0 = x_ref[0].astype(jnp.float32)                           # (T, F)
    gru_layer(x0, H, g1w0, g1u0, g1bi0, g1bh0, gi1, seq_h)
    gru_layer(seq_h[...], H, g1w1, g1u1, g1bi1, g1bh1, gi1, seq_h)
    gru_layer(seq_h[...], H, g1w2, g1u2, g1bi2, g1bh2, gi1, seq_h)

    # ---------------- 16-head self-attention ---------------------------------
    # Single QKV projection for all timesteps; heads statically unrolled
    # (head_dim = H/16 is sub-lane, so per-head slicing stays in-vreg).
    hd = H // num_heads
    scale = 1.0 / math.sqrt(hd)
    x_att = seq_h[...]                                          # (T, H)
    qkv = jnp.dot(x_att, wqkv[...],
                  preferred_element_type=jnp.float32) + bqkv[...]
    q = qkv[:, 0:H] * scale
    k = qkv[:, H:2 * H]
    v = qkv[:, 2 * H:3 * H]
    wo_m = wo[...]
    attn = jnp.broadcast_to(bo[...], (T, H)).astype(jnp.float32)
    for hidx in range(num_heads):
        sl = slice(hidx * hd, (hidx + 1) * hd)
        s = lax.dot_general(q[:, sl], k[:, sl], (((1,), (1,)), ((), ())),
                            preferred_element_type=jnp.float32)          # (T, T)
        p = jax.nn.softmax(s, axis=-1)
        ctx = jnp.dot(p, v[:, sl], preferred_element_type=jnp.float32)   # (T, hd)
        # fold output projection per head: sum_h ctx_h @ Wo^T[rows_h]
        attn = attn + jnp.dot(ctx, wo_m[sl, :],
                              preferred_element_type=jnp.float32)
    seq_h[...] = attn                                           # overwrite in place

    # ---------------- 2-layer GRU #2 (width H2) -------------------------------
    gru_layer(seq_h[...], H2, g2w0, g2u0, g2bi0, g2bh0, gi2, seq_h2)
    h_fin, g_avg = gru_layer_reduce(seq_h2[...], H2,
                                    g2w1, g2u1, g2bi1, g2bh1, gi2)

    # ---------------- feature extractor (eval BN) + prediction heads ----------
    feat = jnp.concatenate([h_fin, g_avg], axis=1)              # (1, 2*H2)
    bn_scale = 1.0 / math.sqrt(1.0 + 1e-5)

    def dense(xv, w_ref, b_ref):
        return jnp.dot(xv, w_ref[...],
                       preferred_element_type=jnp.float32) + b_ref[...]

    zz = jax.nn.relu(dense(feat, w1, b1))
    zz = zz * (gm1[...] * bn_scale) + bt1[...]
    zz = jax.nn.relu(dense(zz, w2, b2))
    zz = zz * (gm2[...] * bn_scale) + bt2[...]
    zz = jax.nn.relu(dense(zz, w3, b3))
    zz = zz * (gm3[...] * bn_scale) + bt3[...]
    zz = jax.nn.relu(dense(zz, w4, b4))                         # (1, 64)

    preds = dense(zz, hw, hb)                                   # (1, 4): [ret, mom, vol, trd]
    th = jnp.tanh(preds)                                        # one EUP pass for all heads
    sg = jax.nn.sigmoid(preds)
    ret, mom, trd, vol = th[:, 0:1], th[:, 1:2], th[:, 3:4], sg[:, 2:3]
    sig = 0.4 * ret + 0.3 * mom + 0.2 * trd + 0.1 * (vol * ret)  # (1, 1)
    out_ref[0] = sig


# --------------------------------------------------------------------------
# Wrapper: one fused pallas_call, grid over batch, weights broadcast
# --------------------------------------------------------------------------
def _const_spec(shape):
    nd = len(shape)
    return pl.BlockSpec(shape, lambda b: (0,) * nd)


@jax.jit
def marea_forward(x, params):
    # x: (B, T, F) batch-first float32 -> (B, 1)
    x = x.astype(jnp.float32)
    B, T, F = x.shape
    H = params['gru1'][0]['w_hh_t'].shape[0]
    H2 = params['gru2'][0]['w_hh_t'].shape[0]

    weights = []
    for lp in params['gru1']:
        weights += [lp['w_ih_t'], lp['w_hh_t'], lp['b_ih'], lp['b_hh']]
    a = params['attn']
    weights += [a['wqkv_t'], a['bqkv'], a['wo_t'], a['bo']]
    for lp in params['gru2']:
        weights += [lp['w_ih_t'], lp['w_hh_t'], lp['b_ih'], lp['b_hh']]
    m = params['mlp']
    weights += [m['w1'], m['b1'], m['g1'], m['be1'],
                m['w2'], m['b2'], m['g2'], m['be2'],
                m['w3'], m['b3'], m['g3'], m['be3'],
                m['w4'], m['b4'], m['hw'], m['hb']]

    in_specs = [pl.BlockSpec((1, T, F), lambda b: (b, 0, 0))]
    in_specs += [_const_spec(w.shape) for w in weights]

    grid_spec = pltpu.PrefetchScalarGridSpec(
        num_scalar_prefetch=0,
        grid=(B,),
        in_specs=in_specs,
        out_specs=pl.BlockSpec((1, 1, 1), lambda b: (b, 0, 0)),
        scratch_shapes=[
            pltpu.VMEM((T, H), jnp.float32),        # sequence buffer (width H)
            pltpu.VMEM((T, H2), jnp.float32),       # sequence buffer (width H//2)
            pltpu.VMEM((T, 3 * H), jnp.float32),    # hoisted input gates (GRU1)
            pltpu.VMEM((T, 3 * H2), jnp.float32),   # hoisted input gates (GRU2)
        ],
    )

    out = pl.pallas_call(
        functools.partial(_marea_kernel, num_heads=NUM_HEADS),
        out_shape=jax.ShapeDtypeStruct((B, 1, 1), jnp.float32),
        grid_spec=grid_spec,
        compiler_params=pltpu.CompilerParams(
            dimension_semantics=("parallel",)),      # per-sample programs; megacore on v7x
    )(x, *weights)
    return out.reshape(B, 1)


# --------------------------------------------------------------------------
# Deterministic parameter initialization
# --------------------------------------------------------------------------
def init_params(key, input_size, hidden_size):
    H, H2 = hidden_size, hidden_size // 2
    keys = iter(jax.random.split(key, 64))

    def w(shape, scale=0.1):
        return scale * jax.random.normal(next(keys), shape, jnp.float32)

    def gru_layer_params(din, h):
        return dict(w_ih_t=w((din, 3 * h)), w_hh_t=w((h, 3 * h)),
                    b_ih=w((1, 3 * h)), b_hh=w((1, 3 * h)))

    params = {
        'gru1': [gru_layer_params(input_size, H),
                 gru_layer_params(H, H),
                 gru_layer_params(H, H)],
        'gru2': [gru_layer_params(H, H2),
                 gru_layer_params(H2, H2)],
        'attn': dict(wqkv_t=w((H, 3 * H)), bqkv=w((1, 3 * H)),
                     wo_t=w((H, H)), bo=w((1, H))),
        'mlp': dict(
            w1=w((2 * H2, 512)), b1=w((1, 512)), g1=1.0 + w((1, 512)), be1=w((1, 512)),
            w2=w((512, 256)), b2=w((1, 256)), g2=1.0 + w((1, 256)), be2=w((1, 256)),
            w3=w((256, 128)), b3=w((1, 128)), g3=1.0 + w((1, 128)), be3=w((1, 128)),
            w4=w((128, 64)), b4=w((1, 64)),
            hw=w((64, 4)), hb=w((1, 4))),
    }
    return params


# --------------------------------------------------------------------------
# Pure-JAX reference (for self-validation)
# --------------------------------------------------------------------------
def _gru_layer_ref(x_tbf, w_ih_t, w_hh_t, b_ih, b_hh):
    H = w_hh_t.shape[0]

    def step(h, x_t):
        gi = x_t @ w_ih_t + b_ih
        gh = h @ w_hh_t + b_hh
        r = jax.nn.sigmoid(gi[:, :H] + gh[:, :H])
        z = jax.nn.sigmoid(gi[:, H:2 * H] + gh[:, H:2 * H])
        n = jnp.tanh(gi[:, 2 * H:] + r * gh[:, 2 * H:])
        h_new = (1.0 - z) * n + z * h
        return h_new, h_new

    h0 = jnp.zeros((x_tbf.shape[1], H), jnp.float32)
    h_n, ys = lax.scan(step, h0, x_tbf)
    return ys, h_n


def _mha_ref(x, wqkv_t, bqkv, wo_t, bo, num_heads):
    B, T, E = x.shape
    hd = E // num_heads
    qkv = x @ wqkv_t + bqkv
    q, k, v = qkv[..., :E], qkv[..., E:2 * E], qkv[..., 2 * E:]
    q = q.reshape(B, T, num_heads, hd).transpose(0, 2, 1, 3) / math.sqrt(hd)
    k = k.reshape(B, T, num_heads, hd).transpose(0, 2, 1, 3)
    v = v.reshape(B, T, num_heads, hd).transpose(0, 2, 1, 3)
    p = jax.nn.softmax(jnp.einsum('bhqd,bhkd->bhqk', q, k), axis=-1)
    ctx = jnp.einsum('bhqk,bhkd->bhqd', p, v).transpose(0, 2, 1, 3).reshape(B, T, E)
    return ctx @ wo_t + bo


def marea_forward_ref(x, params):
    h = jnp.transpose(x.astype(jnp.float32), (1, 0, 2))
    for lp in params['gru1']:
        h, _ = _gru_layer_ref(h, lp['w_ih_t'], lp['w_hh_t'], lp['b_ih'], lp['b_hh'])
    gru1_out = jnp.transpose(h, (1, 0, 2))
    a = params['attn']
    attn_out = _mha_ref(gru1_out, a['wqkv_t'], a['bqkv'], a['wo_t'], a['bo'], NUM_HEADS)
    h2 = jnp.transpose(attn_out, (1, 0, 2))
    h_n = None
    for lp in params['gru2']:
        h2, h_n = _gru_layer_ref(h2, lp['w_ih_t'], lp['w_hh_t'], lp['b_ih'], lp['b_hh'])
    gru2_out = jnp.transpose(h2, (1, 0, 2))
    feat = jnp.concatenate([h_n, jnp.mean(gru2_out, axis=1)], axis=1)

    m = params['mlp']
    bn_scale = 1.0 / math.sqrt(1.0 + 1e-5)
    hh = jax.nn.relu(feat @ m['w1'] + m['b1']) * (m['g1'] * bn_scale) + m['be1']
    hh = jax.nn.relu(hh @ m['w2'] + m['b2']) * (m['g2'] * bn_scale) + m['be2']
    hh = jax.nn.relu(hh @ m['w3'] + m['b3']) * (m['g3'] * bn_scale) + m['be3']
    hh = jax.nn.relu(hh @ m['w4'] + m['b4'])
    preds = hh @ m['hw'] + m['hb']
    ret = jnp.tanh(preds[:, 0:1])
    mom = jnp.tanh(preds[:, 1:2])
    vol = jax.nn.sigmoid(preds[:, 2:3])
    trd = jnp.tanh(preds[:, 3:4])
    return 0.4 * ret + 0.3 * mom + 0.2 * trd + 0.1 * (vol * ret)


# --------------------------------------------------------------------------
if __name__ == "__main__":
    # small shapes: batch=2, seq=8, features=8, hidden=32 (divisible by 16 heads)
    B, T, F, H = 2, 8, 8, 32
    key = jax.random.PRNGKey(0)
    kx, kp = jax.random.split(key)
    x = jax.random.normal(kx, (B, T, F), jnp.float32)
    params = init_params(kp, F, H)

    out = jax.block_until_ready(marea_forward(x, params))
    ref = marea_forward_ref(x, params)

    assert out.shape == (B, 1), out.shape
    assert bool(jnp.all(jnp.isfinite(out)))
    assert bool(jnp.allclose(out, ref, rtol=2e-2, atol=2e-2)), (out, ref)
    print("KERNEL_OK")
</pallas_src>

<mosaic_0001>
module attributes {stable_mosaic.version = 11 : i64} {
  func.func @_marea_kernel(%arg0: i32, %arg1: memref<1x8x8xf32, #tpu.memory_space<vmem>>, %arg2: memref<8x96xf32, #tpu.memory_space<vmem>>, %arg3: memref<32x96xf32, #tpu.memory_space<vmem>>, %arg4: memref<1x96xf32, #tpu.memory_space<vmem>>, %arg5: memref<1x96xf32, #tpu.memory_space<vmem>>, %arg6: memref<32x96xf32, #tpu.memory_space<vmem>>, %arg7: memref<32x96xf32, #tpu.memory_space<vmem>>, %arg8: memref<1x96xf32, #tpu.memory_space<vmem>>, %arg9: memref<1x96xf32, #tpu.memory_space<vmem>>, %arg10: memref<32x96xf32, #tpu.memory_space<vmem>>, %arg11: memref<32x96xf32, #tpu.memory_space<vmem>>, %arg12: memref<1x96xf32, #tpu.memory_space<vmem>>, %arg13: memref<1x96xf32, #tpu.memory_space<vmem>>, %arg14: memref<32x96xf32, #tpu.memory_space<vmem>>, %arg15: memref<1x96xf32, #tpu.memory_space<vmem>>, %arg16: memref<32x32xf32, #tpu.memory_space<vmem>>, %arg17: memref<1x32xf32, #tpu.memory_space<vmem>>, %arg18: memref<32x48xf32, #tpu.memory_space<vmem>>, %arg19: memref<16x48xf32, #tpu.memory_space<vmem>>, %arg20: memref<1x48xf32, #tpu.memory_space<vmem>>, %arg21: memref<1x48xf32, #tpu.memory_space<vmem>>, %arg22: memref<16x48xf32, #tpu.memory_space<vmem>>, %arg23: memref<16x48xf32, #tpu.memory_space<vmem>>, %arg24: memref<1x48xf32, #tpu.memory_space<vmem>>, %arg25: memref<1x48xf32, #tpu.memory_space<vmem>>, %arg26: memref<32x512xf32, #tpu.memory_space<vmem>>, %arg27: memref<1x512xf32, #tpu.memory_space<vmem>>, %arg28: memref<1x512xf32, #tpu.memory_space<vmem>>, %arg29: memref<1x512xf32, #tpu.memory_space<vmem>>, %arg30: memref<512x256xf32, #tpu.memory_space<vmem>>, %arg31: memref<1x256xf32, #tpu.memory_space<vmem>>, %arg32: memref<1x256xf32, #tpu.memory_space<vmem>>, %arg33: memref<1x256xf32, #tpu.memory_space<vmem>>, %arg34: memref<256x128xf32, #tpu.memory_space<vmem>>, %arg35: memref<1x128xf32, #tpu.memory_space<vmem>>, %arg36: memref<1x128xf32, #tpu.memory_space<vmem>>, %arg37: memref<1x128xf32, #tpu.memory_space<vmem>>, %arg38: memref<128x64xf32, #tpu.memory_space<vmem>>, %arg39: memref<1x64xf32, #tpu.memory_space<vmem>>, %arg40: memref<64x4xf32, #tpu.memory_space<vmem>>, %arg41: memref<1x4xf32, #tpu.memory_space<vmem>>, %arg42: memref<1x1x1xf32, #tpu.memory_space<vmem>>, %arg43: memref<8x32xf32, #tpu.memory_space<vmem>>, %arg44: memref<8x16xf32, #tpu.memory_space<vmem>>, %arg45: memref<8x96xf32, #tpu.memory_space<vmem>>, %arg46: memref<8x48xf32, #tpu.memory_space<vmem>>) attributes {dimension_semantics = [#tpu.dimension_semantics<parallel>], iteration_bounds = array<i64: 2>, scalar_prefetch = 0 : i64, scratch_operands = 4 : i64, tpu.core_type = #tpu.core_type<tc>, window_params = [{transform_indices = @transform_0, window_bounds = array<i64: 1, 8, 8>}, {pipeline_mode = #tpu.pipeline_mode<synchronous>, transform_indices = @transform_1, window_bounds = array<i64: 8, 96>}, {pipeline_mode = #tpu.pipeline_mode<synchronous>, transform_indices = @transform_2, window_bounds = array<i64: 32, 96>}, {pipeline_mode = #tpu.pipeline_mode<synchronous>, transform_indices = @transform_3, window_bounds = array<i64: 1, 96>}, {pipeline_mode = #tpu.pipeline_mode<synchronous>, transform_indices = @transform_4, window_bounds = array<i64: 1, 96>}, {pipeline_mode = #tpu.pipeline_mode<synchronous>, transform_indices = @transform_5, window_bounds = array<i64: 32, 96>}, {pipeline_mode = #tpu.pipeline_mode<synchronous>, transform_indices = @transform_6, window_bounds = array<i64: 32, 96>}, {pipeline_mode = #tpu.pipeline_mode<synchronous>, transform_indices = @transform_7, window_bounds = array<i64: 1, 96>}, {pipeline_mode = #tpu.pipeline_mode<synchronous>, transform_indices = @transform_8, window_bounds = array<i64: 1, 96>}, {pipeline_mode = #tpu.pipeline_mode<synchronous>, transform_indices = @transform_9, window_bounds = array<i64: 32, 96>}, {pipeline_mode = #tpu.pipeline_mode<synchronous>, transform_indices = @transform_10, window_bounds = array<i64: 32, 96>}, {pipeline_mode = #tpu.pipeline_mode<synchronous>, transform_indices = @transform_11, window_bounds = array<i64: 1, 96>}, {pipeline_mode = #tpu.pipeline_mode<synchronous>, transform_indices = @transform_12, window_bounds = array<i64: 1, 96>}, {pipeline_mode = #tpu.pipeline_mode<synchronous>, transform_indices = @transform_13, window_bounds = array<i64: 32, 96>}, {pipeline_mode = #tpu.pipeline_mode<synchronous>, transform_indices = @transform_14, window_bounds = array<i64: 1, 96>}, {pipeline_mode = #tpu.pipeline_mode<synchronous>, transform_indices = @transform_15, window_bounds = array<i64: 32, 32>}, {pipeline_mode = #tpu.pipeline_mode<synchronous>, transform_indices = @transform_16, window_bounds = array<i64: 1, 32>}, {pipeline_mode = #tpu.pipeline_mode<synchronous>, transform_indices = @transform_17, window_bounds = array<i64: 32, 48>}, {pipeline_mode = #tpu.pipeline_mode<synchronous>, transform_indices = @transform_18, window_bounds = array<i64: 16, 48>}, {pipeline_mode = #tpu.pipeline_mode<synchronous>, transform_indices = @transform_19, window_bounds = array<i64: 1, 48>}, {pipeline_mode = #tpu.pipeline_mode<synchronous>, transform_indices = @transform_20, window_bounds = array<i64: 1, 48>}, {pipeline_mode = #tpu.pipeline_mode<synchronous>, transform_indices = @transform_21, window_bounds = array<i64: 16, 48>}, {pipeline_mode = #tpu.pipeline_mode<synchronous>, transform_indices = @transform_22, window_bounds = array<i64: 16, 48>}, {pipeline_mode = #tpu.pipeline_mode<synchronous>, transform_indices = @transform_23, window_bounds = array<i64: 1, 48>}, {pipeline_mode = #tpu.pipeline_mode<synchronous>, transform_indices = @transform_24, window_bounds = array<i64: 1, 48>}, {pipeline_mode = #tpu.pipeline_mode<synchronous>, transform_indices = @transform_25, window_bounds = array<i64: 32, 512>}, {pipeline_mode = #tpu.pipeline_mode<synchronous>, transform_indices = @transform_26, window_bounds = array<i64: 1, 512>}, {pipeline_mode = #tpu.pipeline_mode<synchronous>, transform_indices = @transform_27, window_bounds = array<i64: 1, 512>}, {pipeline_mode = #tpu.pipeline_mode<synchronous>, transform_indices = @transform_28, window_bounds = array<i64: 1, 512>}, {pipeline_mode = #tpu.pipeline_mode<synchronous>, transform_indices = @transform_29, window_bounds = array<i64: 512, 256>}, {pipeline_mode = #tpu.pipeline_mode<synchronous>, transform_indices = @transform_30, window_bounds = array<i64: 1, 256>}, {pipeline_mode = #tpu.pipeline_mode<synchronous>, transform_indices = @transform_31, window_bounds = array<i64: 1, 256>}, {pipeline_mode = #tpu.pipeline_mode<synchronous>, transform_indices = @transform_32, window_bounds = array<i64: 1, 256>}, {pipeline_mode = #tpu.pipeline_mode<synchronous>, transform_indices = @transform_33, window_bounds = array<i64: 256, 128>}, {pipeline_mode = #tpu.pipeline_mode<synchronous>, transform_indices = @transform_34, window_bounds = array<i64: 1, 128>}, {pipeline_mode = #tpu.pipeline_mode<synchronous>, transform_indices = @transform_35, window_bounds = array<i64: 1, 128>}, {pipeline_mode = #tpu.pipeline_mode<synchronous>, transform_indices = @transform_36, window_bounds = array<i64: 1, 128>}, {pipeline_mode = #tpu.pipeline_mode<synchronous>, transform_indices = @transform_37, window_bounds = array<i64: 128, 64>}, {pipeline_mode = #tpu.pipeline_mode<synchronous>, transform_indices = @transform_38, window_bounds = array<i64: 1, 64>}, {pipeline_mode = #tpu.pipeline_mode<synchronous>, transform_indices = @transform_39, window_bounds = array<i64: 64, 4>}, {pipeline_mode = #tpu.pipeline_mode<synchronous>, transform_indices = @transform_40, window_bounds = array<i64: 1, 4>}, {transform_indices = @transform_41, window_bounds = array<i64: 1, 1, 1>}]} {
    %c0 = arith.constant 0 : index
    %c0_0 = arith.constant 0 : index
    %c0_1 = arith.constant 0 : index
    %0 = vector.load %arg1[%c0, %c0_0, %c0_1] : memref<1x8x8xf32, #tpu.memory_space<vmem>>, vector<1x8x8xf32>
    %1 = vector.shape_cast %0 : vector<1x8x8xf32> to vector<8x8xf32>
    %c0_2 = arith.constant 0 : index
    %c0_3 = arith.constant 0 : index
    %2 = vector.load %arg2[%c0_2, %c0_3] : memref<8x96xf32, #tpu.memory_space<vmem>>, vector<8x96xf32>
    %cst = arith.constant dense<0.000000e+00> : vector<8x96xf32>
    %3 = tpu.matmul %1, %2, %cst {dimension_numbers = #tpu.dot_dimension_numbers<[1], [0], [0], [1], [0, 0, 1, 1], [], []>} : vector<8x8xf32>, vector<8x96xf32>, vector<8x96xf32> -> vector<8x96xf32>
    %c0_4 = arith.constant 0 : index
    %c0_5 = arith.constant 0 : index
    %4 = vector.load %arg4[%c0_4, %c0_5] : memref<1x96xf32, #tpu.memory_space<vmem>>, vector<1x96xf32>
    %5 = vector.broadcast %4 : vector<1x96xf32> to vector<8x96xf32>
    %6 = arith.addf %3, %5 : vector<8x96xf32>
    %c0_6 = arith.constant 0 : index
    %c0_7 = arith.constant 0 : index
    %7 = vector.load %arg45[%c0_6, %c0_7] : memref<8x96xf32, #tpu.memory_space<vmem>>, vector<8x96xf32>
    tpu.vector_store %arg45[%c0_6, %c0_7], %6 {strides = array<i32>} : memref<8x96xf32, #tpu.memory_space<vmem>>, vector<8x96xf32>,
    %c0_8 = arith.constant 0 : index
    %c0_9 = arith.constant 0 : index
    %8 = vector.load %arg3[%c0_8, %c0_9] : memref<32x96xf32, #tpu.memory_space<vmem>>, vector<32x96xf32>
    %c0_10 = arith.constant 0 : index
    %c0_11 = arith.constant 0 : index
    %9 = vector.load %arg5[%c0_10, %c0_11] : memref<1x96xf32, #tpu.memory_space<vmem>>, vector<1x96xf32>
    %cst_12 = arith.constant 0.000000e+00 : f32
    %10 = vector.broadcast %cst_12 : f32 to vector<1x32xf32>
    %c0_i32 = arith.constant 0 : i32
    %c8_i32 = arith.constant 8 : i32
    %11 = arith.addi %c0_i32, %c8_i32 : i32
    %c1_i32 = arith.constant 1 : i32
    %12 = scf.for %arg47 = %c0_i32 to %11 step %c1_i32 iter_args(%arg48 = %10) -> (vector<1x32xf32>)  : i32 {
      %456 = arith.index_cast %arg47 : i32 to index
      %c0_250 = arith.constant 0 : index
      %457 = vector.load %arg45[%456, %c0_250] : memref<8x96xf32, #tpu.memory_space<vmem>>, vector<1x96xf32>
      %cst_251 = arith.constant dense<0.000000e+00> : vector<1x96xf32>
      %458 = tpu.matmul %arg48, %8, %cst_251 {dimension_numbers = #tpu.dot_dimension_numbers<[1], [0], [0], [1], [0, 0, 1, 1], [], []>} : vector<1x32xf32>, vector<32x96xf32>, vector<1x96xf32> -> vector<1x96xf32>
      %459 = arith.addf %458, %9 : vector<1x96xf32>
      %460 = vector.extract_strided_slice %457 {offsets = [0, 0], sizes = [1, 32], strides = [1, 1]} : vector<1x96xf32> to vector<1x32xf32>
      %461 = vector.extract_strided_slice %459 {offsets = [0, 0], sizes = [1, 32], strides = [1, 1]} : vector<1x96xf32> to vector<1x32xf32>
      %462 = arith.addf %460, %461 : vector<1x32xf32>
      %463 = arith.negf %462 : vector<1x32xf32>
      %464 = math.exp %463 : vector<1x32xf32>
      %cst_252 = arith.constant 1.000000e+00 : f32
      %465 = vector.broadcast %cst_252 : f32 to vector<1x32xf32>
      %466 = arith.addf %465, %464 : vector<1x32xf32>
      %467 = arith.divf %465, %466 : vector<1x32xf32>
      %468 = vector.extract_strided_slice %457 {offsets = [0, 32], sizes = [1, 32], strides = [1, 1]} : vector<1x96xf32> to vector<1x32xf32>
      %469 = vector.extract_strided_slice %459 {offsets = [0, 32], sizes = [1, 32], strides = [1, 1]} : vector<1x96xf32> to vector<1x32xf32>
      %470 = arith.addf %468, %469 : vector<1x32xf32>
      %471 = arith.negf %470 : vector<1x32xf32>
      %472 = math.exp %471 : vector<1x32xf32>
      %cst_253 = arith.constant 1.000000e+00 : f32
      %473 = vector.broadcast %cst_253 : f32 to vector<1x32xf32>
      %474 = arith.addf %473, %472 : vector<1x32xf32>
      %475 = arith.divf %473, %474 : vector<1x32xf32>
      %476 = vector.extract_strided_slice %457 {offsets = [0, 64], sizes = [1, 32], strides = [1, 1]} : vector<1x96xf32> to vector<1x32xf32>
      %477 = vector.extract_strided_slice %459 {offsets = [0, 64], sizes = [1, 32], strides = [1, 1]} : vector<1x96xf32> to vector<1x32xf32>
      %478 = arith.mulf %467, %477 : vector<1x32xf32>
      %479 = arith.addf %476, %478 : vector<1x32xf32>
      %480 = math.tanh %479 : vector<1x32xf32>
      %cst_254 = arith.constant 1.000000e+00 : f32
      %481 = vector.broadcast %cst_254 : f32 to vector<1x32xf32>
      %482 = arith.subf %481, %475 : vector<1x32xf32>
      %483 = arith.mulf %482, %480 : vector<1x32xf32>
      %484 = arith.mulf %475, %arg48 : vector<1x32xf32>
      %485 = arith.addf %483, %484 : vector<1x32xf32>
      %486 = arith.index_cast %arg47 : i32 to index
      %c0_255 = arith.constant 0 : index
      %487 = vector.load %arg43[%486, %c0_255] : memref<8x32xf32, #tpu.memory_space<vmem>>, vector<1x32xf32>
      tpu.vector_store %arg43[%486, %c0_255], %485 {strides = array<i32>} : memref<8x32xf32, #tpu.memory_space<vmem>>, vector<1x32xf32>,
      scf.yield %485 : vector<1x32xf32>
    }
    %c8_i32_13 = arith.constant 8 : i32
    %c0_14 = arith.constant 0 : index
    %c0_15 = arith.constant 0 : index
    %13 = vector.load %arg43[%c0_14, %c0_15] : memref<8x32xf32, #tpu.memory_space<vmem>>, vector<8x32xf32>
    %c0_16 = arith.constant 0 : index
    %c0_17 = arith.constant 0 : index
    %14 = vector.load %arg6[%c0_16, %c0_17] : memref<32x96xf32, #tpu.memory_space<vmem>>, vector<32x96xf32>
    %cst_18 = arith.constant dense<0.000000e+00> : vector<8x96xf32>
    %15 = tpu.matmul %13, %14, %cst_18 {dimension_numbers = #tpu.dot_dimension_numbers<[1], [0], [0], [1], [0, 0, 1, 1], [], []>} : vector<8x32xf32>, vector<32x96xf32>, vector<8x96xf32> -> vector<8x96xf32>
    %c0_19 = arith.constant 0 : index
    %c0_20 = arith.constant 0 : index
    %16 = vector.load %arg8[%c0_19, %c0_20] : memref<1x96xf32, #tpu.memory_space<vmem>>, vector<1x96xf32>
    %17 = vector.broadcast %16 : vector<1x96xf32> to vector<8x96xf32>
    %18 = arith.addf %15, %17 : vector<8x96xf32>
    %c0_21 = arith.constant 0 : index
    %c0_22 = arith.constant 0 : index
    %19 = vector.load %arg45[%c0_21, %c0_22] : memref<8x96xf32, #tpu.memory_space<vmem>>, vector<8x96xf32>
    tpu.vector_store %arg45[%c0_21, %c0_22], %18 {strides = array<i32>} : memref<8x96xf32, #tpu.memory_space<vmem>>, vector<8x96xf32>,
    %c0_23 = arith.constant 0 : index
    %c0_24 = arith.constant 0 : index
    %20 = vector.load %arg7[%c0_23, %c0_24] : memref<32x96xf32, #tpu.memory_space<vmem>>, vector<32x96xf32>
    %c0_25 = arith.constant 0 : index
    %c0_26 = arith.constant 0 : index
    %21 = vector.load %arg9[%c0_25, %c0_26] : memref<1x96xf32, #tpu.memory_space<vmem>>, vector<1x96xf32>
    %cst_27 = arith.constant 0.000000e+00 : f32
    %22 = vector.broadcast %cst_27 : f32 to vector<1x32xf32>
    %c0_i32_28 = arith.constant 0 : i32
    %c8_i32_29 = arith.constant 8 : i32
    %23 = arith.addi %c0_i32_28, %c8_i32_29 : i32
    %c1_i32_30 = arith.constant 1 : i32
    %24 = scf.for %arg47 = %c0_i32_28 to %23 step %c1_i32_30 iter_args(%arg48 = %22) -> (vector<1x32xf32>)  : i32 {
      %456 = arith.index_cast %arg47 : i32 to index
      %c0_250 = arith.constant 0 : index
      %457 = vector.load %arg45[%456, %c0_250] : memref<8x96xf32, #tpu.memory_space<vmem>>, vector<1x96xf32>
      %cst_251 = arith.constant dense<0.000000e+00> : vector<1x96xf32>
      %458 = tpu.matmul %arg48, %20, %cst_251 {dimension_numbers = #tpu.dot_dimension_numbers<[1], [0], [0], [1], [0, 0, 1, 1], [], []>} : vector<1x32xf32>, vector<32x96xf32>, vector<1x96xf32> -> vector<1x96xf32>
      %459 = arith.addf %458, %21 : vector<1x96xf32>
      %460 = vector.extract_strided_slice %457 {offsets = [0, 0], sizes = [1, 32], strides = [1, 1]} : vector<1x96xf32> to vector<1x32xf32>
      %461 = vector.extract_strided_slice %459 {offsets = [0, 0], sizes = [1, 32], strides = [1, 1]} : vector<1x96xf32> to vector<1x32xf32>
      %462 = arith.addf %460, %461 : vector<1x32xf32>
      %463 = arith.negf %462 : vector<1x32xf32>
      %464 = math.exp %463 : vector<1x32xf32>
      %cst_252 = arith.constant 1.000000e+00 : f32
      %465 = vector.broadcast %cst_252 : f32 to vector<1x32xf32>
      %466 = arith.addf %465, %464 : vector<1x32xf32>
      %467 = arith.divf %465, %466 : vector<1x32xf32>
      %468 = vector.extract_strided_slice %457 {offsets = [0, 32], sizes = [1, 32], strides = [1, 1]} : vector<1x96xf32> to vector<1x32xf32>
      %469 = vector.extract_strided_slice %459 {offsets = [0, 32], sizes = [1, 32], strides = [1, 1]} : vector<1x96xf32> to vector<1x32xf32>
      %470 = arith.addf %468, %469 : vector<1x32xf32>
      %471 = arith.negf %470 : vector<1x32xf32>
      %472 = math.exp %471 : vector<1x32xf32>
      %cst_253 = arith.constant 1.000000e+00 : f32
      %473 = vector.broadcast %cst_253 : f32 to vector<1x32xf32>
      %474 = arith.addf %473, %472 : vector<1x32xf32>
      %475 = arith.divf %473, %474 : vector<1x32xf32>
      %476 = vector.extract_strided_slice %457 {offsets = [0, 64], sizes = [1, 32], strides = [1, 1]} : vector<1x96xf32> to vector<1x32xf32>
      %477 = vector.extract_strided_slice %459 {offsets = [0, 64], sizes = [1, 32], strides = [1, 1]} : vector<1x96xf32> to vector<1x32xf32>
      %478 = arith.mulf %467, %477 : vector<1x32xf32>
      %479 = arith.addf %476, %478 : vector<1x32xf32>
      %480 = math.tanh %479 : vector<1x32xf32>
      %cst_254 = arith.constant 1.000000e+00 : f32
      %481 = vector.broadcast %cst_254 : f32 to vector<1x32xf32>
      %482 = arith.subf %481, %475 : vector<1x32xf32>
      %483 = arith.mulf %482, %480 : vector<1x32xf32>
      %484 = arith.mulf %475, %arg48 : vector<1x32xf32>
      %485 = arith.addf %483, %484 : vector<1x32xf32>
      %486 = arith.index_cast %arg47 : i32 to index
      %c0_255 = arith.constant 0 : index
      %487 = vector.load %arg43[%486, %c0_255] : memref<8x32xf32, #tpu.memory_space<vmem>>, vector<1x32xf32>
      tpu.vector_store %arg43[%486, %c0_255], %485 {strides = array<i32>} : memref<8x32xf32, #tpu.memory_space<vmem>>, vector<1x32xf32>,
      scf.yield %485 : vector<1x32xf32>
    }
    %c8_i32_31 = arith.constant 8 : i32
    %c0_32 = arith.constant 0 : index
    %c0_33 = arith.constant 0 : index
    %25 = vector.load %arg43[%c0_32, %c0_33] : memref<8x32xf32, #tpu.memory_space<vmem>>, vector<8x32xf32>
    %c0_34 = arith.constant 0 : index
    %c0_35 = arith.constant 0 : index
    %26 = vector.load %arg10[%c0_34, %c0_35] : memref<32x96xf32, #tpu.memory_space<vmem>>, vector<32x96xf32>
    %cst_36 = arith.constant dense<0.000000e+00> : vector<8x96xf32>
    %27 = tpu.matmul %25, %26, %cst_36 {dimension_numbers = #tpu.dot_dimension_numbers<[1], [0], [0], [1], [0, 0, 1, 1], [], []>} : vector<8x32xf32>, vector<32x96xf32>, vector<8x96xf32> -> vector<8x96xf32>
    %c0_37 = arith.constant 0 : index
    %c0_38 = arith.constant 0 : index
    %28 = vector.load %arg12[%c0_37, %c0_38] : memref<1x96xf32, #tpu.memory_space<vmem>>, vector<1x96xf32>
    %29 = vector.broadcast %28 : vector<1x96xf32> to vector<8x96xf32>
    %30 = arith.addf %27, %29 : vector<8x96xf32>
    %c0_39 = arith.constant 0 : index
    %c0_40 = arith.constant 0 : index
    %31 = vector.load %arg45[%c0_39, %c0_40] : memref<8x96xf32, #tpu.memory_space<vmem>>, vector<8x96xf32>
    tpu.vector_store %arg45[%c0_39, %c0_40], %30 {strides = array<i32>} : memref<8x96xf32, #tpu.memory_space<vmem>>, vector<8x96xf32>,
    %c0_41 = arith.constant 0 : index
    %c0_42 = arith.constant 0 : index
    %32 = vector.load %arg11[%c0_41, %c0_42] : memref<32x96xf32, #tpu.memory_space<vmem>>, vector<32x96xf32>
    %c0_43 = arith.constant 0 : index
    %c0_44 = arith.constant 0 : index
    %33 = vector.load %arg13[%c0_43, %c0_44] : memref<1x96xf32, #tpu.memory_space<vmem>>, vector<1x96xf32>
    %cst_45 = arith.constant 0.000000e+00 : f32
    %34 = vector.broadcast %cst_45 : f32 to vector<1x32xf32>
    %c0_i32_46 = arith.constant 0 : i32
    %c8_i32_47 = arith.constant 8 : i32
    %35 = arith.addi %c0_i32_46, %c8_i32_47 : i32
    %c1_i32_48 = arith.constant 1 : i32
    %36 = scf.for %arg47 = %c0_i32_46 to %35 step %c1_i32_48 iter_args(%arg48 = %34) -> (vector<1x32xf32>)  : i32 {
      %456 = arith.index_cast %arg47 : i32 to index
      %c0_250 = arith.constant 0 : index
      %457 = vector.load %arg45[%456, %c0_250] : memref<8x96xf32, #tpu.memory_space<vmem>>, vector<1x96xf32>
      %cst_251 = arith.constant dense<0.000000e+00> : vector<1x96xf32>
      %458 = tpu.matmul %arg48, %32, %cst_251 {dimension_numbers = #tpu.dot_dimension_numbers<[1], [0], [0], [1], [0, 0, 1, 1], [], []>} : vector<1x32xf32>, vector<32x96xf32>, vector<1x96xf32> -> vector<1x96xf32>
      %459 = arith.addf %458, %33 : vector<1x96xf32>
      %460 = vector.extract_strided_slice %457 {offsets = [0, 0], sizes = [1, 32], strides = [1, 1]} : vector<1x96xf32> to vector<1x32xf32>
      %461 = vector.extract_strided_slice %459 {offsets = [0, 0], sizes = [1, 32], strides = [1, 1]} : vector<1x96xf32> to vector<1x32xf32>
      %462 = arith.addf %460, %461 : vector<1x32xf32>
      %463 = arith.negf %462 : vector<1x32xf32>
      %464 = math.exp %463 : vector<1x32xf32>
      %cst_252 = arith.constant 1.000000e+00 : f32
      %465 = vector.broadcast %cst_252 : f32 to vector<1x32xf32>
      %466 = arith.addf %465, %464 : vector<1x32xf32>
      %467 = arith.divf %465, %466 : vector<1x32xf32>
      %468 = vector.extract_strided_slice %457 {offsets = [0, 32], sizes = [1, 32], strides = [1, 1]} : vector<1x96xf32> to vector<1x32xf32>
      %469 = vector.extract_strided_slice %459 {offsets = [0, 32], sizes = [1, 32], strides = [1, 1]} : vector<1x96xf32> to vector<1x32xf32>
      %470 = arith.addf %468, %469 : vector<1x32xf32>
      %471 = arith.negf %470 : vector<1x32xf32>
      %472 = math.exp %471 : vector<1x32xf32>
      %cst_253 = arith.constant 1.000000e+00 : f32
      %473 = vector.broadcast %cst_253 : f32 to vector<1x32xf32>
      %474 = arith.addf %473, %472 : vector<1x32xf32>
      %475 = arith.divf %473, %474 : vector<1x32xf32>
      %476 = vector.extract_strided_slice %457 {offsets = [0, 64], sizes = [1, 32], strides = [1, 1]} : vector<1x96xf32> to vector<1x32xf32>
      %477 = vector.extract_strided_slice %459 {offsets = [0, 64], sizes = [1, 32], strides = [1, 1]} : vector<1x96xf32> to vector<1x32xf32>
      %478 = arith.mulf %467, %477 : vector<1x32xf32>
      %479 = arith.addf %476, %478 : vector<1x32xf32>
      %480 = math.tanh %479 : vector<1x32xf32>
      %cst_254 = arith.constant 1.000000e+00 : f32
      %481 = vector.broadcast %cst_254 : f32 to vector<1x32xf32>
      %482 = arith.subf %481, %475 : vector<1x32xf32>
      %483 = arith.mulf %482, %480 : vector<1x32xf32>
      %484 = arith.mulf %475, %arg48 : vector<1x32xf32>
      %485 = arith.addf %483, %484 : vector<1x32xf32>
      %486 = arith.index_cast %arg47 : i32 to index
      %c0_255 = arith.constant 0 : index
      %487 = vector.load %arg43[%486, %c0_255] : memref<8x32xf32, #tpu.memory_space<vmem>>, vector<1x32xf32>
      tpu.vector_store %arg43[%486, %c0_255], %485 {strides = array<i32>} : memref<8x32xf32, #tpu.memory_space<vmem>>, vector<1x32xf32>,
      scf.yield %485 : vector<1x32xf32>
    }
    %c8_i32_49 = arith.constant 8 : i32
    %c0_50 = arith.constant 0 : index
    %c0_51 = arith.constant 0 : index
    %37 = vector.load %arg43[%c0_50, %c0_51] : memref<8x32xf32, #tpu.memory_space<vmem>>, vector<8x32xf32>
    %c0_52 = arith.constant 0 : index
    %c0_53 = arith.constant 0 : index
    %38 = vector.load %arg14[%c0_52, %c0_53] : memref<32x96xf32, #tpu.memory_space<vmem>>, vector<32x96xf32>
    %cst_54 = arith.constant dense<0.000000e+00> : vector<8x96xf32>
    %39 = tpu.matmul %37, %38, %cst_54 {dimension_numbers = #tpu.dot_dimension_numbers<[1], [0], [0], [1], [0, 0, 1, 1], [], []>} : vector<8x32xf32>, vector<32x96xf32>, vector<8x96xf32> -> vector<8x96xf32>
    %c0_55 = arith.constant 0 : index
    %c0_56 = arith.constant 0 : index
    %40 = vector.load %arg15[%c0_55, %c0_56] : memref<1x96xf32, #tpu.memory_space<vmem>>, vector<1x96xf32>
    %41 = vector.broadcast %40 : vector<1x96xf32> to vector<8x96xf32>
    %42 = arith.addf %39, %41 : vector<8x96xf32>
    %43 = vector.extract_strided_slice %42 {offsets = [0, 0], sizes = [8, 32], strides = [1, 1]} : vector<8x96xf32> to vector<8x32xf32>
    %cst_57 = arith.constant 0.707106769 : f32
    %44 = vector.broadcast %cst_57 : f32 to vector<8x32xf32>
    %45 = arith.mulf %43, %44 : vector<8x32xf32>
    %46 = vector.extract_strided_slice %42 {offsets = [0, 32], sizes = [8, 32], strides = [1, 1]} : vector<8x96xf32> to vector<8x32xf32>
    %47 = vector.extract_strided_slice %42 {offsets = [0, 64], sizes = [8, 32], strides = [1, 1]} : vector<8x96xf32> to vector<8x32xf32>
    %c0_58 = arith.constant 0 : index
    %c0_59 = arith.constant 0 : index
    %48 = vector.load %arg16[%c0_58, %c0_59] : memref<32x32xf32, #tpu.memory_space<vmem>>, vector<32x32xf32>
    %c0_60 = arith.constant 0 : index
    %c0_61 = arith.constant 0 : index
    %49 = vector.load %arg17[%c0_60, %c0_61] : memref<1x32xf32, #tpu.memory_space<vmem>>, vector<1x32xf32>
    %50 = vector.shape_cast %49 : vector<1x32xf32> to vector<1x32xf32>
    %51 = vector.broadcast %50 : vector<1x32xf32> to vector<8x32xf32>
    %52 = vector.extract_strided_slice %45 {offsets = [0, 0], sizes = [8, 2], strides = [1, 1]} : vector<8x32xf32> to vector<8x2xf32>
    %53 = vector.extract_strided_slice %46 {offsets = [0, 0], sizes = [8, 2], strides = [1, 1]} : vector<8x32xf32> to vector<8x2xf32>
    %cst_62 = arith.constant dense<0.000000e+00> : vector<8x8xf32>
    %54 = tpu.matmul %52, %53, %cst_62 {dimension_numbers = #tpu.dot_dimension_numbers<[1], [1], [0], [0], [0, 0, 1, 0], [], []>} : vector<8x2xf32>, vector<8x2xf32>, vector<8x8xf32> -> vector<8x8xf32>
    %cst_63 = arith.constant dense<0xFF800000> : vector<8xf32>
    %55 = vector.multi_reduction <maximumf>, %54, %cst_63 [1] : vector<8x8xf32> to vector<8xf32>
    %cst_64 = arith.constant 0xFF800000 : f32
    %56 = vector.broadcast %cst_64 : f32 to vector<8xf32>
    %57 = arith.maximumf %56, %55 : vector<8xf32>
    %58 = vector.shape_cast %57 : vector<8xf32> to vector<8x1xf32>
    %59 = vector.broadcast %58 : vector<8x1xf32> to vector<8x8xf32>
    %60 = arith.subf %54, %59 : vector<8x8xf32>
    %61 = math.exp %60 : vector<8x8xf32>
    %cst_65 = arith.constant dense<0.000000e+00> : vector<8xf32>
    %62 = vector.multi_reduction <add>, %61, %cst_65 [1] : vector<8x8xf32> to vector<8xf32>
    %63 = vector.shape_cast %62 : vector<8xf32> to vector<8x1xf32>
    %64 = vector.broadcast %63 : vector<8x1xf32> to vector<8x8xf32>
    %65 = arith.divf %61, %64 : vector<8x8xf32>
    %66 = vector.extract_strided_slice %47 {offsets = [0, 0], sizes = [8, 2], strides = [1, 1]} : vector<8x32xf32> to vector<8x2xf32>
    %cst_66 = arith.constant dense<0.000000e+00> : vector<8x2xf32>
    %67 = tpu.matmul %65, %66, %cst_66 {dimension_numbers = #tpu.dot_dimension_numbers<[1], [0], [0], [1], [0, 0, 1, 1], [], []>} : vector<8x8xf32>, vector<8x2xf32>, vector<8x2xf32> -> vector<8x2xf32>
    %68 = vector.extract_strided_slice %48 {offsets = [0, 0], sizes = [2, 32], strides = [1, 1]} : vector<32x32xf32> to vector<2x32xf32>
    %cst_67 = arith.constant dense<0.000000e+00> : vector<8x32xf32>
    %69 = tpu.matmul %67, %68, %cst_67 {dimension_numbers = #tpu.dot_dimension_numbers<[1], [0], [0], [1], [0, 0, 1, 1], [], []>} : vector<8x2xf32>, vector<2x32xf32>, vector<8x32xf32> -> vector<8x32xf32>
    %70 = arith.addf %51, %69 : vector<8x32xf32>
    %71 = vector.extract_strided_slice %45 {offsets = [0, 2], sizes = [8, 2], strides = [1, 1]} : vector<8x32xf32> to vector<8x2xf32>
    %72 = vector.extract_strided_slice %46 {offsets = [0, 2], sizes = [8, 2], strides = [1, 1]} : vector<8x32xf32> to vector<8x2xf32>
    %cst_68 = arith.constant dense<0.000000e+00> : vector<8x8xf32>
    %73 = tpu.matmul %71, %72, %cst_68 {dimension_numbers = #tpu.dot_dimension_numbers<[1], [1], [0], [0], [0, 0, 1, 0], [], []>} : vector<8x2xf32>, vector<8x2xf32>, vector<8x8xf32> -> vector<8x8xf32>
    %cst_69 = arith.constant dense<0xFF800000> : vector<8xf32>
    %74 = vector.multi_reduction <maximumf>, %73, %cst_69 [1] : vector<8x8xf32> to vector<8xf32>
    %cst_70 = arith.constant 0xFF800000 : f32
    %75 = vector.broadcast %cst_70 : f32 to vector<8xf32>
    %76 = arith.maximumf %75, %74 : vector<8xf32>
    %77 = vector.shape_cast %76 : vector<8xf32> to vector<8x1xf32>
    %78 = vector.broadcast %77 : vector<8x1xf32> to vector<8x8xf32>
    %79 = arith.subf %73, %78 : vector<8x8xf32>
    %80 = math.exp %79 : vector<8x8xf32>
    %cst_71 = arith.constant dense<0.000000e+00> : vector<8xf32>
    %81 = vector.multi_reduction <add>, %80, %cst_71 [1] : vector<8x8xf32> to vector<8xf32>
    %82 = vector.shape_cast %81 : vector<8xf32> to vector<8x1xf32>
    %83 = vector.broadcast %82 : vector<8x1xf32> to vector<8x8xf32>
    %84 = arith.divf %80, %83 : vector<8x8xf32>
    %85 = vector.extract_strided_slice %47 {offsets = [0, 2], sizes = [8, 2], strides = [1, 1]} : vector<8x32xf32> to vector<8x2xf32>
    %cst_72 = arith.constant dense<0.000000e+00> : vector<8x2xf32>
    %86 = tpu.matmul %84, %85, %cst_72 {dimension_numbers = #tpu.dot_dimension_numbers<[1], [0], [0], [1], [0, 0, 1, 1], [], []>} : vector<8x8xf32>, vector<8x2xf32>, vector<8x2xf32> -> vector<8x2xf32>
    %87 = vector.extract_strided_slice %48 {offsets = [2, 0], sizes = [2, 32], strides = [1, 1]} : vector<32x32xf32> to vector<2x32xf32>
    %cst_73 = arith.constant dense<0.000000e+00> : vector<8x32xf32>
    %88 = tpu.matmul %86, %87, %cst_73 {dimension_numbers = #tpu.dot_dimension_numbers<[1], [0], [0], [1], [0, 0, 1, 1], [], []>} : vector<8x2xf32>, vector<2x32xf32>, vector<8x32xf32> -> vector<8x32xf32>
    %89 = arith.addf %70, %88 : vector<8x32xf32>
    %90 = vector.extract_strided_slice %45 {offsets = [0, 4], sizes = [8, 2], strides = [1, 1]} : vector<8x32xf32> to vector<8x2xf32>
    %91 = vector.extract_strided_slice %46 {offsets = [0, 4], sizes = [8, 2], strides = [1, 1]} : vector<8x32xf32> to vector<8x2xf32>
    %cst_74 = arith.constant dense<0.000000e+00> : vector<8x8xf32>
    %92 = tpu.matmul %90, %91, %cst_74 {dimension_numbers = #tpu.dot_dimension_numbers<[1], [1], [0], [0], [0, 0, 1, 0], [], []>} : vector<8x2xf32>, vector<8x2xf32>, vector<8x8xf32> -> vector<8x8xf32>
    %cst_75 = arith.constant dense<0xFF800000> : vector<8xf32>
    %93 = vector.multi_reduction <maximumf>, %92, %cst_75 [1] : vector<8x8xf32> to vector<8xf32>
    %cst_76 = arith.constant 0xFF800000 : f32
    %94 = vector.broadcast %cst_76 : f32 to vector<8xf32>
    %95 = arith.maximumf %94, %93 : vector<8xf32>
    %96 = vector.shape_cast %95 : vector<8xf32> to vector<8x1xf32>
    %97 = vector.broadcast %96 : vector<8x1xf32> to vector<8x8xf32>
    %98 = arith.subf %92, %97 : vector<8x8xf32>
    %99 = math.exp %98 : vector<8x8xf32>
    %cst_77 = arith.constant dense<0.000000e+00> : vector<8xf32>
    %100 = vector.multi_reduction <add>, %99, %cst_77 [1] : vector<8x8xf32> to vector<8xf32>
    %101 = vector.shape_cast %100 : vector<8xf32> to vector<8x1xf32>
    %102 = vector.broadcast %101 : vector<8x1xf32> to vector<8x8xf32>
    %103 = arith.divf %99, %102 : vector<8x8xf32>
    %104 = vector.extract_strided_slice %47 {offsets = [0, 4], sizes = [8, 2], strides = [1, 1]} : vector<8x32xf32> to vector<8x2xf32>
    %cst_78 = arith.constant dense<0.000000e+00> : vector<8x2xf32>
    %105 = tpu.matmul %103, %104, %cst_78 {dimension_numbers = #tpu.dot_dimension_numbers<[1], [0], [0], [1], [0, 0, 1, 1], [], []>} : vector<8x8xf32>, vector<8x2xf32>, vector<8x2xf32> -> vector<8x2xf32>
    %106 = vector.extract_strided_slice %48 {offsets = [4, 0], sizes = [2, 32], strides = [1, 1]} : vector<32x32xf32> to vector<2x32xf32>
    %cst_79 = arith.constant dense<0.000000e+00> : vector<8x32xf32>
    %107 = tpu.matmul %105, %106, %cst_79 {dimension_numbers = #tpu.dot_dimension_numbers<[1], [0], [0], [1], [0, 0, 1, 1], [], []>} : vector<8x2xf32>, vector<2x32xf32>, vector<8x32xf32> -> vector<8x32xf32>
    %108 = arith.addf %89, %107 : vector<8x32xf32>
    %109 = vector.extract_strided_slice %45 {offsets = [0, 6], sizes = [8, 2], strides = [1, 1]} : vector<8x32xf32> to vector<8x2xf32>
    %110 = vector.extract_strided_slice %46 {offsets = [0, 6], sizes = [8, 2], strides = [1, 1]} : vector<8x32xf32> to vector<8x2xf32>
    %cst_80 = arith.constant dense<0.000000e+00> : vector<8x8xf32>
    %111 = tpu.matmul %109, %110, %cst_80 {dimension_numbers = #tpu.dot_dimension_numbers<[1], [1], [0], [0], [0, 0, 1, 0], [], []>} : vector<8x2xf32>, vector<8x2xf32>, vector<8x8xf32> -> vector<8x8xf32>
    %cst_81 = arith.constant dense<0xFF800000> : vector<8xf32>
    %112 = vector.multi_reduction <maximumf>, %111, %cst_81 [1] : vector<8x8xf32> to vector<8xf32>
    %cst_82 = arith.constant 0xFF800000 : f32
    %113 = vector.broadcast %cst_82 : f32 to vector<8xf32>
    %114 = arith.maximumf %113, %112 : vector<8xf32>
    %115 = vector.shape_cast %114 : vector<8xf32> to vector<8x1xf32>
    %116 = vector.broadcast %115 : vector<8x1xf32> to vector<8x8xf32>
    %117 = arith.subf %111, %116 : vector<8x8xf32>
    %118 = math.exp %117 : vector<8x8xf32>
    %cst_83 = arith.constant dense<0.000000e+00> : vector<8xf32>
    %119 = vector.multi_reduction <add>, %118, %cst_83 [1] : vector<8x8xf32> to vector<8xf32>
    %120 = vector.shape_cast %119 : vector<8xf32> to vector<8x1xf32>
    %121 = vector.broadcast %120 : vector<8x1xf32> to vector<8x8xf32>
    %122 = arith.divf %118, %121 : vector<8x8xf32>
    %123 = vector.extract_strided_slice %47 {offsets = [0, 6], sizes = [8, 2], strides = [1, 1]} : vector<8x32xf32> to vector<8x2xf32>
    %cst_84 = arith.constant dense<0.000000e+00> : vector<8x2xf32>
    %124 = tpu.matmul %122, %123, %cst_84 {dimension_numbers = #tpu.dot_dimension_numbers<[1], [0], [0], [1], [0, 0, 1, 1], [], []>} : vector<8x8xf32>, vector<8x2xf32>, vector<8x2xf32> -> vector<8x2xf32>
    %125 = vector.extract_strided_slice %48 {offsets = [6, 0], sizes = [2, 32], strides = [1, 1]} : vector<32x32xf32> to vector<2x32xf32>
    %cst_85 = arith.constant dense<0.000000e+00> : vector<8x32xf32>
    %126 = tpu.matmul %124, %125, %cst_85 {dimension_numbers = #tpu.dot_dimension_numbers<[1], [0], [0], [1], [0, 0, 1, 1], [], []>} : vector<8x2xf32>, vector<2x32xf32>, vector<8x32xf32> -> vector<8x32xf32>
    %127 = arith.addf %108, %126 : vector<8x32xf32>
    %128 = vector.extract_strided_slice %45 {offsets = [0, 8], sizes = [8, 2], strides = [1, 1]} : vector<8x32xf32> to vector<8x2xf32>
    %129 = vector.extract_strided_slice %46 {offsets = [0, 8], sizes = [8, 2], strides = [1, 1]} : vector<8x32xf32> to vector<8x2xf32>
    %cst_86 = arith.constant dense<0.000000e+00> : vector<8x8xf32>
    %130 = tpu.matmul %128, %129, %cst_86 {dimension_numbers = #tpu.dot_dimension_numbers<[1], [1], [0], [0], [0, 0, 1, 0], [], []>} : vector<8x2xf32>, vector<8x2xf32>, vector<8x8xf32> -> vector<8x8xf32>
    %cst_87 = arith.constant dense<0xFF800000> : vector<8xf32>
    %131 = vector.multi_reduction <maximumf>, %130, %cst_87 [1] : vector<8x8xf32> to vector<8xf32>
    %cst_88 = arith.constant 0xFF800000 : f32
    %132 = vector.broadcast %cst_88 : f32 to vector<8xf32>
    %133 = arith.maximumf %132, %131 : vector<8xf32>
    %134 = vector.shape_cast %133 : vector<8xf32> to vector<8x1xf32>
    %135 = vector.broadcast %134 : vector<8x1xf32> to vector<8x8xf32>
    %136 = arith.subf %130, %135 : vector<8x8xf32>
    %137 = math.exp %136 : vector<8x8xf32>
    %cst_89 = arith.constant dense<0.000000e+00> : vector<8xf32>
    %138 = vector.multi_reduction <add>, %137, %cst_89 [1] : vector<8x8xf32> to vector<8xf32>
    %139 = vector.shape_cast %138 : vector<8xf32> to vector<8x1xf32>
    %140 = vector.broadcast %139 : vector<8x1xf32> to vector<8x8xf32>
    %141 = arith.divf %137, %140 : vector<8x8xf32>
    %142 = vector.extract_strided_slice %47 {offsets = [0, 8], sizes = [8, 2], strides = [1, 1]} : vector<8x32xf32> to vector<8x2xf32>
    %cst_90 = arith.constant dense<0.000000e+00> : vector<8x2xf32>
    %143 = tpu.matmul %141, %142, %cst_90 {dimension_numbers = #tpu.dot_dimension_numbers<[1], [0], [0], [1], [0, 0, 1, 1], [], []>} : vector<8x8xf32>, vector<8x2xf32>, vector<8x2xf32> -> vector<8x2xf32>
    %144 = vector.extract_strided_slice %48 {offsets = [8, 0], sizes = [2, 32], strides = [1, 1]} : vector<32x32xf32> to vector<2x32xf32>
    %cst_91 = arith.constant dense<0.000000e+00> : vector<8x32xf32>
    %145 = tpu.matmul %143, %144, %cst_91 {dimension_numbers = #tpu.dot_dimension_numbers<[1], [0], [0], [1], [0, 0, 1, 1], [], []>} : vector<8x2xf32>, vector<2x32xf32>, vector<8x32xf32> -> vector<8x32xf32>
    %146 = arith.addf %127, %145 : vector<8x32xf32>
    %147 = vector.extract_strided_slice %45 {offsets = [0, 10], sizes = [8, 2], strides = [1, 1]} : vector<8x32xf32> to vector<8x2xf32>
    %148 = vector.extract_strided_slice %46 {offsets = [0, 10], sizes = [8, 2], strides = [1, 1]} : vector<8x32xf32> to vector<8x2xf32>
    %cst_92 = arith.constant dense<0.000000e+00> : vector<8x8xf32>
    %149 = tpu.matmul %147, %148, %cst_92 {dimension_numbers = #tpu.dot_dimension_numbers<[1], [1], [0], [0], [0, 0, 1, 0], [], []>} : vector<8x2xf32>, vector<8x2xf32>, vector<8x8xf32> -> vector<8x8xf32>
    %cst_93 = arith.constant dense<0xFF800000> : vector<8xf32>
    %150 = vector.multi_reduction <maximumf>, %149, %cst_93 [1] : vector<8x8xf32> to vector<8xf32>
    %cst_94 = arith.constant 0xFF800000 : f32
    %151 = vector.broadcast %cst_94 : f32 to vector<8xf32>
    %152 = arith.maximumf %151, %150 : vector<8xf32>
    %153 = vector.shape_cast %152 : vector<8xf32> to vector<8x1xf32>
    %154 = vector.broadcast %153 : vector<8x1xf32> to vector<8x8xf32>
    %155 = arith.subf %149, %154 : vector<8x8xf32>
    %156 = math.exp %155 : vector<8x8xf32>
    %cst_95 = arith.constant dense<0.000000e+00> : vector<8xf32>
    %157 = vector.multi_reduction <add>, %156, %cst_95 [1] : vector<8x8xf32> to vector<8xf32>
    %158 = vector.shape_cast %157 : vector<8xf32> to vector<8x1xf32>
    %159 = vector.broadcast %158 : vector<8x1xf32> to vector<8x8xf32>
    %160 = arith.divf %156, %159 : vector<8x8xf32>
    %161 = vector.extract_strided_slice %47 {offsets = [0, 10], sizes = [8, 2], strides = [1, 1]} : vector<8x32xf32> to vector<8x2xf32>
    %cst_96 = arith.constant dense<0.000000e+00> : vector<8x2xf32>
    %162 = tpu.matmul %160, %161, %cst_96 {dimension_numbers = #tpu.dot_dimension_numbers<[1], [0], [0], [1], [0, 0, 1, 1], [], []>} : vector<8x8xf32>, vector<8x2xf32>, vector<8x2xf32> -> vector<8x2xf32>
    %163 = vector.extract_strided_slice %48 {offsets = [10, 0], sizes = [2, 32], strides = [1, 1]} : vector<32x32xf32> to vector<2x32xf32>
    %cst_97 = arith.constant dense<0.000000e+00> : vector<8x32xf32>
    %164 = tpu.matmul %162, %163, %cst_97 {dimension_numbers = #tpu.dot_dimension_numbers<[1], [0], [0], [1], [0, 0, 1, 1], [], []>} : vector<8x2xf32>, vector<2x32xf32>, vector<8x32xf32> -> vector<8x32xf32>
    %165 = arith.addf %146, %164 : vector<8x32xf32>
    %166 = vector.extract_strided_slice %45 {offsets = [0, 12], sizes = [8, 2], strides = [1, 1]} : vector<8x32xf32> to vector<8x2xf32>
    %167 = vector.extract_strided_slice %46 {offsets = [0, 12], sizes = [8, 2], strides = [1, 1]} : vector<8x32xf32> to vector<8x2xf32>
    %cst_98 = arith.constant dense<0.000000e+00> : vector<8x8xf32>
    %168 = tpu.matmul %166, %167, %cst_98 {dimension_numbers = #tpu.dot_dimension_numbers<[1], [1], [0], [0], [0, 0, 1, 0], [], []>} : vector<8x2xf32>, vector<8x2xf32>, vector<8x8xf32> -> vector<8x8xf32>
    %cst_99 = arith.constant dense<0xFF800000> : vector<8xf32>
    %169 = vector.multi_reduction <maximumf>, %168, %cst_99 [1] : vector<8x8xf32> to vector<8xf32>
    %cst_100 = arith.constant 0xFF800000 : f32
    %170 = vector.broadcast %cst_100 : f32 to vector<8xf32>
    %171 = arith.maximumf %170, %169 : vector<8xf32>
    %172 = vector.shape_cast %171 : vector<8xf32> to vector<8x1xf32>
    %173 = vector.broadcast %172 : vector<8x1xf32> to vector<8x8xf32>
    %174 = arith.subf %168, %173 : vector<8x8xf32>
    %175 = math.exp %174 : vector<8x8xf32>
    %cst_101 = arith.constant dense<0.000000e+00> : vector<8xf32>
    %176 = vector.multi_reduction <add>, %175, %cst_101 [1] : vector<8x8xf32> to vector<8xf32>
    %177 = vector.shape_cast %176 : vector<8xf32> to vector<8x1xf32>
    %178 = vector.broadcast %177 : vector<8x1xf32> to vector<8x8xf32>
    %179 = arith.divf %175, %178 : vector<8x8xf32>
    %180 = vector.extract_strided_slice %47 {offsets = [0, 12], sizes = [8, 2], strides = [1, 1]} : vector<8x32xf32> to vector<8x2xf32>
    %cst_102 = arith.constant dense<0.000000e+00> : vector<8x2xf32>
    %181 = tpu.matmul %179, %180, %cst_102 {dimension_numbers = #tpu.dot_dimension_numbers<[1], [0], [0], [1], [0, 0, 1, 1], [], []>} : vector<8x8xf32>, vector<8x2xf32>, vector<8x2xf32> -> vector<8x2xf32>
    %182 = vector.extract_strided_slice %48 {offsets = [12, 0], sizes = [2, 32], strides = [1, 1]} : vector<32x32xf32> to vector<2x32xf32>
    %cst_103 = arith.constant dense<0.000000e+00> : vector<8x32xf32>
    %183 = tpu.matmul %181, %182, %cst_103 {dimension_numbers = #tpu.dot_dimension_numbers<[1], [0], [0], [1], [0, 0, 1, 1], [], []>} : vector<8x2xf32>, vector<2x32xf32>, vector<8x32xf32> -> vector<8x32xf32>
    %184 = arith.addf %165, %183 : vector<8x32xf32>
    %185 = vector.extract_strided_slice %45 {offsets = [0, 14], sizes = [8, 2], strides = [1, 1]} : vector<8x32xf32> to vector<8x2xf32>
    %186 = vector.extract_strided_slice %46 {offsets = [0, 14], sizes = [8, 2], strides = [1, 1]} : vector<8x32xf32> to vector<8x2xf32>
    %cst_104 = arith.constant dense<0.000000e+00> : vector<8x8xf32>
    %187 = tpu.matmul %185, %186, %cst_104 {dimension_numbers = #tpu.dot_dimension_numbers<[1], [1], [0], [0], [0, 0, 1, 0], [], []>} : vector<8x2xf32>, vector<8x2xf32>, vector<8x8xf32> -> vector<8x8xf32>
    %cst_105 = arith.constant dense<0xFF800000> : vector<8xf32>
    %188 = vector.multi_reduction <maximumf>, %187, %cst_105 [1] : vector<8x8xf32> to vector<8xf32>
    %cst_106 = arith.constant 0xFF800000 : f32
    %189 = vector.broadcast %cst_106 : f32 to vector<8xf32>
    %190 = arith.maximumf %189, %188 : vector<8xf32>
    %191 = vector.shape_cast %190 : vector<8xf32> to vector<8x1xf32>
    %192 = vector.broadcast %191 : vector<8x1xf32> to vector<8x8xf32>
    %193 = arith.subf %187, %192 : vector<8x8xf32>
    %194 = math.exp %193 : vector<8x8xf32>
    %cst_107 = arith.constant dense<0.000000e+00> : vector<8xf32>
    %195 = vector.multi_reduction <add>, %194, %cst_107 [1] : vector<8x8xf32> to vector<8xf32>
    %196 = vector.shape_cast %195 : vector<8xf32> to vector<8x1xf32>
    %197 = vector.broadcast %196 : vector<8x1xf32> to vector<8x8xf32>
    %198 = arith.divf %194, %197 : vector<8x8xf32>
    %199 = vector.extract_strided_slice %47 {offsets = [0, 14], sizes = [8, 2], strides = [1, 1]} : vector<8x32xf32> to vector<8x2xf32>
    %cst_108 = arith.constant dense<0.000000e+00> : vector<8x2xf32>
    %200 = tpu.matmul %198, %199, %cst_108 {dimension_numbers = #tpu.dot_dimension_numbers<[1], [0], [0], [1], [0, 0, 1, 1], [], []>} : vector<8x8xf32>, vector<8x2xf32>, vector<8x2xf32> -> vector<8x2xf32>
    %201 = vector.extract_strided_slice %48 {offsets = [14, 0], sizes = [2, 32], strides = [1, 1]} : vector<32x32xf32> to vector<2x32xf32>
    %cst_109 = arith.constant dense<0.000000e+00> : vector<8x32xf32>
    %202 = tpu.matmul %200, %201, %cst_109 {dimension_numbers = #tpu.dot_dimension_numbers<[1], [0], [0], [1], [0, 0, 1, 1], [], []>} : vector<8x2xf32>, vector<2x32xf32>, vector<8x32xf32> -> vector<8x32xf32>
    %203 = arith.addf %184, %202 : vector<8x32xf32>
    %204 = vector.extract_strided_slice %45 {offsets = [0, 16], sizes = [8, 2], strides = [1, 1]} : vector<8x32xf32> to vector<8x2xf32>
    %205 = vector.extract_strided_slice %46 {offsets = [0, 16], sizes = [8, 2], strides = [1, 1]} : vector<8x32xf32> to vector<8x2xf32>
    %cst_110 = arith.constant dense<0.000000e+00> : vector<8x8xf32>
    %206 = tpu.matmul %204, %205, %cst_110 {dimension_numbers = #tpu.dot_dimension_numbers<[1], [1], [0], [0], [0, 0, 1, 0], [], []>} : vector<8x2xf32>, vector<8x2xf32>, vector<8x8xf32> -> vector<8x8xf32>
    %cst_111 = arith.constant dense<0xFF800000> : vector<8xf32>
    %207 = vector.multi_reduction <maximumf>, %206, %cst_111 [1] : vector<8x8xf32> to vector<8xf32>
    %cst_112 = arith.constant 0xFF800000 : f32
    %208 = vector.broadcast %cst_112 : f32 to vector<8xf32>
    %209 = arith.maximumf %208, %207 : vector<8xf32>
    %210 = vector.shape_cast %209 : vector<8xf32> to vector<8x1xf32>
    %211 = vector.broadcast %210 : vector<8x1xf32> to vector<8x8xf32>
    %212 = arith.subf %206, %211 : vector<8x8xf32>
    %213 = math.exp %212 : vector<8x8xf32>
    %cst_113 = arith.constant dense<0.000000e+00> : vector<8xf32>
    %214 = vector.multi_reduction <add>, %213, %cst_113 [1] : vector<8x8xf32> to vector<8xf32>
    %215 = vector.shape_cast %214 : vector<8xf32> to vector<8x1xf32>
    %216 = vector.broadcast %215 : vector<8x1xf32> to vector<8x8xf32>
    %217 = arith.divf %213, %216 : vector<8x8xf32>
    %218 = vector.extract_strided_slice %47 {offsets = [0, 16], sizes = [8, 2], strides = [1, 1]} : vector<8x32xf32> to vector<8x2xf32>
    %cst_114 = arith.constant dense<0.000000e+00> : vector<8x2xf32>
    %219 = tpu.matmul %217, %218, %cst_114 {dimension_numbers = #tpu.dot_dimension_numbers<[1], [0], [0], [1], [0, 0, 1, 1], [], []>} : vector<8x8xf32>, vector<8x2xf32>, vector<8x2xf32> -> vector<8x2xf32>
    %220 = vector.extract_strided_slice %48 {offsets = [16, 0], sizes = [2, 32], strides = [1, 1]} : vector<32x32xf32> to vector<2x32xf32>
    %cst_115 = arith.constant dense<0.000000e+00> : vector<8x32xf32>
    %221 = tpu.matmul %219, %220, %cst_115 {dimension_numbers = #tpu.dot_dimension_numbers<[1], [0], [0], [1], [0, 0, 1, 1], [], []>} : vector<8x2xf32>, vector<2x32xf32>, vector<8x32xf32> -> vector<8x32xf32>
    %222 = arith.addf %203, %221 : vector<8x32xf32>
    %223 = vector.extract_strided_slice %45 {offsets = [0, 18], sizes = [8, 2], strides = [1, 1]} : vector<8x32xf32> to vector<8x2xf32>
    %224 = vector.extract_strided_slice %46 {offsets = [0, 18], sizes = [8, 2], strides = [1, 1]} : vector<8x32xf32> to vector<8x2xf32>
    %cst_116 = arith.constant dense<0.000000e+00> : vector<8x8xf32>
    %225 = tpu.matmul %223, %224, %cst_116 {dimension_numbers = #tpu.dot_dimension_numbers<[1], [1], [0], [0], [0, 0, 1, 0], [], []>} : vector<8x2xf32>, vector<8x2xf32>, vector<8x8xf32> -> vector<8x8xf32>
    %cst_117 = arith.constant dense<0xFF800000> : vector<8xf32>
    %226 = vector.multi_reduction <maximumf>, %225, %cst_117 [1] : vector<8x8xf32> to vector<8xf32>
    %cst_118 = arith.constant 0xFF800000 : f32
    %227 = vector.broadcast %cst_118 : f32 to vector<8xf32>
    %228 = arith.maximumf %227, %226 : vector<8xf32>
    %229 = vector.shape_cast %228 : vector<8xf32> to vector<8x1xf32>
    %230 = vector.broadcast %229 : vector<8x1xf32> to vector<8x8xf32>
    %231 = arith.subf %225, %230 : vector<8x8xf32>
    %232 = math.exp %231 : vector<8x8xf32>
    %cst_119 = arith.constant dense<0.000000e+00> : vector<8xf32>
    %233 = vector.multi_reduction <add>, %232, %cst_119 [1] : vector<8x8xf32> to vector<8xf32>
    %234 = vector.shape_cast %233 : vector<8xf32> to vector<8x1xf32>
    %235 = vector.broadcast %234 : vector<8x1xf32> to vector<8x8xf32>
    %236 = arith.divf %232, %235 : vector<8x8xf32>
    %237 = vector.extract_strided_slice %47 {offsets = [0, 18], sizes = [8, 2], strides = [1, 1]} : vector<8x32xf32> to vector<8x2xf32>
    %cst_120 = arith.constant dense<0.000000e+00> : vector<8x2xf32>
    %238 = tpu.matmul %236, %237, %cst_120 {dimension_numbers = #tpu.dot_dimension_numbers<[1], [0], [0], [1], [0, 0, 1, 1], [], []>} : vector<8x8xf32>, vector<8x2xf32>, vector<8x2xf32> -> vector<8x2xf32>
    %239 = vector.extract_strided_slice %48 {offsets = [18, 0], sizes = [2, 32], strides = [1, 1]} : vector<32x32xf32> to vector<2x32xf32>
    %cst_121 = arith.constant dense<0.000000e+00> : vector<8x32xf32>
    %240 = tpu.matmul %238, %239, %cst_121 {dimension_numbers = #tpu.dot_dimension_numbers<[1], [0], [0], [1], [0, 0, 1, 1], [], []>} : vector<8x2xf32>, vector<2x32xf32>, vector<8x32xf32> -> vector<8x32xf32>
    %241 = arith.addf %222, %240 : vector<8x32xf32>
    %242 = vector.extract_strided_slice %45 {offsets = [0, 20], sizes = [8, 2], strides = [1, 1]} : vector<8x32xf32> to vector<8x2xf32>
    %243 = vector.extract_strided_slice %46 {offsets = [0, 20], sizes = [8, 2], strides = [1, 1]} : vector<8x32xf32> to vector<8x2xf32>
    %cst_122 = arith.constant dense<0.000000e+00> : vector<8x8xf32>
    %244 = tpu.matmul %242, %243, %cst_122 {dimension_numbers = #tpu.dot_dimension_numbers<[1], [1], [0], [0], [0, 0, 1, 0], [], []>} : vector<8x2xf32>, vector<8x2xf32>, vector<8x8xf32> -> vector<8x8xf32>
    %cst_123 = arith.constant dense<0xFF800000> : vector<8xf32>
    %245 = vector.multi_reduction <maximumf>, %244, %cst_123 [1] : vector<8x8xf32> to vector<8xf32>
    %cst_124 = arith.constant 0xFF800000 : f32
    %246 = vector.broadcast %cst_124 : f32 to vector<8xf32>
    %247 = arith.maximumf %246, %245 : vector<8xf32>
    %248 = vector.shape_cast %247 : vector<8xf32> to vector<8x1xf32>
    %249 = vector.broadcast %248 : vector<8x1xf32> to vector<8x8xf32>
    %250 = arith.subf %244, %249 : vector<8x8xf32>
    %251 = math.exp %250 : vector<8x8xf32>
    %cst_125 = arith.constant dense<0.000000e+00> : vector<8xf32>
    %252 = vector.multi_reduction <add>, %251, %cst_125 [1] : vector<8x8xf32> to vector<8xf32>
    %253 = vector.shape_cast %252 : vector<8xf32> to vector<8x1xf32>
    %254 = vector.broadcast %253 : vector<8x1xf32> to vector<8x8xf32>
    %255 = arith.divf %251, %254 : vector<8x8xf32>
    %256 = vector.extract_strided_slice %47 {offsets = [0, 20], sizes = [8, 2], strides = [1, 1]} : vector<8x32xf32> to vector<8x2xf32>
    %cst_126 = arith.constant dense<0.000000e+00> : vector<8x2xf32>
    %257 = tpu.matmul %255, %256, %cst_126 {dimension_numbers = #tpu.dot_dimension_numbers<[1], [0], [0], [1], [0, 0, 1, 1], [], []>} : vector<8x8xf32>, vector<8x2xf32>, vector<8x2xf32> -> vector<8x2xf32>
    %258 = vector.extract_strided_slice %48 {offsets = [20, 0], sizes = [2, 32], strides = [1, 1]} : vector<32x32xf32> to vector<2x32xf32>
    %cst_127 = arith.constant dense<0.000000e+00> : vector<8x32xf32>
    %259 = tpu.matmul %257, %258, %cst_127 {dimension_numbers = #tpu.dot_dimension_numbers<[1], [0], [0], [1], [0, 0, 1, 1], [], []>} : vector<8x2xf32>, vector<2x32xf32>, vector<8x32xf32> -> vector<8x32xf32>
    %260 = arith.addf %241, %259 : vector<8x32xf32>
    %261 = vector.extract_strided_slice %45 {offsets = [0, 22], sizes = [8, 2], strides = [1, 1]} : vector<8x32xf32> to vector<8x2xf32>
    %262 = vector.extract_strided_slice %46 {offsets = [0, 22], sizes = [8, 2], strides = [1, 1]} : vector<8x32xf32> to vector<8x2xf32>
    %cst_128 = arith.constant dense<0.000000e+00> : vector<8x8xf32>
    %263 = tpu.matmul %261, %262, %cst_128 {dimension_numbers = #tpu.dot_dimension_numbers<[1], [1], [0], [0], [0, 0, 1, 0], [], []>} : vector<8x2xf32>, vector<8x2xf32>, vector<8x8xf32> -> vector<8x8xf32>
    %cst_129 = arith.constant dense<0xFF800000> : vector<8xf32>
    %264 = vector.multi_reduction <maximumf>, %263, %cst_129 [1] : vector<8x8xf32> to vector<8xf32>
    %cst_130 = arith.constant 0xFF800000 : f32
    %265 = vector.broadcast %cst_130 : f32 to vector<8xf32>
    %266 = arith.maximumf %265, %264 : vector<8xf32>
    %267 = vector.shape_cast %266 : vector<8xf32> to vector<8x1xf32>
    %268 = vector.broadcast %267 : vector<8x1xf32> to vector<8x8xf32>
    %269 = arith.subf %263, %268 : vector<8x8xf32>
    %270 = math.exp %269 : vector<8x8xf32>
    %cst_131 = arith.constant dense<0.000000e+00> : vector<8xf32>
    %271 = vector.multi_reduction <add>, %270, %cst_131 [1] : vector<8x8xf32> to vector<8xf32>
    %272 = vector.shape_cast %271 : vector<8xf32> to vector<8x1xf32>
    %273 = vector.broadcast %272 : vector<8x1xf32> to vector<8x8xf32>
    %274 = arith.divf %270, %273 : vector<8x8xf32>
    %275 = vector.extract_strided_slice %47 {offsets = [0, 22], sizes = [8, 2], strides = [1, 1]} : vector<8x32xf32> to vector<8x2xf32>
    %cst_132 = arith.constant dense<0.000000e+00> : vector<8x2xf32>
    %276 = tpu.matmul %274, %275, %cst_132 {dimension_numbers = #tpu.dot_dimension_numbers<[1], [0], [0], [1], [0, 0, 1, 1], [], []>} : vector<8x8xf32>, vector<8x2xf32>, vector<8x2xf32> -> vector<8x2xf32>
    %277 = vector.extract_strided_slice %48 {offsets = [22, 0], sizes = [2, 32], strides = [1, 1]} : vector<32x32xf32> to vector<2x32xf32>
    %cst_133 = arith.constant dense<0.000000e+00> : vector<8x32xf32>
    %278 = tpu.matmul %276, %277, %cst_133 {dimension_numbers = #tpu.dot_dimension_numbers<[1], [0], [0], [1], [0, 0, 1, 1], [], []>} : vector<8x2xf32>, vector<2x32xf32>, vector<8x32xf32> -> vector<8x32xf32>
    %279 = arith.addf %260, %278 : vector<8x32xf32>
    %280 = vector.extract_strided_slice %45 {offsets = [0, 24], sizes = [8, 2], strides = [1, 1]} : vector<8x32xf32> to vector<8x2xf32>
    %281 = vector.extract_strided_slice %46 {offsets = [0, 24], sizes = [8, 2], strides = [1, 1]} : vector<8x32xf32> to vector<8x2xf32>
    %cst_134 = arith.constant dense<0.000000e+00> : vector<8x8xf32>
    %282 = tpu.matmul %280, %281, %cst_134 {dimension_numbers = #tpu.dot_dimension_numbers<[1], [1], [0], [0], [0, 0, 1, 0], [], []>} : vector<8x2xf32>, vector<8x2xf32>, vector<8x8xf32> -> vector<8x8xf32>
    %cst_135 = arith.constant dense<0xFF800000> : vector<8xf32>
    %283 = vector.multi_reduction <maximumf>, %282, %cst_135 [1] : vector<8x8xf32> to vector<8xf32>
    %cst_136 = arith.constant 0xFF800000 : f32
    %284 = vector.broadcast %cst_136 : f32 to vector<8xf32>
    %285 = arith.maximumf %284, %283 : vector<8xf32>
    %286 = vector.shape_cast %285 : vector<8xf32> to vector<8x1xf32>
    %287 = vector.broadcast %286 : vector<8x1xf32> to vector<8x8xf32>
    %288 = arith.subf %282, %287 : vector<8x8xf32>
    %289 = math.exp %288 : vector<8x8xf32>
    %cst_137 = arith.constant dense<0.000000e+00> : vector<8xf32>
    %290 = vector.multi_reduction <add>, %289, %cst_137 [1] : vector<8x8xf32> to vector<8xf32>
    %291 = vector.shape_cast %290 : vector<8xf32> to vector<8x1xf32>
    %292 = vector.broadcast %291 : vector<8x1xf32> to vector<8x8xf32>
    %293 = arith.divf %289, %292 : vector<8x8xf32>
    %294 = vector.extract_strided_slice %47 {offsets = [0, 24], sizes = [8, 2], strides = [1, 1]} : vector<8x32xf32> to vector<8x2xf32>
    %cst_138 = arith.constant dense<0.000000e+00> : vector<8x2xf32>
    %295 = tpu.matmul %293, %294, %cst_138 {dimension_numbers = #tpu.dot_dimension_numbers<[1], [0], [0], [1], [0, 0, 1, 1], [], []>} : vector<8x8xf32>, vector<8x2xf32>, vector<8x2xf32> -> vector<8x2xf32>
    %296 = vector.extract_strided_slice %48 {offsets = [24, 0], sizes = [2, 32], strides = [1, 1]} : vector<32x32xf32> to vector<2x32xf32>
    %cst_139 = arith.constant dense<0.000000e+00> : vector<8x32xf32>
    %297 = tpu.matmul %295, %296, %cst_139 {dimension_numbers = #tpu.dot_dimension_numbers<[1], [0], [0], [1], [0, 0, 1, 1], [], []>} : vector<8x2xf32>, vector<2x32xf32>, vector<8x32xf32> -> vector<8x32xf32>
    %298 = arith.addf %279, %297 : vector<8x32xf32>
    %299 = vector.extract_strided_slice %45 {offsets = [0, 26], sizes = [8, 2], strides = [1, 1]} : vector<8x32xf32> to vector<8x2xf32>
    %300 = vector.extract_strided_slice %46 {offsets = [0, 26], sizes = [8, 2], strides = [1, 1]} : vector<8x32xf32> to vector<8x2xf32>
    %cst_140 = arith.constant dense<0.000000e+00> : vector<8x8xf32>
    %301 = tpu.matmul %299, %300, %cst_140 {dimension_numbers = #tpu.dot_dimension_numbers<[1], [1], [0], [0], [0, 0, 1, 0], [], []>} : vector<8x2xf32>, vector<8x2xf32>, vector<8x8xf32> -> vector<8x8xf32>
    %cst_141 = arith.constant dense<0xFF800000> : vector<8xf32>
    %302 = vector.multi_reduction <maximumf>, %301, %cst_141 [1] : vector<8x8xf32> to vector<8xf32>
    %cst_142 = arith.constant 0xFF800000 : f32
    %303 = vector.broadcast %cst_142 : f32 to vector<8xf32>
    %304 = arith.maximumf %303, %302 : vector<8xf32>
    %305 = vector.shape_cast %304 : vector<8xf32> to vector<8x1xf32>
    %306 = vector.broadcast %305 : vector<8x1xf32> to vector<8x8xf32>
    %307 = arith.subf %301, %306 : vector<8x8xf32>
    %308 = math.exp %307 : vector<8x8xf32>
    %cst_143 = arith.constant dense<0.000000e+00> : vector<8xf32>
    %309 = vector.multi_reduction <add>, %308, %cst_143 [1] : vector<8x8xf32> to vector<8xf32>
    %310 = vector.shape_cast %309 : vector<8xf32> to vector<8x1xf32>
    %311 = vector.broadcast %310 : vector<8x1xf32> to vector<8x8xf32>
    %312 = arith.divf %308, %311 : vector<8x8xf32>
    %313 = vector.extract_strided_slice %47 {offsets = [0, 26], sizes = [8, 2], strides = [1, 1]} : vector<8x32xf32> to vector<8x2xf32>
    %cst_144 = arith.constant dense<0.000000e+00> : vector<8x2xf32>
    %314 = tpu.matmul %312, %313, %cst_144 {dimension_numbers = #tpu.dot_dimension_numbers<[1], [0], [0], [1], [0, 0, 1, 1], [], []>} : vector<8x8xf32>, vector<8x2xf32>, vector<8x2xf32> -> vector<8x2xf32>
    %315 = vector.extract_strided_slice %48 {offsets = [26, 0], sizes = [2, 32], strides = [1, 1]} : vector<32x32xf32> to vector<2x32xf32>
    %cst_145 = arith.constant dense<0.000000e+00> : vector<8x32xf32>
    %316 = tpu.matmul %314, %315, %cst_145 {dimension_numbers = #tpu.dot_dimension_numbers<[1], [0], [0], [1], [0, 0, 1, 1], [], []>} : vector<8x2xf32>, vector<2x32xf32>, vector<8x32xf32> -> vector<8x32xf32>
    %317 = arith.addf %298, %316 : vector<8x32xf32>
    %318 = vector.extract_strided_slice %45 {offsets = [0, 28], sizes = [8, 2], strides = [1, 1]} : vector<8x32xf32> to vector<8x2xf32>
    %319 = vector.extract_strided_slice %46 {offsets = [0, 28], sizes = [8, 2], strides = [1, 1]} : vector<8x32xf32> to vector<8x2xf32>
    %cst_146 = arith.constant dense<0.000000e+00> : vector<8x8xf32>
    %320 = tpu.matmul %318, %319, %cst_146 {dimension_numbers = #tpu.dot_dimension_numbers<[1], [1], [0], [0], [0, 0, 1, 0], [], []>} : vector<8x2xf32>, vector<8x2xf32>, vector<8x8xf32> -> vector<8x8xf32>
    %cst_147 = arith.constant dense<0xFF800000> : vector<8xf32>
    %321 = vector.multi_reduction <maximumf>, %320, %cst_147 [1] : vector<8x8xf32> to vector<8xf32>
    %cst_148 = arith.constant 0xFF800000 : f32
    %322 = vector.broadcast %cst_148 : f32 to vector<8xf32>
    %323 = arith.maximumf %322, %321 : vector<8xf32>
    %324 = vector.shape_cast %323 : vector<8xf32> to vector<8x1xf32>
    %325 = vector.broadcast %324 : vector<8x1xf32> to vector<8x8xf32>
    %326 = arith.subf %320, %325 : vector<8x8xf32>
    %327 = math.exp %326 : vector<8x8xf32>
    %cst_149 = arith.constant dense<0.000000e+00> : vector<8xf32>
    %328 = vector.multi_reduction <add>, %327, %cst_149 [1] : vector<8x8xf32> to vector<8xf32>
    %329 = vector.shape_cast %328 : vector<8xf32> to vector<8x1xf32>
    %330 = vector.broadcast %329 : vector<8x1xf32> to vector<8x8xf32>
    %331 = arith.divf %327, %330 : vector<8x8xf32>
    %332 = vector.extract_strided_slice %47 {offsets = [0, 28], sizes = [8, 2], strides = [1, 1]} : vector<8x32xf32> to vector<8x2xf32>
    %cst_150 = arith.constant dense<0.000000e+00> : vector<8x2xf32>
    %333 = tpu.matmul %331, %332, %cst_150 {dimension_numbers = #tpu.dot_dimension_numbers<[1], [0], [0], [1], [0, 0, 1, 1], [], []>} : vector<8x8xf32>, vector<8x2xf32>, vector<8x2xf32> -> vector<8x2xf32>
    %334 = vector.extract_strided_slice %48 {offsets = [28, 0], sizes = [2, 32], strides = [1, 1]} : vector<32x32xf32> to vector<2x32xf32>
    %cst_151 = arith.constant dense<0.000000e+00> : vector<8x32xf32>
    %335 = tpu.matmul %333, %334, %cst_151 {dimension_numbers = #tpu.dot_dimension_numbers<[1], [0], [0], [1], [0, 0, 1, 1], [], []>} : vector<8x2xf32>, vector<2x32xf32>, vector<8x32xf32> -> vector<8x32xf32>
    %336 = arith.addf %317, %335 : vector<8x32xf32>
    %337 = vector.extract_strided_slice %45 {offsets = [0, 30], sizes = [8, 2], strides = [1, 1]} : vector<8x32xf32> to vector<8x2xf32>
    %338 = vector.extract_strided_slice %46 {offsets = [0, 30], sizes = [8, 2], strides = [1, 1]} : vector<8x32xf32> to vector<8x2xf32>
    %cst_152 = arith.constant dense<0.000000e+00> : vector<8x8xf32>
    %339 = tpu.matmul %337, %338, %cst_152 {dimension_numbers = #tpu.dot_dimension_numbers<[1], [1], [0], [0], [0, 0, 1, 0], [], []>} : vector<8x2xf32>, vector<8x2xf32>, vector<8x8xf32> -> vector<8x8xf32>
    %cst_153 = arith.constant dense<0xFF800000> : vector<8xf32>
    %340 = vector.multi_reduction <maximumf>, %339, %cst_153 [1] : vector<8x8xf32> to vector<8xf32>
    %cst_154 = arith.constant 0xFF800000 : f32
    %341 = vector.broadcast %cst_154 : f32 to vector<8xf32>
    %342 = arith.maximumf %341, %340 : vector<8xf32>
    %343 = vector.shape_cast %342 : vector<8xf32> to vector<8x1xf32>
    %344 = vector.broadcast %343 : vector<8x1xf32> to vector<8x8xf32>
    %345 = arith.subf %339, %344 : vector<8x8xf32>
    %346 = math.exp %345 : vector<8x8xf32>
    %cst_155 = arith.constant dense<0.000000e+00> : vector<8xf32>
    %347 = vector.multi_reduction <add>, %346, %cst_155 [1] : vector<8x8xf32> to vector<8xf32>
    %348 = vector.shape_cast %347 : vector<8xf32> to vector<8x1xf32>
    %349 = vector.broadcast %348 : vector<8x1xf32> to vector<8x8xf32>
    %350 = arith.divf %346, %349 : vector<8x8xf32>
    %351 = vector.extract_strided_slice %47 {offsets = [0, 30], sizes = [8, 2], strides = [1, 1]} : vector<8x32xf32> to vector<8x2xf32>
    %cst_156 = arith.constant dense<0.000000e+00> : vector<8x2xf32>
    %352 = tpu.matmul %350, %351, %cst_156 {dimension_numbers = #tpu.dot_dimension_numbers<[1], [0], [0], [1], [0, 0, 1, 1], [], []>} : vector<8x8xf32>, vector<8x2xf32>, vector<8x2xf32> -> vector<8x2xf32>
    %353 = vector.extract_strided_slice %48 {offsets = [30, 0], sizes = [2, 32], strides = [1, 1]} : vector<32x32xf32> to vector<2x32xf32>
    %cst_157 = arith.constant dense<0.000000e+00> : vector<8x32xf32>
    %354 = tpu.matmul %352, %353, %cst_157 {dimension_numbers = #tpu.dot_dimension_numbers<[1], [0], [0], [1], [0, 0, 1, 1], [], []>} : vector<8x2xf32>, vector<2x32xf32>, vector<8x32xf32> -> vector<8x32xf32>
    %355 = arith.addf %336, %354 : vector<8x32xf32>
    %c0_158 = arith.constant 0 : index
    %c0_159 = arith.constant 0 : index
    %356 = vector.load %arg43[%c0_158, %c0_159] : memref<8x32xf32, #tpu.memory_space<vmem>>, vector<8x32xf32>
    tpu.vector_store %arg43[%c0_158, %c0_159], %355 {strides = array<i32>} : memref<8x32xf32, #tpu.memory_space<vmem>>, vector<8x32xf32>,
    %c0_160 = arith.constant 0 : index
    %c0_161 = arith.constant 0 : index
    %357 = vector.load %arg43[%c0_160, %c0_161] : memref<8x32xf32, #tpu.memory_space<vmem>>, vector<8x32xf32>
    %c0_162 = arith.constant 0 : index
    %c0_163 = arith.constant 0 : index
    %358 = vector.load %arg18[%c0_162, %c0_163] : memref<32x48xf32, #tpu.memory_space<vmem>>, vector<32x48xf32>
    %cst_164 = arith.constant dense<0.000000e+00> : vector<8x48xf32>
    %359 = tpu.matmul %357, %358, %cst_164 {dimension_numbers = #tpu.dot_dimension_numbers<[1], [0], [0], [1], [0, 0, 1, 1], [], []>} : vector<8x32xf32>, vector<32x48xf32>, vector<8x48xf32> -> vector<8x48xf32>
    %c0_165 = arith.constant 0 : index
    %c0_166 = arith.constant 0 : index
    %360 = vector.load %arg20[%c0_165, %c0_166] : memref<1x48xf32, #tpu.memory_space<vmem>>, vector<1x48xf32>
    %361 = vector.broadcast %360 : vector<1x48xf32> to vector<8x48xf32>
    %362 = arith.addf %359, %361 : vector<8x48xf32>
    %c0_167 = arith.constant 0 : index
    %c0_168 = arith.constant 0 : index
    %363 = vector.load %arg46[%c0_167, %c0_168] : memref<8x48xf32, #tpu.memory_space<vmem>>, vector<8x48xf32>
    tpu.vector_store %arg46[%c0_167, %c0_168], %362 {strides = array<i32>} : memref<8x48xf32, #tpu.memory_space<vmem>>, vector<8x48xf32>,
    %c0_169 = arith.constant 0 : index
    %c0_170 = arith.constant 0 : index
    %364 = vector.load %arg19[%c0_169, %c0_170] : memref<16x48xf32, #tpu.memory_space<vmem>>, vector<16x48xf32>
    %c0_171 = arith.constant 0 : index
    %c0_172 = arith.constant 0 : index
    %365 = vector.load %arg21[%c0_171, %c0_172] : memref<1x48xf32, #tpu.memory_space<vmem>>, vector<1x48xf32>
    %cst_173 = arith.constant 0.000000e+00 : f32
    %366 = vector.broadcast %cst_173 : f32 to vector<1x16xf32>
    %c0_i32_174 = arith.constant 0 : i32
    %c8_i32_175 = arith.constant 8 : i32
    %367 = arith.addi %c0_i32_174, %c8_i32_175 : i32
    %c1_i32_176 = arith.constant 1 : i32
    %368 = scf.for %arg47 = %c0_i32_174 to %367 step %c1_i32_176 iter_args(%arg48 = %366) -> (vector<1x16xf32>)  : i32 {
      %456 = arith.index_cast %arg47 : i32 to index
      %c0_250 = arith.constant 0 : index
      %457 = vector.load %arg46[%456, %c0_250] : memref<8x48xf32, #tpu.memory_space<vmem>>, vector<1x48xf32>
      %cst_251 = arith.constant dense<0.000000e+00> : vector<1x48xf32>
      %458 = tpu.matmul %arg48, %364, %cst_251 {dimension_numbers = #tpu.dot_dimension_numbers<[1], [0], [0], [1], [0, 0, 1, 1], [], []>} : vector<1x16xf32>, vector<16x48xf32>, vector<1x48xf32> -> vector<1x48xf32>
      %459 = arith.addf %458, %365 : vector<1x48xf32>
      %460 = vector.extract_strided_slice %457 {offsets = [0, 0], sizes = [1, 16], strides = [1, 1]} : vector<1x48xf32> to vector<1x16xf32>
      %461 = vector.extract_strided_slice %459 {offsets = [0, 0], sizes = [1, 16], strides = [1, 1]} : vector<1x48xf32> to vector<1x16xf32>
      %462 = arith.addf %460, %461 : vector<1x16xf32>
      %463 = arith.negf %462 : vector<1x16xf32>
      %464 = math.exp %463 : vector<1x16xf32>
      %cst_252 = arith.constant 1.000000e+00 : f32
      %465 = vector.broadcast %cst_252 : f32 to vector<1x16xf32>
      %466 = arith.addf %465, %464 : vector<1x16xf32>
      %467 = arith.divf %465, %466 : vector<1x16xf32>
      %468 = vector.extract_strided_slice %457 {offsets = [0, 16], sizes = [1, 16], strides = [1, 1]} : vector<1x48xf32> to vector<1x16xf32>
      %469 = vector.extract_strided_slice %459 {offsets = [0, 16], sizes = [1, 16], strides = [1, 1]} : vector<1x48xf32> to vector<1x16xf32>
      %470 = arith.addf %468, %469 : vector<1x16xf32>
      %471 = arith.negf %470 : vector<1x16xf32>
      %472 = math.exp %471 : vector<1x16xf32>
      %cst_253 = arith.constant 1.000000e+00 : f32
      %473 = vector.broadcast %cst_253 : f32 to vector<1x16xf32>
      %474 = arith.addf %473, %472 : vector<1x16xf32>
      %475 = arith.divf %473, %474 : vector<1x16xf32>
      %476 = vector.extract_strided_slice %457 {offsets = [0, 32], sizes = [1, 16], strides = [1, 1]} : vector<1x48xf32> to vector<1x16xf32>
      %477 = vector.extract_strided_slice %459 {offsets = [0, 32], sizes = [1, 16], strides = [1, 1]} : vector<1x48xf32> to vector<1x16xf32>
      %478 = arith.mulf %467, %477 : vector<1x16xf32>
      %479 = arith.addf %476, %478 : vector<1x16xf32>
      %480 = math.tanh %479 : vector<1x16xf32>
      %cst_254 = arith.constant 1.000000e+00 : f32
      %481 = vector.broadcast %cst_254 : f32 to vector<1x16xf32>
      %482 = arith.subf %481, %475 : vector<1x16xf32>
      %483 = arith.mulf %482, %480 : vector<1x16xf32>
      %484 = arith.mulf %475, %arg48 : vector<1x16xf32>
      %485 = arith.addf %483, %484 : vector<1x16xf32>
      %486 = arith.index_cast %arg47 : i32 to index
      %c0_255 = arith.constant 0 : index
      %487 = vector.load %arg44[%486, %c0_255] : memref<8x16xf32, #tpu.memory_space<vmem>>, vector<1x16xf32>
      tpu.vector_store %arg44[%486, %c0_255], %485 {strides = array<i32>} : memref<8x16xf32, #tpu.memory_space<vmem>>, vector<1x16xf32>,
      scf.yield %485 : vector<1x16xf32>
    }
    %c8_i32_177 = arith.constant 8 : i32
    %c0_178 = arith.constant 0 : index
    %c0_179 = arith.constant 0 : index
    %369 = vector.load %arg44[%c0_178, %c0_179] : memref<8x16xf32, #tpu.memory_space<vmem>>, vector<8x16xf32>
    %c0_180 = arith.constant 0 : index
    %c0_181 = arith.constant 0 : index
    %370 = vector.load %arg22[%c0_180, %c0_181] : memref<16x48xf32, #tpu.memory_space<vmem>>, vector<16x48xf32>
    %cst_182 = arith.constant dense<0.000000e+00> : vector<8x48xf32>
    %371 = tpu.matmul %369, %370, %cst_182 {dimension_numbers = #tpu.dot_dimension_numbers<[1], [0], [0], [1], [0, 0, 1, 1], [], []>} : vector<8x16xf32>, vector<16x48xf32>, vector<8x48xf32> -> vector<8x48xf32>
    %c0_183 = arith.constant 0 : index
    %c0_184 = arith.constant 0 : index
    %372 = vector.load %arg24[%c0_183, %c0_184] : memref<1x48xf32, #tpu.memory_space<vmem>>, vector<1x48xf32>
    %373 = vector.broadcast %372 : vector<1x48xf32> to vector<8x48xf32>
    %374 = arith.addf %371, %373 : vector<8x48xf32>
    %c0_185 = arith.constant 0 : index
    %c0_186 = arith.constant 0 : index
    %375 = vector.load %arg46[%c0_185, %c0_186] : memref<8x48xf32, #tpu.memory_space<vmem>>, vector<8x48xf32>
    tpu.vector_store %arg46[%c0_185, %c0_186], %374 {strides = array<i32>} : memref<8x48xf32, #tpu.memory_space<vmem>>, vector<8x48xf32>,
    %c0_187 = arith.constant 0 : index
    %c0_188 = arith.constant 0 : index
    %376 = vector.load %arg23[%c0_187, %c0_188] : memref<16x48xf32, #tpu.memory_space<vmem>>, vector<16x48xf32>
    %c0_189 = arith.constant 0 : index
    %c0_190 = arith.constant 0 : index
    %377 = vector.load %arg25[%c0_189, %c0_190] : memref<1x48xf32, #tpu.memory_space<vmem>>, vector<1x48xf32>
    %cst_191 = arith.constant 0.000000e+00 : f32
    %378 = vector.broadcast %cst_191 : f32 to vector<1x16xf32>
    %cst_192 = arith.constant 0.000000e+00 : f32
    %379 = vector.broadcast %cst_192 : f32 to vector<1x16xf32>
    %c0_i32_193 = arith.constant 0 : i32
    %c8_i32_194 = arith.constant 8 : i32
    %380 = arith.addi %c0_i32_193, %c8_i32_194 : i32
    %c1_i32_195 = arith.constant 1 : i32
    %381:2 = scf.for %arg47 = %c0_i32_193 to %380 step %c1_i32_195 iter_args(%arg48 = %378, %arg49 = %379) -> (vector<1x16xf32>, vector<1x16xf32>)  : i32 {
      %456 = arith.index_cast %arg47 : i32 to index
      %c0_250 = arith.constant 0 : index
      %457 = vector.load %arg46[%456, %c0_250] : memref<8x48xf32, #tpu.memory_space<vmem>>, vector<1x48xf32>
      %cst_251 = arith.constant dense<0.000000e+00> : vector<1x48xf32>
      %458 = tpu.matmul %arg48, %376, %cst_251 {dimension_numbers = #tpu.dot_dimension_numbers<[1], [0], [0], [1], [0, 0, 1, 1], [], []>} : vector<1x16xf32>, vector<16x48xf32>, vector<1x48xf32> -> vector<1x48xf32>
      %459 = arith.addf %458, %377 : vector<1x48xf32>
      %460 = vector.extract_strided_slice %457 {offsets = [0, 0], sizes = [1, 16], strides = [1, 1]} : vector<1x48xf32> to vector<1x16xf32>
      %461 = vector.extract_strided_slice %459 {offsets = [0, 0], sizes = [1, 16], strides = [1, 1]} : vector<1x48xf32> to vector<1x16xf32>
      %462 = arith.addf %460, %461 : vector<1x16xf32>
      %463 = arith.negf %462 : vector<1x16xf32>
      %464 = math.exp %463 : vector<1x16xf32>
      %cst_252 = arith.constant 1.000000e+00 : f32
      %465 = vector.broadcast %cst_252 : f32 to vector<1x16xf32>
      %466 = arith.addf %465, %464 : vector<1x16xf32>
      %467 = arith.divf %465, %466 : vector<1x16xf32>
      %468 = vector.extract_strided_slice %457 {offsets = [0, 16], sizes = [1, 16], strides = [1, 1]} : vector<1x48xf32> to vector<1x16xf32>
      %469 = vector.extract_strided_slice %459 {offsets = [0, 16], sizes = [1, 16], strides = [1, 1]} : vector<1x48xf32> to vector<1x16xf32>
      %470 = arith.addf %468, %469 : vector<1x16xf32>
      %471 = arith.negf %470 : vector<1x16xf32>
      %472 = math.exp %471 : vector<1x16xf32>
      %cst_253 = arith.constant 1.000000e+00 : f32
      %473 = vector.broadcast %cst_253 : f32 to vector<1x16xf32>
      %474 = arith.addf %473, %472 : vector<1x16xf32>
      %475 = arith.divf %473, %474 : vector<1x16xf32>
      %476 = vector.extract_strided_slice %457 {offsets = [0, 32], sizes = [1, 16], strides = [1, 1]} : vector<1x48xf32> to vector<1x16xf32>
      %477 = vector.extract_strided_slice %459 {offsets = [0, 32], sizes = [1, 16], strides = [1, 1]} : vector<1x48xf32> to vector<1x16xf32>
      %478 = arith.mulf %467, %477 : vector<1x16xf32>
      %479 = arith.addf %476, %478 : vector<1x16xf32>
      %480 = math.tanh %479 : vector<1x16xf32>
      %cst_254 = arith.constant 1.000000e+00 : f32
      %481 = vector.broadcast %cst_254 : f32 to vector<1x16xf32>
      %482 = arith.subf %481, %475 : vector<1x16xf32>
      %483 = arith.mulf %482, %480 : vector<1x16xf32>
      %484 = arith.mulf %475, %arg48 : vector<1x16xf32>
      %485 = arith.addf %483, %484 : vector<1x16xf32>
      %486 = arith.addf %arg49, %485 : vector<1x16xf32>
      scf.yield %485, %486 : vector<1x16xf32>, vector<1x16xf32>
    }
    %c8_i32_196 = arith.constant 8 : i32
    %cst_197 = arith.constant 1.250000e-01 : f32
    %382 = vector.broadcast %cst_197 : f32 to vector<1x16xf32>
    %383 = arith.mulf %381#1, %382 : vector<1x16xf32>
    %384 = tpu.concatenate %381#0, %383 in 1 : vector<1x16xf32>, vector<1x16xf32> -> vector<1x32xf32>
    %c0_198 = arith.constant 0 : index
    %c0_199 = arith.constant 0 : index
    %385 = vector.load %arg26[%c0_198, %c0_199] : memref<32x512xf32, #tpu.memory_space<vmem>>, vector<32x512xf32>
    %cst_200 = arith.constant dense<0.000000e+00> : vector<1x512xf32>
    %386 = tpu.matmul %384, %385, %cst_200 {dimension_numbers = #tpu.dot_dimension_numbers<[1], [0], [0], [1], [0, 0, 1, 1], [], []>} : vector<1x32xf32>, vector<32x512xf32>, vector<1x512xf32> -> vector<1x512xf32>
    %c0_201 = arith.constant 0 : index
    %c0_202 = arith.constant 0 : index
    %387 = vector.load %arg27[%c0_201, %c0_202] : memref<1x512xf32, #tpu.memory_space<vmem>>, vector<1x512xf32>
    %388 = arith.addf %386, %387 : vector<1x512xf32>
    %cst_203 = arith.constant 0.000000e+00 : f32
    %389 = vector.broadcast %cst_203 : f32 to vector<1x512xf32>
    %390 = arith.maximumf %388, %389 : vector<1x512xf32>
    %c0_204 = arith.constant 0 : index
    %c0_205 = arith.constant 0 : index
    %391 = vector.load %arg28[%c0_204, %c0_205] : memref<1x512xf32, #tpu.memory_space<vmem>>, vector<1x512xf32>
    %cst_206 = arith.constant 0.999994993 : f32
    %392 = vector.broadcast %cst_206 : f32 to vector<1x512xf32>
    %393 = arith.mulf %391, %392 : vector<1x512xf32>
    %394 = arith.mulf %390, %393 : vector<1x512xf32>
    %c0_207 = arith.constant 0 : index
    %c0_208 = arith.constant 0 : index
    %395 = vector.load %arg29[%c0_207, %c0_208] : memref<1x512xf32, #tpu.memory_space<vmem>>, vector<1x512xf32>
    %396 = arith.addf %394, %395 : vector<1x512xf32>
    %c0_209 = arith.constant 0 : index
    %c0_210 = arith.constant 0 : index
    %397 = vector.load %arg30[%c0_209, %c0_210] : memref<512x256xf32, #tpu.memory_space<vmem>>, vector<512x256xf32>
    %cst_211 = arith.constant dense<0.000000e+00> : vector<1x256xf32>
    %398 = tpu.matmul %396, %397, %cst_211 {dimension_numbers = #tpu.dot_dimension_numbers<[1], [0], [0], [1], [0, 0, 1, 1], [], []>} : vector<1x512xf32>, vector<512x256xf32>, vector<1x256xf32> -> vector<1x256xf32>
    %c0_212 = arith.constant 0 : index
    %c0_213 = arith.constant 0 : index
    %399 = vector.load %arg31[%c0_212, %c0_213] : memref<1x256xf32, #tpu.memory_space<vmem>>, vector<1x256xf32>
    %400 = arith.addf %398, %399 : vector<1x256xf32>
    %cst_214 = arith.constant 0.000000e+00 : f32
    %401 = vector.broadcast %cst_214 : f32 to vector<1x256xf32>
    %402 = arith.maximumf %400, %401 : vector<1x256xf32>
    %c0_215 = arith.constant 0 : index
    %c0_216 = arith.constant 0 : index
    %403 = vector.load %arg32[%c0_215, %c0_216] : memref<1x256xf32, #tpu.memory_space<vmem>>, vector<1x256xf32>
    %cst_217 = arith.constant 0.999994993 : f32
    %404 = vector.broadcast %cst_217 : f32 to vector<1x256xf32>
    %405 = arith.mulf %403, %404 : vector<1x256xf32>
    %406 = arith.mulf %402, %405 : vector<1x256xf32>
    %c0_218 = arith.constant 0 : index
    %c0_219 = arith.constant 0 : index
    %407 = vector.load %arg33[%c0_218, %c0_219] : memref<1x256xf32, #tpu.memory_space<vmem>>, vector<1x256xf32>
    %408 = arith.addf %406, %407 : vector<1x256xf32>
    %c0_220 = arith.constant 0 : index
    %c0_221 = arith.constant 0 : index
    %409 = vector.load %arg34[%c0_220, %c0_221] : memref<256x128xf32, #tpu.memory_space<vmem>>, vector<256x128xf32>
    %cst_222 = arith.constant dense<0.000000e+00> : vector<1x128xf32>
    %410 = tpu.matmul %408, %409, %cst_222 {dimension_numbers = #tpu.dot_dimension_numbers<[1], [0], [0], [1], [0, 0, 1, 1], [], []>} : vector<1x256xf32>, vector<256x128xf32>, vector<1x128xf32> -> vector<1x128xf32>
    %c0_223 = arith.constant 0 : index
    %c0_224 = arith.constant 0 : index
    %411 = vector.load %arg35[%c0_223, %c0_224] : memref<1x128xf32, #tpu.memory_space<vmem>>, vector<1x128xf32>
    %412 = arith.addf %410, %411 : vector<1x128xf32>
    %cst_225 = arith.constant 0.000000e+00 : f32
    %413 = vector.broadcast %cst_225 : f32 to vector<1x128xf32>
    %414 = arith.maximumf %412, %413 : vector<1x128xf32>
    %c0_226 = arith.constant 0 : index
    %c0_227 = arith.constant 0 : index
    %415 = vector.load %arg36[%c0_226, %c0_227] : memref<1x128xf32, #tpu.memory_space<vmem>>, vector<1x128xf32>
    %cst_228 = arith.constant 0.999994993 : f32
    %416 = vector.broadcast %cst_228 : f32 to vector<1x128xf32>
    %417 = arith.mulf %415, %416 : vector<1x128xf32>
    %418 = arith.mulf %414, %417 : vector<1x128xf32>
    %c0_229 = arith.constant 0 : index
    %c0_230 = arith.constant 0 : index
    %419 = vector.load %arg37[%c0_229, %c0_230] : memref<1x128xf32, #tpu.memory_space<vmem>>, vector<1x128xf32>
    %420 = arith.addf %418, %419 : vector<1x128xf32>
    %c0_231 = arith.constant 0 : index
    %c0_232 = arith.constant 0 : index
    %421 = vector.load %arg38[%c0_231, %c0_232] : memref<128x64xf32, #tpu.memory_space<vmem>>, vector<128x64xf32>
    %cst_233 = arith.constant dense<0.000000e+00> : vector<1x64xf32>
    %422 = tpu.matmul %420, %421, %cst_233 {dimension_numbers = #tpu.dot_dimension_numbers<[1], [0], [0], [1], [0, 0, 1, 1], [], []>} : vector<1x128xf32>, vector<128x64xf32>, vector<1x64xf32> -> vector<1x64xf32>
    %c0_234 = arith.constant 0 : index
    %c0_235 = arith.constant 0 : index
    %423 = vector.load %arg39[%c0_234, %c0_235] : memref<1x64xf32, #tpu.memory_space<vmem>>, vector<1x64xf32>
    %424 = arith.addf %422, %423 : vector<1x64xf32>
    %cst_236 = arith.constant 0.000000e+00 : f32
    %425 = vector.broadcast %cst_236 : f32 to vector<1x64xf32>
    %426 = arith.maximumf %424, %425 : vector<1x64xf32>
    %c0_237 = arith.constant 0 : index
    %c0_238 = arith.constant 0 : index
    %427 = vector.load %arg40[%c0_237, %c0_238] : memref<64x4xf32, #tpu.memory_space<vmem>>, vector<64x4xf32>
    %cst_239 = arith.constant dense<0.000000e+00> : vector<1x4xf32>
    %428 = tpu.matmul %426, %427, %cst_239 {dimension_numbers = #tpu.dot_dimension_numbers<[1], [0], [0], [1], [0, 0, 1, 1], [], []>} : vector<1x64xf32>, vector<64x4xf32>, vector<1x4xf32> -> vector<1x4xf32>
    %c0_240 = arith.constant 0 : index
    %c0_241 = arith.constant 0 : index
    %429 = vector.load %arg41[%c0_240, %c0_241] : memref<1x4xf32, #tpu.memory_space<vmem>>, vector<1x4xf32>
    %430 = arith.addf %428, %429 : vector<1x4xf32>
    %431 = math.tanh %430 : vector<1x4xf32>
    %432 = arith.negf %430 : vector<1x4xf32>
    %433 = math.exp %432 : vector<1x4xf32>
    %cst_242 = arith.constant 1.000000e+00 : f32
    %434 = vector.broadcast %cst_242 : f32 to vector<1x4xf32>
    %435 = arith.addf %434, %433 : vector<1x4xf32>
    %436 = arith.divf %434, %435 : vector<1x4xf32>
    %437 = vector.extract_strided_slice %431 {offsets = [0, 0], sizes = [1, 1], strides = [1, 1]} : vector<1x4xf32> to vector<1x1xf32>
    %438 = vector.extract_strided_slice %431 {offsets = [0, 1], sizes = [1, 1], strides = [1, 1]} : vector<1x4xf32> to vector<1x1xf32>
    %439 = vector.extract_strided_slice %431 {offsets = [0, 3], sizes = [1, 1], strides = [1, 1]} : vector<1x4xf32> to vector<1x1xf32>
    %440 = vector.extract_strided_slice %436 {offsets = [0, 2], sizes = [1, 1], strides = [1, 1]} : vector<1x4xf32> to vector<1x1xf32>
    %cst_243 = arith.constant 4.000000e-01 : f32
    %441 = vector.broadcast %cst_243 : f32 to vector<1x1xf32>
    %442 = arith.mulf %441, %437 : vector<1x1xf32>
    %cst_244 = arith.constant 3.000000e-01 : f32
    %443 = vector.broadcast %cst_244 : f32 to vector<1x1xf32>
    %444 = arith.mulf %443, %438 : vector<1x1xf32>
    %445 = arith.addf %442, %444 : vector<1x1xf32>
    %cst_245 = arith.constant 2.000000e-01 : f32
    %446 = vector.broadcast %cst_245 : f32 to vector<1x1xf32>
    %447 = arith.mulf %446, %439 : vector<1x1xf32>
    %448 = arith.addf %445, %447 : vector<1x1xf32>
    %449 = arith.mulf %440, %437 : vector<1x1xf32>
    %cst_246 = arith.constant 1.000000e-01 : f32
    %450 = vector.broadcast %cst_246 : f32 to vector<1x1xf32>
    %451 = arith.mulf %450, %449 : vector<1x1xf32>
    %452 = arith.addf %448, %451 : vector<1x1xf32>
    %c0_247 = arith.constant 0 : index
    %c0_248 = arith.constant 0 : index
    %c0_249 = arith.constant 0 : index
    %453 = vector.load %arg42[%c0_247, %c0_248, %c0_249] : memref<1x1x1xf32, #tpu.memory_space<vmem>>, vector<1x1x1xf32>
    %454 = vector.shape_cast %453 : vector<1x1x1xf32> to vector<1x1xf32>
    %455 = vector.shape_cast %452 : vector<1x1xf32> to vector<1x1x1xf32>
    tpu.vector_store %arg42[%c0_247, %c0_248, %c0_249], %455 {strides = array<i32>} : memref<1x1x1xf32, #tpu.memory_space<vmem>>, vector<1x1x1xf32>,
    return
  }
  func.func @transform_0(%arg0: i32) -> (i32, i32, i32) {
    %c0_i32 = arith.constant 0 : i32
    %c0_i32_0 = arith.constant 0 : i32
    %c0_i32_1 = arith.constant 0 : i32
    return %arg0, %c0_i32, %c0_i32_0 : i32, i32, i32
  }
  func.func @transform_1(%arg0: i32) -> (i32, i32) {
    %c0_i32 = arith.constant 0 : i32
    %c0_i32_0 = arith.constant 0 : i32
    %c0_i32_1 = arith.constant 0 : i32
    return %c0_i32, %c0_i32_0 : i32, i32
  }
  func.func @transform_2(%arg0: i32) -> (i32, i32) {
    %c0_i32 = arith.constant 0 : i32
    %c0_i32_0 = arith.constant 0 : i32
    %c0_i32_1 = arith.constant 0 : i32
    return %c0_i32, %c0_i32_0 : i32, i32
  }
  func.func @transform_3(%arg0: i32) -> (i32, i32) {
    %c0_i32 = arith.constant 0 : i32
    %c0_i32_0 = arith.constant 0 : i32
    %c0_i32_1 = arith.constant 0 : i32
    return %c0_i32, %c0_i32_0 : i32, i32
  }
  func.func @transform_4(%arg0: i32) -> (i32, i32) {
    %c0_i32 = arith.constant 0 : i32
    %c0_i32_0 = arith.constant 0 : i32
    %c0_i32_1 = arith.constant 0 : i32
    return %c0_i32, %c0_i32_0 : i32, i32
  }
  func.func @transform_5(%arg0: i32) -> (i32, i32) {
    %c0_i32 = arith.constant 0 : i32
    %c0_i32_0 = arith.constant 0 : i32
    %c0_i32_1 = arith.constant 0 : i32
    return %c0_i32, %c0_i32_0 : i32, i32
  }
  func.func @transform_6(%arg0: i32) -> (i32, i32) {
    %c0_i32 = arith.constant 0 : i32
    %c0_i32_0 = arith.constant 0 : i32
    %c0_i32_1 = arith.constant 0 : i32
    return %c0_i32, %c0_i32_0 : i32, i32
  }
  func.func @transform_7(%arg0: i32) -> (i32, i32) {
    %c0_i32 = arith.constant 0 : i32
    %c0_i32_0 = arith.constant 0 : i32
    %c0_i32_1 = arith.constant 0 : i32
    return %c0_i32, %c0_i32_0 : i32, i32
  }
  func.func @transform_8(%arg0: i32) -> (i32, i32) {
    %c0_i32 = arith.constant 0 : i32
    %c0_i32_0 = arith.constant 0 : i32
    %c0_i32_1 = arith.constant 0 : i32
    return %c0_i32, %c0_i32_0 : i32, i32
  }
  func.func @transform_9(%arg0: i32) -> (i32, i32) {
    %c0_i32 = arith.constant 0 : i32
    %c0_i32_0 = arith.constant 0 : i32
    %c0_i32_1 = arith.constant 0 : i32
    return %c0_i32, %c0_i32_0 : i32, i32
  }
  func.func @transform_10(%arg0: i32) -> (i32, i32) {
    %c0_i32 = arith.constant 0 : i32
    %c0_i32_0 = arith.constant 0 : i32
    %c0_i32_1 = arith.constant 0 : i32
    return %c0_i32, %c0_i32_0 : i32, i32
  }
  func.func @transform_11(%arg0: i32) -> (i32, i32) {
    %c0_i32 = arith.constant 0 : i32
    %c0_i32_0 = arith.constant 0 : i32
    %c0_i32_1 = arith.constant 0 : i32
    return %c0_i32, %c0_i32_0 : i32, i32
  }
  func.func @transform_12(%arg0: i32) -> (i32, i32) {
    %c0_i32 = arith.constant 0 : i32
    %c0_i32_0 = arith.constant 0 : i32
    %c0_i32_1 = arith.constant 0 : i32
    return %c0_i32, %c0_i32_0 : i32, i32
  }
  func.func @transform_13(%arg0: i32) -> (i32, i32) {
    %c0_i32 = arith.constant 0 : i32
    %c0_i32_0 = arith.constant 0 : i32
    %c0_i32_1 = arith.constant 0 : i32
    return %c0_i32, %c0_i32_0 : i32, i32
  }
  func.func @transform_14(%arg0: i32) -> (i32, i32) {
    %c0_i32 = arith.constant 0 : i32
    %c0_i32_0 = arith.constant 0 : i32
    %c0_i32_1 = arith.constant 0 : i32
    return %c0_i32, %c0_i32_0 : i32, i32
  }
  func.func @transform_15(%arg0: i32) -> (i32, i32) {
    %c0_i32 = arith.constant 0 : i32
    %c0_i32_0 = arith.constant 0 : i32
    %c0_i32_1 = arith.constant 0 : i32
    return %c0_i32, %c0_i32_0 : i32, i32
  }
  func.func @transform_16(%arg0: i32) -> (i32, i32) {
    %c0_i32 = arith.constant 0 : i32
    %c0_i32_0 = arith.constant 0 : i32
    %c0_i32_1 = arith.constant 0 : i32
    return %c0_i32, %c0_i32_0 : i32, i32
  }
  func.func @transform_17(%arg0: i32) -> (i32, i32) {
    %c0_i32 = arith.constant 0 : i32
    %c0_i32_0 = arith.constant 0 : i32
    %c0_i32_1 = arith.constant 0 : i32
    return %c0_i32, %c0_i32_0 : i32, i32
  }
  func.func @transform_18(%arg0: i32) -> (i32, i32) {
    %c0_i32 = arith.constant 0 : i32
    %c0_i32_0 = arith.constant 0 : i32
    %c0_i32_1 = arith.constant 0 : i32
    return %c0_i32, %c0_i32_0 : i32, i32
  }
  func.func @transform_19(%arg0: i32) -> (i32, i32) {
    %c0_i32 = arith.constant 0 : i32
    %c0_i32_0 = arith.constant 0 : i32
    %c0_i32_1 = arith.constant 0 : i32
    return %c0_i32, %c0_i32_0 : i32, i32
  }
  func.func @transform_20(%arg0: i32) -> (i32, i32) {
    %c0_i32 = arith.constant 0 : i32
    %c0_i32_0 = arith.constant 0 : i32
    %c0_i32_1 = arith.constant 0 : i32
    return %c0_i32, %c0_i32_0 : i32, i32
  }
  func.func @transform_21(%arg0: i32) -> (i32, i32) {
    %c0_i32 = arith.constant 0 : i32
    %c0_i32_0 = arith.constant 0 : i32
    %c0_i32_1 = arith.constant 0 : i32
    return %c0_i32, %c0_i32_0 : i32, i32
  }
  func.func @transform_22(%arg0: i32) -> (i32, i32) {
    %c0_i32 = arith.constant 0 : i32
    %c0_i32_0 = arith.constant 0 : i32
    %c0_i32_1 = arith.constant 0 : i32
    return %c0_i32, %c0_i32_0 : i32, i32
  }
  func.func @transform_23(%arg0: i32) -> (i32, i32) {
    %c0_i32 = arith.constant 0 : i32
    %c0_i32_0 = arith.constant 0 : i32
    %c0_i32_1 = arith.constant 0 : i32
    return %c0_i32, %c0_i32_0 : i32, i32
  }
  func.func @transform_24(%arg0: i32) -> (i32, i32) {
    %c0_i32 = arith.constant 0 : i32
    %c0_i32_0 = arith.constant 0 : i32
    %c0_i32_1 = arith.constant 0 : i32
    return %c0_i32, %c0_i32_0 : i32, i32
  }
  func.func @transform_25(%arg0: i32) -> (i32, i32) {
    %c0_i32 = arith.constant 0 : i32
    %c0_i32_0 = arith.constant 0 : i32
    %c0_i32_1 = arith.constant 0 : i32
    return %c0_i32, %c0_i32_0 : i32, i32
  }
  func.func @transform_26(%arg0: i32) -> (i32, i32) {
    %c0_i32 = arith.constant 0 : i32
    %c0_i32_0 = arith.constant 0 : i32
    %c0_i32_1 = arith.constant 0 : i32
    return %c0_i32, %c0_i32_0 : i32, i32
  }
  func.func @transform_27(%arg0: i32) -> (i32, i32) {
    %c0_i32 = arith.constant 0 : i32
    %c0_i32_0 = arith.constant 0 : i32
    %c0_i32_1 = arith.constant 0 : i32
    return %c0_i32, %c0_i32_0 : i32, i32
  }
  func.func @transform_28(%arg0: i32) -> (i32, i32) {
    %c0_i32 = arith.constant 0 : i32
    %c0_i32_0 = arith.constant 0 : i32
    %c0_i32_1 = arith.constant 0 : i32
    return %c0_i32, %c0_i32_0 : i32, i32
  }
  func.func @transform_29(%arg0: i32) -> (i32, i32) {
    %c0_i32 = arith.constant 0 : i32
    %c0_i32_0 = arith.constant 0 : i32
    %c0_i32_1 = arith.constant 0 : i32
    return %c0_i32, %c0_i32_0 : i32, i32
  }
  func.func @transform_30(%arg0: i32) -> (i32, i32) {
    %c0_i32 = arith.constant 0 : i32
    %c0_i32_0 = arith.constant 0 : i32
    %c0_i32_1 = arith.constant 0 : i32
    return %c0_i32, %c0_i32_0 : i32, i32
  }
  func.func @transform_31(%arg0: i32) -> (i32, i32) {
    %c0_i32 = arith.constant 0 : i32
    %c0_i32_0 = arith.constant 0 : i32
    %c0_i32_1 = arith.constant 0 : i32
    return %c0_i32, %c0_i32_0 : i32, i32
  }
  func.func @transform_32(%arg0: i32) -> (i32, i32) {
    %c0_i32 = arith.constant 0 : i32
    %c0_i32_0 = arith.constant 0 : i32
    %c0_i32_1 = arith.constant 0 : i32
    return %c0_i32, %c0_i32_0 : i32, i32
  }
  func.func @transform_33(%arg0: i32) -> (i32, i32) {
    %c0_i32 = arith.constant 0 : i32
    %c0_i32_0 = arith.constant 0 : i32
    %c0_i32_1 = arith.constant 0 : i32
    return %c0_i32, %c0_i32_0 : i32, i32
  }
  func.func @transform_34(%arg0: i32) -> (i32, i32) {
    %c0_i32 = arith.constant 0 : i32
    %c0_i32_0 = arith.constant 0 : i32
    %c0_i32_1 = arith.constant 0 : i32
    return %c0_i32, %c0_i32_0 : i32, i32
  }
  func.func @transform_35(%arg0: i32) -> (i32, i32) {
    %c0_i32 = arith.constant 0 : i32
    %c0_i32_0 = arith.constant 0 : i32
    %c0_i32_1 = arith.constant 0 : i32
    return %c0_i32, %c0_i32_0 : i32, i32
  }
  func.func @transform_36(%arg0: i32) -> (i32, i32) {
    %c0_i32 = arith.constant 0 : i32
    %c0_i32_0 = arith.constant 0 : i32
    %c0_i32_1 = arith.constant 0 : i32
    return %c0_i32, %c0_i32_0 : i32, i32
  }
  func.func @transform_37(%arg0: i32) -> (i32, i32) {
    %c0_i32 = arith.constant 0 : i32
    %c0_i32_0 = arith.constant 0 : i32
    %c0_i32_1 = arith.constant 0 : i32
    return %c0_i32, %c0_i32_0 : i32, i32
  }
  func.func @transform_38(%arg0: i32) -> (i32, i32) {
    %c0_i32 = arith.constant 0 : i32
    %c0_i32_0 = arith.constant 0 : i32
    %c0_i32_1 = arith.constant 0 : i32
    return %c0_i32, %c0_i32_0 : i32, i32
  }
  func.func @transform_39(%arg0: i32) -> (i32, i32) {
    %c0_i32 = arith.constant 0 : i32
    %c0_i32_0 = arith.constant 0 : i32
    %c0_i32_1 = arith.constant 0 : i32
    return %c0_i32, %c0_i32_0 : i32, i32
  }
  func.func @transform_40(%arg0: i32) -> (i32, i32) {
    %c0_i32 = arith.constant 0 : i32
    %c0_i32_0 = arith.constant 0 : i32
    %c0_i32_1 = arith.constant 0 : i32
    return %c0_i32, %c0_i32_0 : i32, i32
  }
  func.func @transform_41(%arg0: i32) -> (i32, i32, i32) {
    %c0_i32 = arith.constant 0 : i32
    %c0_i32_0 = arith.constant 0 : i32
    %c0_i32_1 = arith.constant 0 : i32
    return %arg0, %c0_i32, %c0_i32_0 : i32, i32, i32
  }
}

</mosaic_0001>

<bundles_post_ra>
// kernel: marea_forward.1
= control target key start
LH: loop header
LB: loop body
LE: loop exit
PB: predicated region body
PF: predicated region fallthrough
CT: control target
= control target key end

     0   :  { %s7012_s6 = smov 1   ;;  %s7013_s10 = smov 2   ;;  %s8323_s0 = inlined_call_operand.smem [shape: u32[42], index: -1, kind: input, shape index: {}] }
   0x1   :  { %s7159_s5 = sld [smem:[%s8323_s0]]   ;;  %s7014_s14 = smov 3  }
   0x2   :  { %s7164_s9 = sld [smem:[%s8323_s0 + %s7012_s6]]   ;;  %s7015_s18 = smov 4  }
   0x3   :  { %s7169_s13 = sld [smem:[%s8323_s0 + %s7013_s10]]   ;;  %s7016_s22 = smov 5  }
   0x4   :  { %s7174_s17 = sld [smem:[%s8323_s0 + %s7014_s14]]   ;;  %s7017_s26 = smov 6  }
   0x5   :  { %s7179_s21 = sld [smem:[%s8323_s0 + %s7015_s18]]   ;;  %s7018_s30 = smov 7  }
   0x6   :  { %s7184_s25 = sld [smem:[%s8323_s0 + %s7016_s22]]   ;;  %s7019_s4 = smov 8  }
   0x7   :  { %8374 = sst [smem:[#allocation73_spill]] %s7159_s5  ;;  %s7020_s10 = smov 9  }
   0x8   :  { %8375 = sst [smem:[#allocation74_spill]] %s7164_s9  ;;  %s7021_s15 = smov 10  }
   0x9   :  { %8376 = sst [smem:[#allocation75_spill]] %s7169_s13  ;;  %s7022_s20 = smov 11  }
   0xa   :  { %s7189_s29 = sld [smem:[%s8323_s0 + %s7017_s26]]   ;;  %s7023_s26 = smov 12  }
   0xb   :  { %8377 = sst [smem:[#allocation76_spill]] %s7179_s21  ;;  %s7024_s1 = smov 13  }
   0xc   :  { %8378 = sst [smem:[#allocation77_spill]] %s7184_s25  ;;  %s7025_s7 = smov 14  }
   0xd   :  { %s7194_s3 = sld [smem:[%s8323_s0 + %s7018_s30]]   ;;  %s7027_s22 = smov 16  }
   0xe   :  { %s7199_s8 = sld [smem:[%s8323_s0 + %s7019_s4]]   ;;  %s7028_s28 = smov 17  }
   0xf   :  { %s7204_s14 = sld [smem:[%s8323_s0 + %s7020_s10]]  }
  0x10   :  { %8379 = sst [smem:[#allocation78_spill]] %s7189_s29 }
  0x11   :  { %s7209_s19 = sld [smem:[%s8323_s0 + %s7021_s15]]   ;;  %s7026_s15 = smov 15  }
  0x12   :  { %s7214_s24 = sld [smem:[%s8323_s0 + %s7022_s20]]  }
  0x13   :  { %8380 = sst [smem:[#allocation79_spill]] %s7194_s3 }
  0x14   :  { %8381 = sst [smem:[#allocation80_spill]] %s7199_s8 }
  0x15   :  { %s7219_s30 = sld [smem:[%s8323_s0 + %s7023_s26]]  }
  0x16   :  { %s7224_s6 = sld [smem:[%s8323_s0 + %s7024_s1]]  }
  0x17   :  { %8382 = sst [smem:[#allocation81_spill]] %s7209_s19 }
  0x18   :  { %s7229_s12 = sld [smem:[%s8323_s0 + %s7025_s7]]   ;;  %s7029_s7 = smov 18  }
  0x19   :  { %s7234_s20 = sld [smem:[%s8323_s0 + %s7026_s15]]   ;;  %s7030_s15 = smov 19  }
  0x1a   :  { %s7239_s27 = sld [smem:[%s8323_s0 + %s7027_s22]]   ;;  %s7031_s22 = smov 20  }
  0x1b   :  { %8383 = sst [smem:[#allocation82_spill]] %s7219_s30 }
  0x1c   :  { %8384 = sst [smem:[#allocation83_spill]] %s7224_s6 }
  0x1d   :  { %s7244_s4 = sld [smem:[%s8323_s0 + %s7028_s28]]   ;;  %s7032_s28 = smov 21  }
  0x1e   :  { %8385 = sst [smem:[#allocation84_spill]] %s7229_s12 }
  0x1f   :  { %s7249_s29 = sld [smem:[%s8323_s0 + %s7029_s7]]   ;;  %s7033_s7 = smov 22  }
  0x20   :  { %8386 = sst [smem:[#allocation85_spill]] %s7239_s27 }
  0x21   :  { %s7254_s25 = sld [smem:[%s8323_s0 + %s7030_s15]]   ;;  %s7034_s15 = smov 23  }
  0x22   :  { %s7259_s9 = sld [smem:[%s8323_s0 + %s7031_s22]]   ;;  %s7035_s22 = smov 24  }
  0x23   :  { %8387 = sst [smem:[#allocation86_spill]] %s7244_s4 }
  0x24   :  { %s7264_s13 = sld [smem:[%s8323_s0 + %s7032_s28]]   ;;  %s7036_s28 = smov 25  }
  0x25   :  { %8388 = sst [smem:[#allocation87_spill]] %s7249_s29 }
  0x26   :  { %s7269_s5 = sld [smem:[%s8323_s0 + %s7033_s7]]   ;;  %s7037_s7 = smov 26  }
  0x27   :  { %s7274_s29 = sld [smem:[%s8323_s0 + %s7034_s15]]   ;;  %s7038_s15 = smov 27  }
  0x28   :  { %8389 = sst [smem:[#allocation88_spill]] %s7259_s9 }
  0x29   :  { %s7279_s9 = sld [smem:[%s8323_s0 + %s7035_s22]]   ;;  %s7039_s22 = smov 28  }
  0x2a   :  { %8390 = sst [smem:[#allocation89_spill]] %s7264_s13 }
  0x2b   :  { %s7284_s27 = sld [smem:[%s8323_s0 + %s7036_s28]]   ;;  %s7040_s28 = smov 29  }
  0x2c   :  { %8391 = sst [smem:[#allocation90_spill]] %s7269_s5 }
  0x2d   :  { %s7289_s5 = sld [smem:[%s8323_s0 + %s7037_s7]]   ;;  %s7041_s7 = smov 30  }
  0x2e   :  { %s7294_s12 = sld [smem:[%s8323_s0 + %s7038_s15]]   ;;  %s7042_s15 = smov 31  }
  0x2f   :  { %8392 = sst [smem:[#allocation91_spill]] %s7279_s9 }
  0x30   :  { %s7299_s9 = sld [smem:[%s8323_s0 + %s7039_s22]]   ;;  %s7043_s22 = smov 32  }
  0x31   :  { %8393 = sst [smem:[#allocation92_spill]] %s7284_s27 }
  0x32   :  { %s7304_s27 = sld [smem:[%s8323_s0 + %s7040_s28]]   ;;  %s7044_s28 = smov 33  }
  0x33   :  { %8394 = sst [smem:[#allocation93_spill]] %s7289_s5 }
  0x34   :  { %8395 = sst [smem:[#allocation94_spill]] %s7294_s12 }
  0x35   :  { %s7309_s30 = sld [smem:[%s8323_s0 + %s7041_s7]]   ;;  %s7045_s7 = smov 34  }
  0x36   :  { %8396 = sst [smem:[#allocation95_spill]] %s7299_s9 }
  0x37   :  { %s7314_s12 = sld [smem:[%s8323_s0 + %s7042_s15]]   ;;  %s7046_s15 = smov 35  }
  0x38   :  { %8397 = sst [smem:[#allocation96_spill]] %s7304_s27 }
  0x39   :  { %s7319_s19 = sld [smem:[%s8323_s0 + %s7043_s22]]   ;;  %s7047_s22 = smov 36  }
  0x3a   :  { %s7324_s27 = sld [smem:[%s8323_s0 + %s7044_s28]]   ;;  %s7048_s28 = smov 37  }
  0x3b   :  { %8398 = sst [smem:[#allocation97_spill]] %s7309_s30 }
  0x3c   :  { %s7329_s30 = sld [smem:[%s8323_s0 + %s7045_s7]]   ;;  %s7049_s7 = smov 38  }
  0x3d   :  { %8399 = sst [smem:[#allocation98_spill]] %s7314_s12 }
  0x3e   :  { %s7334_s8 = sld [smem:[%s8323_s0 + %s7046_s15]]   ;;  %s7050_s15 = smov 39  }
  0x3f   :  { %8400 = sst [smem:[#allocation99_spill]] %s7319_s19 }
  0x40   :  { %s7339_s19 = sld [smem:[%s8323_s0 + %s7047_s22]]   ;;  %s7051_s22 = smov 40  }
  0x41   :  { %s7344_s21 = sld [smem:[%s8323_s0 + %s7048_s28]]   ;;  %s7052_s28 = smov 41  }
  0x42   :  { %8401 = sst [smem:[#allocation100_spill]] %s7329_s30 }
  0x43   :  { %s7349_s30 = sld [smem:[%s8323_s0 + %s7049_s7]]  }
  0x44   :  { %8402 = sst [smem:[#allocation101_spill]] %s7334_s8 }
  0x45   :  { %s7354_s8 = sld [smem:[%s8323_s0 + %s7050_s15]]  }
  0x46   :  { %8403 = sst [smem:[#allocation102_spill]] %s7339_s19 }
  0x47   :  { %8404 = sst [smem:[#allocation103_spill]] %s7344_s21 }
  0x48   :  { %s7359_s19 = sld [smem:[%s8323_s0 + %s7051_s22]]  }
  0x49   :  { %s7364_s21 = sld [smem:[%s8323_s0 + %s7052_s28]]  }
  0x4b   :  { %8405 = sst [smem:[#allocation104_spill]] %s7354_s8 }
  0x4f   :  { %8406 = sst [smem:[#allocation105_spill]] %s7364_s21 }
  0x50   :  { %88 = vsyncpa [#allocation7], 0 }
  0x51   :  { %90 = vsyncpa [#allocation7 + $0x1], 0 }
  0x52   :  { %91 = vsyncpa [#allocation9], 0 }
  0x53   :  { %92 = vsyncpa [#allocation12], 0 }
  0x54   :  { %93 = vsyncpa [#allocation15], 0 }
  0x55   :  { %94 = vsyncpa [#allocation18], 0 }
  0x56   :  { %95 = vsyncpa [#allocation21], 0 }
  0x57   :  { %96 = vsyncpa [#allocation24], 0 }
  0x58   :  { %97 = vsyncpa [#allocation27], 0 }
  0x59   :  { %98 = vsyncpa [#allocation30], 0 }
  0x5a   :  { %99 = vsyncpa [#allocation33], 0 }
  0x5b   :  { %100 = vsyncpa [#allocation36], 0 }
  0x5c   :  { %101 = vsyncpa [#allocation39], 0 }
  0x5d   :  { %102 = vsyncpa [#allocation42], 0 }
  0x5e   :  { %103 = vsyncpa [#allocation45], 0 }
  0x5f   :  { %104 = vsyncpa [#allocation48], 0 }
  0x60   :  { %105 = vsyncpa [#allocation51], 0 }
  0x61   :  { %106 = vsyncpa [#allocation54], 0  ;;  %s7366_s0 = smov 0   ;;  %s7368_s7 = smov 0  }
  0x62   :  { %s7370_s10 = smov 0   ;;  %s7372_s11 = smov 0  }
  0x63 LB: > { %s8407_s13 = sld [smem:[#allocation89_spill]]  ;;  %s7385_s15 = sadd.s32 4294967295, %s6966_s11   ;;  %s6962_s10 = sphi %s7370_s10, %s8460_s10   ;;  %s6958_s7 = sphi %s7368_s7, %s8459_s7   ;;  %s6954_s0 = sphi %s7366_s0, %s8457_s0   ;;  %s6966_s11 = sphi %s7372_s11, %s8456_s11  }
  0x64   : > { %s8408_s12 = sld [smem:[#allocation98_spill]]  ;;  %s7388_s16 = sadd.s32 1, %s6966_s11  }
  0x65   : > { %s8409_s9 = sld [smem:[#allocation95_spill]]  ;;  %s116_s18 = ssub.s32 %s6966_s11, %s7388_s16 }
  0x66   : > { %s8410_s6 = sld [smem:[#allocation83_spill]]  ;;  %s119_s22 = sadd.s32 1, %s6962_s10 }
  0x67   : > { %s8411_s5 = sld [smem:[#allocation93_spill]]  ;;  %p117_p0 = scmp.eq.s32.totalorder %s116_s18, 0 }
  0x68   : > { %s8412_s4 = sld [smem:[#allocation86_spill]]  ;;  %p126_p1 = scmp.ne.s32.totalorder %s6962_s10, %s6958_s7 }
  0x69   : > { %s8413_s3 = sld [smem:[#allocation79_spill]]  ;;  %p127_p2 = scmp.eq.s32.totalorder %s6966_s11, 0 }
  0x6a   : > { %8414 = sst [smem:[#allocation106_spill]] %s6958_s7  ;;  %p132_p3 = scmp.ne.s32.totalorder %s6958_s7, %s6954_s0 }
  0x6b   : > { %8415 = sst [smem:[#allocation107_spill]] %s7388_s16  ;;  %p7400_p4 = por %p127_p2, %p126_p1 }
  0x6c   : > { %s7398_s23 = scalar_select %p117_p0, %s6962_s10, %s119_s22  }
  0x6d   : > { %p133_p5 = scmp.eq.s32.totalorder %s7385_s15, 0  ;;  %p5159_p6 = scmp.ge.s32.totalorder %s6966_s11, 1 }
  0x6e   : > { %8416 = sst [smem:[#allocation108_spill]] %s7398_s23  ;;  %p1009_p7 = scmp.lt.s32.totalorder %s6966_s11, 3 }
  0x6f   : > { %p7409_p8 = por %p133_p5, %p132_p3 }
  0x70   : > { %p7413_p9 = pnand %p5159_p6, %p1009_p7 }
  0x71   : > { %s8418_s28 = scalar_select %p7409_p8, 1, 0 }
  0x72   : > { %1013 = sbr.rel (%p7413_p9) target bundleno = 534 (0x216), region = 12  ;;  %s1027_s2 = sshll.u32 (!%p7413_p9), %s7174_s17, 4  ;;  %s1028_s2 = int_to_ptr.hbm [resolvable:$true] %s1027_s2 }
  0x73   : > { %8419 = sst [smem:[#allocation109_spill]] %s8418_s28  ;;  %s7053_s0 = smov (!%p7413_p9), [#allocation8]  }
  0x74   : > { %s1029_s18 = sshll.u32 (!%p7413_p9), %s7053_s0, 4  ;;  %s1057_s22 = sshll.u32 (!%p7413_p9), %s8413_s3, 4  ;;  %s1030_s18 = int_to_ptr.vmem [resolvable:$true] %s1029_s18  ;;  %s7421_s22 = int_to_ptr.hbm [resolvable:$true] %s1057_s22 }
  0x75   : > { %s5898_s23 = sshra.s32 (!%p7413_p9), %s1028_s2, 4  ;;  %s5904_s8 = scalar_lea.hbm (!%p7413_p9), %s7174_s17, 1  ;;  %s5899_s23 = int_to_ptr.hbm [resolvable:$true] %s5898_s23 }
  0x76   : > { %s5900_s16 = scalar_lea.hbm (!%p7413_p9), %s5899_s23, 1  ;;  %p5905_p13 = scmp.lt.s32.totalorder (!%p7413_p9), %s5899_s23, %s7174_s17 }
  0x77   : > { %p5901_p10 = scmp.ne.s32.totalorder %s5899_s23, %s5900_s16  ;;  %p5906_p0 = scmp.lt.s32.totalorder %s5904_s8, %s5900_s16 }
  0x79   : > { %p5902_p11 = pnand %p5901_p10, %p133_p5  ;;  %p5907_p1 = por %p5906_p0, %p5905_p13 }
  0x7b   : > { %p5903_p12 = pneg %p5902_p11 }
  0x7d   : > { %p5908_p2 = pnand %p5907_p1, %p5903_p12 }
  0x7f   : > { %5911 = shalt.err (!%p5908_p2)
}
  0x80   : > { %5334 = dma.hbm_to_vmem [thread:$0]  (%p133_p5), %s1028_s2, 16, %s1030_s18, [#allocation9]  }
  0x81   : > { %s1080_s0 = sshll.u32 %s7204_s14, 4  ;;  %s7054_s21 = smov [#allocation11]   ;;  %s7430_s0 = int_to_ptr.hbm [resolvable:$true] %s1080_s0 }
  0x82   : > { %s1059_s28 = sshll.u32 %s7054_s21, 4  ;;  %s5926_s7 = sshra.s32 %s7421_s22, 4  ;;  %s1060_s28 = int_to_ptr.vmem [resolvable:$true] %s1059_s28  ;;  %s5927_s7 = int_to_ptr.hbm [resolvable:$true] %s5926_s7 }
  0x83   : > { %s5928_s8 = scalar_lea.hbm %s5927_s7, 1  ;;  %s5932_s16 = scalar_lea.hbm %s8413_s3, 1 }
  0x84   : > { %p5929_p3 = scmp.ne.s32.totalorder %s5927_s7, %s5928_s8  ;;  %p5933_p10 = scmp.lt.s32.totalorder %s5927_s7, %s8413_s3 }
  0x85   : > { %p5934_p11 = scmp.lt.s32.totalorder %s5932_s16, %s5928_s8 }
  0x86   : > { %p5930_p6 = pnand %p5929_p3, %p133_p5 }
  0x87   : > { %p5935_p12 = por %p5934_p11, %p5933_p10 }
  0x88   : > { %p5931_p7 = pneg %p5930_p6 }
  0x8a   : > { %p5936_p13 = pnand %p5935_p12, %p5931_p7 }
  0x8c   : > { %5939 = shalt.err (!%p5936_p13)
}
  0x8d   : > { %5338 = dma.hbm_to_vmem [thread:$0]  (%p133_p5), %s7421_s22, 16, %s1060_s28, [#allocation12]  }
  0x8e   : > { %s7055_s21 = smov [#allocation14]   ;;  %s5954_s2 = sshra.s32 %s7430_s0, 4  ;;  %s5955_s2 = int_to_ptr.hbm [resolvable:$true] %s5954_s2 }
  0x8f   : > { %s1082_s23 = sshll.u32 %s7055_s21, 4  ;;  %s5956_s18 = scalar_lea.hbm %s5955_s2, 32  ;;  %s1083_s23 = int_to_ptr.vmem [resolvable:$true] %s1082_s23 }
  0x90   : > { %p5957_p0 = scmp.ne.s32.totalorder %s5955_s2, %s5956_s18  ;;  %s5960_s7 = scalar_lea.hbm %s7204_s14, 32 }
  0x91   : > { %p5961_p3 = scmp.lt.s32.totalorder %s5955_s2, %s7204_s14  ;;  %p5962_p6 = scmp.lt.s32.totalorder %s5960_s7, %s5956_s18 }
  0x92   : > { %p5958_p1 = pnand %p5957_p0, %p133_p5 }
  0x93   : > { %p5963_p7 = por %p5962_p6, %p5961_p3 }
  0x94   : > { %p5959_p2 = pneg %p5958_p1 }
  0x96   : > { %p5964_p10 = pnand %p5963_p7, %p5959_p2 }
  0x98   : > { %5967 = shalt.err (!%p5964_p10)
}
  0x99   : > { %s8353_s8 = smov 128   ;;  %s8355_s28 = smov 8  }
  0x9a   : > { %5342 = dma.hbm_to_vmem [thread:$0]  (%p133_p5), %s7430_s0, 512, %s1083_s23, [#allocation15], %s8353_s8, %s8353_s8, %s8355_s28  }
  0x9b   : > { %s1109_s22 = sshll.u32 %s7214_s24, 4  ;;  %s7058_s16 = smov [#allocation17]   ;;  %s1110_s22 = int_to_ptr.hbm [resolvable:$true] %s1109_s22 }
  0x9c   : > { %s1111_s21 = sshll.u32 %s7058_s16, 4  ;;  %s1132_s2 = sshll.u32 %s8410_s6, 4  ;;  %s1112_s21 = int_to_ptr.vmem [resolvable:$true] %s1111_s21  ;;  %s1133_s2 = int_to_ptr.hbm [resolvable:$true] %s1132_s2 }
  0x9d   : > { %s5982_s18 = sshra.s32 %s1110_s22, 4  ;;  %s5988_s3 = scalar_lea.hbm %s7214_s24, 1  ;;  %s5983_s18 = int_to_ptr.hbm [resolvable:$true] %s5982_s18 }
  0x9e   : > { %s5984_s7 = scalar_lea.hbm %s5983_s18, 1  ;;  %p5989_p0 = scmp.lt.s32.totalorder %s5983_s18, %s7214_s24 }
  0x9f   : > { %p5985_p11 = scmp.ne.s32.totalorder %s5983_s18, %s5984_s7  ;;  %p5990_p1 = scmp.lt.s32.totalorder %s5988_s3, %s5984_s7 }
  0xa1   : > { %p5986_p12 = pnand %p5985_p11, %p133_p5  ;;  %p5991_p2 = por %p5990_p1, %p5989_p0 }
  0xa3   : > { %p5987_p13 = pneg %p5986_p12 }
  0xa5   : > { %p5992_p3 = pnand %p5991_p2, %p5987_p13 }
  0xa7   : > { %5995 = shalt.err (!%p5992_p3)
}
  0xa8   : > { %5346 = dma.hbm_to_vmem [thread:$0]  (%p133_p5), %s1110_s22, 16, %s1112_s21, [#allocation18]  }
  0xa9   : > { %s7059_s0 = smov [#allocation20]   ;;  %s1158_s16 = sshll.u32 %s7234_s20, 4  ;;  %s7460_s16 = int_to_ptr.hbm [resolvable:$true] %s1158_s16 }
  0xaa   : > { %s1134_s23 = sshll.u32 %s7059_s0, 4  ;;  %s6010_s8 = sshra.s32 %s1133_s2, 4  ;;  %s1135_s23 = int_to_ptr.vmem [resolvable:$true] %s1134_s23  ;;  %s6011_s8 = int_to_ptr.hbm [resolvable:$true] %s6010_s8 }
  0xab   : > { %s6012_s3 = scalar_lea.hbm %s6011_s8, 32  ;;  %s6016_s18 = scalar_lea.hbm %s8410_s6, 32 }
  0xac   : > { %p6013_p6 = scmp.ne.s32.totalorder %s6011_s8, %s6012_s3  ;;  %p6017_p11 = scmp.lt.s32.totalorder %s6011_s8, %s8410_s6 }
  0xad   : > { %p6018_p12 = scmp.lt.s32.totalorder %s6016_s18, %s6012_s3 }
  0xae   : > { %p6014_p7 = pnand %p6013_p6, %p133_p5 }
  0xaf   : > { %p6019_p13 = por %p6018_p12, %p6017_p11 }
  0xb0   : > { %p6015_p10 = pneg %p6014_p7 }
  0xb2   : > { %p6020_p0 = pnand %p6019_p13, %p6015_p10 }
  0xb4   : > { %6023 = shalt.err (!%p6020_p0)
}
  0xb5   : > { %s8421_s22 = smov 128   ;;  %s1184_s21 = sshll.u32 %s8412_s4, 4  ;;  %s7472_s21 = int_to_ptr.hbm [resolvable:$true] %s1184_s21 }
  0xb6   : > { %5350 = dma.hbm_to_vmem [thread:$0]  (%p133_p5), %s1133_s2, 512, %s1135_s23, [#allocation21], %s8421_s22, %s8421_s22, %s8355_s28  }
  0xb7   : > { %s7060_s7 = smov [#allocation23]   ;;  %s6038_s8 = sshra.s32 %s7460_s16, 4  ;;  %s6039_s8 = int_to_ptr.hbm [resolvable:$true] %s6038_s8 }
  0xb8   : > { %s1160_s0 = sshll.u32 %s7060_s7, 4  ;;  %s6040_s3 = scalar_lea.hbm %s6039_s8, 32  ;;  %s1161_s0 = int_to_ptr.vmem [resolvable:$true] %s1160_s0 }
  0xb9   : > { %p6041_p1 = scmp.ne.s32.totalorder %s6039_s8, %s6040_s3  ;;  %s6044_s18 = scalar_lea.hbm %s7234_s20, 32 }
  0xba   : > { %p6045_p6 = scmp.lt.s32.totalorder %s6039_s8, %s7234_s20  ;;  %p6046_p7 = scmp.lt.s32.totalorder %s6044_s18, %s6040_s3 }
  0xbb   : > { %p6042_p2 = pnand %p6041_p1, %p133_p5 }
  0xbc   : > { %p6047_p10 = por %p6046_p7, %p6045_p6 }
  0xbd   : > { %p6043_p3 = pneg %p6042_p2 }
  0xbf   : > { %p6048_p11 = pnand %p6047_p10, %p6043_p3 }
  0xc1   : > { %6051 = shalt.err (!%p6048_p11)
}
  0xc2   : > { %5354 = dma.hbm_to_vmem [thread:$0]  (%p133_p5), %s7460_s16, 512, %s1161_s0, [#allocation24], %s8421_s22, %s8421_s22, %s8355_s28  }
  0xc3   : > { %s7061_s2 = smov [#allocation26]   ;;  %s1213_s7 = sshll.u32 %s7254_s25, 4  ;;  %s7486_s7 = int_to_ptr.hbm [resolvable:$true] %s1213_s7 }
  0xc4   : > { %s1186_s23 = sshll.u32 %s7061_s2, 4  ;;  %s6066_s8 = sshra.s32 %s7472_s21, 4  ;;  %s1187_s23 = int_to_ptr.vmem [resolvable:$true] %s1186_s23  ;;  %s6067_s8 = int_to_ptr.hbm [resolvable:$true] %s6066_s8 }
  0xc5   : > { %s6068_s3 = scalar_lea.hbm %s6067_s8, 32  ;;  %s6072_s18 = scalar_lea.hbm %s8412_s4, 32 }
  0xc6   : > { %p6069_p12 = scmp.ne.s32.totalorder %s6067_s8, %s6068_s3  ;;  %p6073_p1 = scmp.lt.s32.totalorder %s6067_s8, %s8412_s4 }
  0xc7   : > { %p6074_p2 = scmp.lt.s32.totalorder %s6072_s18, %s6068_s3 }
  0xc8   : > { %p6070_p13 = pnand %p6069_p12, %p133_p5 }
  0xc9   : > { %p6075_p3 = por %p6074_p2, %p6073_p1 }
  0xca   : > { %p6071_p0 = pneg %p6070_p13 }
  0xcc   : > { %p6076_p6 = pnand %p6075_p3, %p6071_p0 }
  0xce   : > { %6079 = shalt.err (!%p6076_p6)
}
  0xcf   : > { %5358 = dma.hbm_to_vmem [thread:$0]  (%p133_p5), %s7472_s21, 512, %s1187_s23, [#allocation27], %s8421_s22, %s8421_s22, %s8355_s28  }
  0xd0   : > { %s1236_s16 = sshll.u32 %s8407_s13, 4  ;;  %s7062_s0 = smov [#allocation29]   ;;  %s7500_s16 = int_to_ptr.hbm [resolvable:$true] %s1236_s16 }
  0xd1   : > { %s1215_s2 = sshll.u32 %s7062_s0, 4  ;;  %s6094_s8 = sshra.s32 %s7486_s7, 4  ;;  %s1216_s2 = int_to_ptr.vmem [resolvable:$true] %s1215_s2  ;;  %s6095_s8 = int_to_ptr.hbm [resolvable:$true] %s6094_s8 }
  0xd2   : > { %s6096_s3 = scalar_lea.hbm %s6095_s8, 1  ;;  %s6100_s18 = scalar_lea.hbm %s7254_s25, 1 }
  0xd3   : > { %p6097_p7 = scmp.ne.s32.totalorder %s6095_s8, %s6096_s3  ;;  %p6101_p12 = scmp.lt.s32.totalorder %s6095_s8, %s7254_s25 }
  0xd4   : > { %p6102_p13 = scmp.lt.s32.totalorder %s6100_s18, %s6096_s3 }
  0xd5   : > { %p6098_p10 = pnand %p6097_p7, %p133_p5 }
  0xd6   : > { %p6103_p0 = por %p6102_p13, %p6101_p12 }
  0xd7   : > { %p6099_p11 = pneg %p6098_p10 }
  0xd9   : > { %p6104_p1 = pnand %p6103_p0, %p6099_p11 }
  0xdb   : > { %6107 = shalt.err (!%p6104_p1)
}
  0xdc   : > { %5362 = dma.hbm_to_vmem [thread:$0]  (%p133_p5), %s7486_s7, 16, %s1216_s2, [#allocation30]  }
  0xdd   : > { %s7063_s21 = smov [#allocation32]   ;;  %s1265_s0 = sshll.u32 %s7274_s29, 4  ;;  %s7511_s0 = int_to_ptr.hbm [resolvable:$true] %s1265_s0 }
  0xde   : > { %s1238_s23 = sshll.u32 %s7063_s21, 4  ;;  %s6122_s8 = sshra.s32 %s7500_s16, 4  ;;  %s1239_s23 = int_to_ptr.vmem [resolvable:$true] %s1238_s23  ;;  %s6123_s8 = int_to_ptr.hbm [resolvable:$true] %s6122_s8 }
  0xdf   : > { %s6124_s3 = scalar_lea.hbm %s6123_s8, 16  ;;  %s6128_s18 = scalar_lea.hbm %s8407_s13, 16 }
  0xe0   : > { %p6125_p2 = scmp.ne.s32.totalorder %s6123_s8, %s6124_s3  ;;  %p6129_p7 = scmp.lt.s32.totalorder %s6123_s8, %s8407_s13 }
  0xe1   : > { %p6130_p10 = scmp.lt.s32.totalorder %s6128_s18, %s6124_s3 }
  0xe2   : > { %p6126_p3 = pnand %p6125_p2, %p133_p5 }
  0xe3   : > { %p6131_p11 = por %p6130_p10, %p6129_p7 }
  0xe4   : > { %p6127_p6 = pneg %p6126_p3 }
  0xe6   : > { %p6132_p12 = pnand %p6131_p11, %p6127_p6 }
  0xe8   : > { %6135 = shalt.err (!%p6132_p12)
}
  0xe9   : > { %5366 = dma.hbm_to_vmem [thread:$0]  (%p133_p5), %s7500_s16, 256, %s1239_s23, [#allocation33], %s8421_s22, %s8421_s22, %s8355_s28  }
  0xea   : > { %s1292_s7 = sshll.u32 %s8411_s5, 4  ;;  %s7064_s2 = smov [#allocation35]   ;;  %s7525_s7 = int_to_ptr.hbm [resolvable:$true] %s1292_s7 }
  0xeb   : > { %s1267_s21 = sshll.u32 %s7064_s2, 4  ;;  %s6150_s8 = sshra.s32 %s7511_s0, 4  ;;  %s1268_s21 = int_to_ptr.vmem [resolvable:$true] %s1267_s21  ;;  %s6151_s8 = int_to_ptr.hbm [resolvable:$true] %s6150_s8 }
  0xec   : > { %s6152_s3 = scalar_lea.hbm %s6151_s8, 1  ;;  %s6156_s18 = scalar_lea.hbm %s7274_s29, 1 }
  0xed   : > { %p6153_p13 = scmp.ne.s32.totalorder %s6151_s8, %s6152_s3  ;;  %p6157_p2 = scmp.lt.s32.totalorder %s6151_s8, %s7274_s29 }
  0xee   : > { %p6158_p3 = scmp.lt.s32.totalorder %s6156_s18, %s6152_s3 }
  0xef   : > { %p6154_p0 = pnand %p6153_p13, %p133_p5 }
  0xf0   : > { %p6159_p6 = por %p6158_p3, %p6157_p2 }
  0xf1   : > { %p6155_p1 = pneg %p6154_p0 }
  0xf3   : > { %p6160_p7 = pnand %p6159_p6, %p6155_p1 }
  0xf5   : > { %6163 = shalt.err (!%p6160_p7)
}
  0xf6   : > { %5370 = dma.hbm_to_vmem [thread:$0]  (%p133_p5), %s7511_s0, 16, %s1268_s21, [#allocation36]  }
  0xf7   : > { %s7065_s16 = smov [#allocation38]   ;;  %s1316_s2 = sshll.u32 %s8409_s9, 4  ;;  %s7536_s2 = int_to_ptr.hbm [resolvable:$true] %s1316_s2 }
  0xf8   : > { %s1294_s23 = sshll.u32 %s7065_s16, 4  ;;  %s6178_s8 = sshra.s32 %s7525_s7, 4  ;;  %s1295_s23 = int_to_ptr.vmem [resolvable:$true] %s1294_s23  ;;  %s6179_s8 = int_to_ptr.hbm [resolvable:$true] %s6178_s8 }
  0xf9   : > { %s6180_s3 = scalar_lea.hbm %s6179_s8, 4  ;;  %s6184_s18 = scalar_lea.hbm %s8411_s5, 4 }
  0xfa   : > { %p6181_p10 = scmp.ne.s32.totalorder %s6179_s8, %s6180_s3  ;;  %p6185_p13 = scmp.lt.s32.totalorder %s6179_s8, %s8411_s5 }
  0xfb   : > { %p6186_p0 = scmp.lt.s32.totalorder %s6184_s18, %s6180_s3 }
  0xfc   : > { %p6182_p11 = pnand %p6181_p10, %p133_p5 }
  0xfd   : > { %p6187_p1 = por %p6186_p0, %p6185_p13 }
  0xfe   : > { %p6183_p12 = pneg %p6182_p11 }
 0x100   : > { %p6188_p2 = pnand %p6187_p1, %p6183_p12 }
 0x102   : > { %6191 = shalt.err (!%p6188_p2)
}
 0x103   : > { %5374 = dma.hbm_to_vmem [thread:$0]  (%p133_p5), %s7525_s7, 64, %s1295_s23, [#allocation39]  }
 0x104   : > { %s1345_s0 = sshll.u32 %s8408_s12, 4  ;;  %s7066_s21 = smov [#allocation41]   ;;  %s7547_s0 = int_to_ptr.hbm [resolvable:$true] %s1345_s0 }
 0x105   : > { %s1318_s16 = sshll.u32 %s7066_s21, 4  ;;  %s6206_s8 = sshra.s32 %s7536_s2, 4  ;;  %s1319_s16 = int_to_ptr.vmem [resolvable:$true] %s1318_s16  ;;  %s6207_s8 = int_to_ptr.hbm [resolvable:$true] %s6206_s8 }
 0x106   : > { %s6208_s3 = scalar_lea.hbm %s6207_s8, 4  ;;  %s6212_s18 = scalar_lea.hbm %s8409_s9, 4 }
 0x107   : > { %p6209_p3 = scmp.ne.s32.totalorder %s6207_s8, %s6208_s3  ;;  %p6213_p10 = scmp.lt.s32.totalorder %s6207_s8, %s8409_s9 }
 0x108   : > { %p6214_p11 = scmp.lt.s32.totalorder %s6212_s18, %s6208_s3 }
 0x109   : > { %p6210_p6 = pnand %p6209_p3, %p133_p5 }
 0x10a   : > { %p6215_p12 = por %p6214_p11, %p6213_p10 }
 0x10b   : > { %p6211_p7 = pneg %p6210_p6 }
 0x10d   : > { %p6216_p13 = pnand %p6215_p12, %p6211_p7 }
 0x10f   : > { %6219 = shalt.err (!%p6216_p13)
}
 0x110   : > { %5378 = dma.hbm_to_vmem [thread:$0]  (%p133_p5), %s7536_s2, 64, %s1319_s16, [#allocation42]  }
 0x111   : > { %s7067_s7 = smov [#allocation44]   ;;  %s1368_s21 = sshll.u32 %s7324_s27, 4  ;;  %s7558_s21 = int_to_ptr.hbm [resolvable:$true] %s1368_s21 }
 0x112   : > { %s1347_s23 = sshll.u32 %s7067_s7, 4  ;;  %s6234_s8 = sshra.s32 %s7547_s0, 4  ;;  %s1348_s23 = int_to_ptr.vmem [resolvable:$true] %s1347_s23  ;;  %s6235_s8 = int_to_ptr.hbm [resolvable:$true] %s6234_s8 }
 0x113   : > { %s6236_s3 = scalar_lea.hbm %s6235_s8, 2  ;;  %s6240_s18 = scalar_lea.hbm %s8408_s12, 2 }
 0x114   : > { %p6237_p0 = scmp.ne.s32.totalorder %s6235_s8, %s6236_s3  ;;  %p6241_p3 = scmp.lt.s32.totalorder %s6235_s8, %s8408_s12 }
 0x115   : > { %p6242_p6 = scmp.lt.s32.totalorder %s6240_s18, %s6236_s3 }
 0x116   : > { %p6238_p1 = pnand %p6237_p0, %p133_p5 }
 0x117   : > { %p6243_p7 = por %p6242_p6, %p6241_p3 }
 0x118   : > { %p6239_p2 = pneg %p6238_p1 }
 0x11a   : > { %p6244_p10 = pnand %p6243_p7, %p6239_p2 }
 0x11c   : > { %6247 = shalt.err (!%p6244_p10)
}
 0x11d   : > { %s8422_s2 = sld [smem:[#allocation101_spill]]  ;;  %s7068_s7 = smov [#allocation47]  }
 0x11e   : > { %5382 = dma.hbm_to_vmem [thread:$0]  (%p133_p5), %s7547_s0, 32, %s1348_s23, [#allocation45]  }
 0x11f   : > { %s1370_s28 = sshll.u32 %s7068_s7, 4  ;;  %s6262_s8 = sshra.s32 %s7558_s21, 4  ;;  %s1371_s28 = int_to_ptr.vmem [resolvable:$true] %s1370_s28  ;;  %s6263_s8 = int_to_ptr.hbm [resolvable:$true] %s6262_s8 }
 0x120   : > { %s6264_s3 = scalar_lea.hbm %s6263_s8, 256  ;;  %s6268_s18 = scalar_lea.hbm %s7324_s27, 256 }
 0x121   : > { %p6265_p11 = scmp.ne.s32.totalorder %s6263_s8, %s6264_s3  ;;  %p6269_p0 = scmp.lt.s32.totalorder %s6263_s8, %s7324_s27 }
 0x122   : > { %p6270_p1 = scmp.lt.s32.totalorder %s6268_s18, %s6264_s3 }
 0x123   : > { %s1395_s16 = sshll.u32 %s8422_s2, 4  ;;  %p6266_p12 = pnand %p6265_p11, %p133_p5  ;;  %s7569_s16 = int_to_ptr.hbm [resolvable:$true] %s1395_s16 }
 0x124   : > { %p6271_p2 = por %p6270_p1, %p6269_p0 }
 0x125   : > { %p6267_p13 = pneg %p6266_p12 }
 0x127   : > { %p6272_p3 = pnand %p6271_p2, %p6267_p13 }
 0x129   : > { %6275 = shalt.err (!%p6272_p3)
}
 0x12a   : > { %s8423_s0 = smov 8   ;;  %s7069_s23 = smov [#allocation50]  }
 0x12b   : > { %5386 = dma.hbm_to_vmem [thread:$0]  (%p133_p5), %s7558_s21, 4096, %s1371_s28, [#allocation48], %s8421_s22, %s8421_s22, %s8423_s0  }
 0x12c   : > { %s1397_s7 = sshll.u32 %s7069_s23, 4  ;;  %s1422_s4 = sshll.u32 %s7349_s30, 4  ;;  %s1398_s7 = int_to_ptr.vmem [resolvable:$true] %s1397_s7  ;;  %s7583_s4 = int_to_ptr.hbm [resolvable:$true] %s1422_s4 }
 0x12d   : > { %s6290_s8 = sshra.s32 %s7569_s16, 4  ;;  %s6296_s18 = scalar_lea.hbm %s8422_s2, 1  ;;  %s6291_s8 = int_to_ptr.hbm [resolvable:$true] %s6290_s8 }
 0x12e   : > { %s6292_s3 = scalar_lea.hbm %s6291_s8, 1  ;;  %p6297_p11 = scmp.lt.s32.totalorder %s6291_s8, %s8422_s2 }
 0x12f   : > { %p6293_p6 = scmp.ne.s32.totalorder %s6291_s8, %s6292_s3  ;;  %p6298_p12 = scmp.lt.s32.totalorder %s6296_s18, %s6292_s3 }
 0x131   : > { %p6294_p7 = pnand %p6293_p6, %p133_p5  ;;  %p6299_p13 = por %p6298_p12, %p6297_p11 }
 0x133   : > { %p6295_p10 = pneg %p6294_p7 }
 0x135   : > { %p6300_p0 = pnand %p6299_p13, %p6295_p10 }
 0x137   : > { %6303 = shalt.err (!%p6300_p0)
}
 0x138   : > { %s8424_s28 = sld [smem:[#allocation76_spill]]  ;;  %s7070_s23 = smov [#allocation53]  }
 0x139   : > { %5390 = dma.hbm_to_vmem [thread:$0]  (%p133_p5), %s7569_s16, 16, %s1398_s7, [#allocation51]  }
 0x13a   : > { %s1424_s5 = sshll.u32 %s7070_s23, 4  ;;  %s6318_s8 = sshra.s32 %s7583_s4, 4  ;;  %s1425_s5 = int_to_ptr.vmem [resolvable:$true] %s1424_s5  ;;  %s6319_s8 = int_to_ptr.hbm [resolvable:$true] %s6318_s8 }
 0x13b   : > { %s6320_s3 = scalar_lea.hbm %s6319_s8, 1  ;;  %s6324_s18 = scalar_lea.hbm %s7349_s30, 1 }
 0x13c   : > { %p6321_p1 = scmp.ne.s32.totalorder %s6319_s8, %s6320_s3  ;;  %p6325_p6 = scmp.lt.s32.totalorder %s6319_s8, %s7349_s30 }
 0x13d   : > { %p6326_p7 = scmp.lt.s32.totalorder %s6324_s18, %s6320_s3 }
 0x13e   : > { %s1039_s21 = sshll.u32 %s8424_s28, 4  ;;  %p6322_p2 = pnand %p6321_p1, %p133_p5  ;;  %s7594_s21 = int_to_ptr.hbm [resolvable:$true] %s1039_s21 }
 0x13f   : > { %p6327_p10 = por %p6326_p7, %p6325_p6 }
 0x140   : > { %p6323_p3 = pneg %p6322_p2 }
 0x142   : > { %p6328_p11 = pnand %p6327_p10, %p6323_p3 }
 0x144   : > { %6331 = shalt.err (!%p6328_p11)
}
 0x145   : > { %s8425_s16 = sld [smem:[#allocation80_spill]]  ;;  %s7071_s7 = smov [#allocation10]  }
 0x146   : > { %5394 = dma.hbm_to_vmem [thread:$0]  (%p133_p5), %s7583_s4, 16, %s1425_s5, [#allocation54]  }
 0x147   : > { %s1041_s23 = sshll.u32 %s7071_s7, 4  ;;  %s6346_s8 = sshra.s32 %s7594_s21, 4  ;;  %s1042_s23 = int_to_ptr.vmem [resolvable:$true] %s1041_s23  ;;  %s6347_s8 = int_to_ptr.hbm [resolvable:$true] %s6346_s8 }
 0x148   : > { %s6348_s3 = scalar_lea.hbm %s6347_s8, 1  ;;  %s6352_s18 = scalar_lea.hbm %s8424_s28, 1 }
 0x149   : > { %p6349_p12 = scmp.ne.s32.totalorder %s6347_s8, %s6348_s3  ;;  %p6353_p1 = scmp.lt.s32.totalorder %s6347_s8, %s8424_s28 }
 0x14a   : > { %p6354_p2 = scmp.lt.s32.totalorder %s6352_s18, %s6348_s3 }
 0x14b   : > { %s1069_s2 = sshll.u32 %s8425_s16, 4  ;;  %p6350_p13 = pnand %p6349_p12, %p133_p5  ;;  %s7605_s2 = int_to_ptr.hbm [resolvable:$true] %s1069_s2 }
 0x14c   : > { %p6355_p3 = por %p6354_p2, %p6353_p1 }
 0x14d   : > { %p6351_p0 = pneg %p6350_p13 }
 0x14f   : > { %p6356_p6 = pnand %p6355_p3, %p6351_p0 }
 0x151   : > { %6359 = shalt.err (!%p6356_p6)
}
 0x152   : > { %s8426_s5 = sld [smem:[#allocation81_spill]]  ;;  %s7072_s7 = smov [#allocation13]  }
 0x153   : > { %5336 = dma.hbm_to_vmem [thread:$0]  (%p133_p5), %s7594_s21, 16, %s1042_s23, [#allocation9]  }
 0x154   : > { %s1071_s6 = sshll.u32 %s7072_s7, 4  ;;  %s6374_s8 = sshra.s32 %s7605_s2, 4  ;;  %s1072_s6 = int_to_ptr.vmem [resolvable:$true] %s1071_s6  ;;  %s6375_s8 = int_to_ptr.hbm [resolvable:$true] %s6374_s8 }
 0x155   : > { %s6376_s3 = scalar_lea.hbm %s6375_s8, 1  ;;  %s6380_s18 = scalar_lea.hbm %s8425_s16, 1 }
 0x156   : > { %p6377_p7 = scmp.ne.s32.totalorder %s6375_s8, %s6376_s3  ;;  %p6381_p12 = scmp.lt.s32.totalorder %s6375_s8, %s8425_s16 }
 0x157   : > { %p6382_p13 = scmp.lt.s32.totalorder %s6380_s18, %s6376_s3 }
 0x158   : > { %s1094_s4 = sshll.u32 %s8426_s5, 4  ;;  %p6378_p10 = pnand %p6377_p7, %p133_p5  ;;  %s7616_s4 = int_to_ptr.hbm [resolvable:$true] %s1094_s4 }
 0x159   : > { %p6383_p0 = por %p6382_p13, %p6381_p12 }
 0x15a   : > { %p6379_p11 = pneg %p6378_p10 }
 0x15c   : > { %p6384_p1 = pnand %p6383_p0, %p6379_p11 }
 0x15e   : > { %6387 = shalt.err (!%p6384_p1)
}
 0x15f   : > { %s8427_s21 = sld [smem:[#allocation82_spill]]  ;;  %s7073_s23 = smov [#allocation16]  }
 0x160   : > { %5340 = dma.hbm_to_vmem [thread:$0]  (%p133_p5), %s7605_s2, 16, %s1072_s6, [#allocation12]  }
 0x161   : > { %s1096_s7 = sshll.u32 %s7073_s23, 4  ;;  %s6402_s8 = sshra.s32 %s7616_s4, 4  ;;  %s1097_s7 = int_to_ptr.vmem [resolvable:$true] %s1096_s7  ;;  %s6403_s8 = int_to_ptr.hbm [resolvable:$true] %s6402_s8 }
 0x162   : > { %s6404_s3 = scalar_lea.hbm %s6403_s8, 32  ;;  %s6408_s18 = scalar_lea.hbm %s8426_s5, 32 }
 0x163   : > { %p6405_p2 = scmp.ne.s32.totalorder %s6403_s8, %s6404_s3  ;;  %p6409_p7 = scmp.lt.s32.totalorder %s6403_s8, %s8426_s5 }
 0x164   : > { %p6410_p10 = scmp.lt.s32.totalorder %s6408_s18, %s6404_s3 }
 0x165   : > { %s1121_s9 = sshll.u32 %s8427_s21, 4  ;;  %p6406_p3 = pnand %p6405_p2, %p133_p5  ;;  %s7627_s9 = int_to_ptr.hbm [resolvable:$true] %s1121_s9 }
 0x166   : > { %p6411_p11 = por %p6410_p10, %p6409_p7 }
 0x167   : > { %p6407_p6 = pneg %p6406_p3 }
 0x169   : > { %p6412_p12 = pnand %p6411_p11, %p6407_p6 }
 0x16b   : > { %6415 = shalt.err (!%p6412_p12)
}
 0x16c   : > { %s8428_s6 = sld [smem:[#allocation84_spill]]  ;;  %s7074_s23 = smov [#allocation19]  }
 0x16d   : > { %5344 = dma.hbm_to_vmem [thread:$0]  (%p133_p5), %s7616_s4, 512, %s1097_s7, [#allocation15], %s8421_s22, %s8421_s22, %s8423_s0  }
 0x16e   : > { %s1123_s12 = sshll.u32 %s7074_s23, 4  ;;  %s6430_s8 = sshra.s32 %s7627_s9, 4  ;;  %s1124_s12 = int_to_ptr.vmem [resolvable:$true] %s1123_s12  ;;  %s6431_s8 = int_to_ptr.hbm [resolvable:$true] %s6430_s8 }
 0x16f   : > { %s6432_s3 = scalar_lea.hbm %s6431_s8, 1  ;;  %s6436_s18 = scalar_lea.hbm %s8427_s21, 1 }
 0x170   : > { %p6433_p13 = scmp.ne.s32.totalorder %s6431_s8, %s6432_s3  ;;  %p6437_p2 = scmp.lt.s32.totalorder %s6431_s8, %s8427_s21 }
 0x171   : > { %p6438_p3 = scmp.lt.s32.totalorder %s6436_s18, %s6432_s3 }
 0x172   : > { %s1147_s2 = sshll.u32 %s8428_s6, 4  ;;  %p6434_p0 = pnand %p6433_p13, %p133_p5  ;;  %s7641_s2 = int_to_ptr.hbm [resolvable:$true] %s1147_s2 }
 0x173   : > { %p6439_p6 = por %p6438_p3, %p6437_p2 }
 0x174   : > { %p6435_p1 = pneg %p6434_p0 }
 0x176   : > { %p6440_p7 = pnand %p6439_p6, %p6435_p1 }
 0x178   : > { %6443 = shalt.err (!%p6440_p7)
}
 0x179   : > { %s8429_s4 = sld [smem:[#allocation85_spill]]  ;;  %s7075_s7 = smov [#allocation22]  }
 0x17a   : > { %5348 = dma.hbm_to_vmem [thread:$0]  (%p133_p5), %s7627_s9, 16, %s1124_s12, [#allocation18]  }
 0x17b   : > { %s1149_s23 = sshll.u32 %s7075_s7, 4  ;;  %s6458_s8 = sshra.s32 %s7641_s2, 4  ;;  %s1150_s23 = int_to_ptr.vmem [resolvable:$true] %s1149_s23  ;;  %s6459_s8 = int_to_ptr.hbm [resolvable:$true] %s6458_s8 }
 0x17c   : > { %s6460_s3 = scalar_lea.hbm %s6459_s8, 1  ;;  %s6464_s18 = scalar_lea.hbm %s8428_s6, 1 }
 0x17d   : > { %p6461_p10 = scmp.ne.s32.totalorder %s6459_s8, %s6460_s3  ;;  %p6465_p13 = scmp.lt.s32.totalorder %s6459_s8, %s8428_s6 }
 0x17e   : > { %p6466_p0 = scmp.lt.s32.totalorder %s6464_s18, %s6460_s3 }
 0x17f   : > { %s1173_s5 = sshll.u32 %s8429_s4, 4  ;;  %p6462_p11 = pnand %p6461_p10, %p133_p5  ;;  %s7652_s5 = int_to_ptr.hbm [resolvable:$true] %s1173_s5 }
 0x180   : > { %p6467_p1 = por %p6466_p0, %p6465_p13 }
 0x181   : > { %p6463_p12 = pneg %p6462_p11 }
 0x183   : > { %p6468_p2 = pnand %p6467_p1, %p6463_p12 }
 0x185   : > { %6471 = shalt.err (!%p6468_p2)
}
 0x186   : > { %s8430_s9 = sld [smem:[#allocation87_spill]]  ;;  %s7076_s7 = smov [#allocation25]  }
 0x187   : > { %5352 = dma.hbm_to_vmem [thread:$0]  (%p133_p5), %s7641_s2, 16, %s1150_s23, [#allocation21]  }
 0x188   : > { %s1175_s13 = sshll.u32 %s7076_s7, 4  ;;  %s6486_s8 = sshra.s32 %s7652_s5, 4  ;;  %s1176_s13 = int_to_ptr.vmem [resolvable:$true] %s1175_s13  ;;  %s6487_s8 = int_to_ptr.hbm [resolvable:$true] %s6486_s8 }
 0x189   : > { %s6488_s3 = scalar_lea.hbm %s6487_s8, 1  ;;  %s6492_s18 = scalar_lea.hbm %s8429_s4, 1 }
 0x18a   : > { %p6489_p3 = scmp.ne.s32.totalorder %s6487_s8, %s6488_s3  ;;  %p6493_p10 = scmp.lt.s32.totalorder %s6487_s8, %s8429_s4 }
 0x18b   : > { %p6494_p11 = scmp.lt.s32.totalorder %s6492_s18, %s6488_s3 }
 0x18c   : > { %s1198_s12 = sshll.u32 %s8430_s9, 4  ;;  %p6490_p6 = pnand %p6489_p3, %p133_p5  ;;  %s7663_s12 = int_to_ptr.hbm [resolvable:$true] %s1198_s12 }
 0x18d   : > { %p6495_p12 = por %p6494_p11, %p6493_p10 }
 0x18e   : > { %p6491_p7 = pneg %p6490_p6 }
 0x190   : > { %p6496_p13 = pnand %p6495_p12, %p6491_p7 }
 0x192   : > { %6499 = shalt.err (!%p6496_p13)
}
 0x193   : > { %s8431_s2 = sld [smem:[#allocation88_spill]]  ;;  %s7077_s23 = smov [#allocation28]  }
 0x194   : > { %5356 = dma.hbm_to_vmem [thread:$0]  (%p133_p5), %s7652_s5, 16, %s1176_s13, [#allocation24]  }
 0x195   : > { %s1200_s7 = sshll.u32 %s7077_s23, 4  ;;  %s6514_s8 = sshra.s32 %s7663_s12, 4  ;;  %s1201_s7 = int_to_ptr.vmem [resolvable:$true] %s1200_s7  ;;  %s6515_s8 = int_to_ptr.hbm [resolvable:$true] %s6514_s8 }
 0x196   : > { %s6516_s3 = scalar_lea.hbm %s6515_s8, 16  ;;  %s6520_s18 = scalar_lea.hbm %s8430_s9, 16 }
 0x197   : > { %p6517_p0 = scmp.ne.s32.totalorder %s6515_s8, %s6516_s3  ;;  %p6521_p3 = scmp.lt.s32.totalorder %s6515_s8, %s8430_s9 }
 0x198   : > { %p6522_p6 = scmp.lt.s32.totalorder %s6520_s18, %s6516_s3 }
 0x199   : > { %s1225_s6 = sshll.u32 %s8431_s2, 4  ;;  %p6518_p1 = pnand %p6517_p0, %p133_p5  ;;  %s7674_s6 = int_to_ptr.hbm [resolvable:$true] %s1225_s6 }
 0x19a   : > { %p6523_p7 = por %p6522_p6, %p6521_p3 }
 0x19b   : > { %p6519_p2 = pneg %p6518_p1 }
 0x19d   : > { %p6524_p10 = pnand %p6523_p7, %p6519_p2 }
 0x19f   : > { %6527 = shalt.err (!%p6524_p10)
}
 0x1a0   : > { %s8432_s13 = sld [smem:[#allocation90_spill]]  ;;  %s7078_s23 = smov [#allocation31]  }
 0x1a1   : > { %5360 = dma.hbm_to_vmem [thread:$0]  (%p133_p5), %s7663_s12, 256, %s1201_s7, [#allocation27], %s8421_s22, %s8421_s22, %s8423_s0  }
 0x1a2   : > { %s1227_s4 = sshll.u32 %s7078_s23, 4  ;;  %s6542_s8 = sshra.s32 %s7674_s6, 4  ;;  %s1228_s4 = int_to_ptr.vmem [resolvable:$true] %s1227_s4  ;;  %s6543_s8 = int_to_ptr.hbm [resolvable:$true] %s6542_s8 }
 0x1a3   : > { %s6544_s3 = scalar_lea.hbm %s6543_s8, 1  ;;  %s6548_s18 = scalar_lea.hbm %s8431_s2, 1 }
 0x1a4   : > { %p6545_p11 = scmp.ne.s32.totalorder %s6543_s8, %s6544_s3  ;;  %p6549_p0 = scmp.lt.s32.totalorder %s6543_s8, %s8431_s2 }
 0x1a5   : > { %p6550_p1 = scmp.lt.s32.totalorder %s6548_s18, %s6544_s3 }
 0x1a6   : > { %s1250_s5 = sshll.u32 %s8432_s13, 4  ;;  %p6546_p12 = pnand %p6545_p11, %p133_p5  ;;  %s7688_s5 = int_to_ptr.hbm [resolvable:$true] %s1250_s5 }
 0x1a7   : > { %p6551_p2 = por %p6550_p1, %p6549_p0 }
 0x1a8   : > { %p6547_p13 = pneg %p6546_p12 }
 0x1aa   : > { %p6552_p3 = pnand %p6551_p2, %p6547_p13 }
 0x1ac   : > { %6555 = shalt.err (!%p6552_p3)
}
 0x1ad   : > { %s8433_s12 = sld [smem:[#allocation91_spill]]  ;;  %s7079_s7 = smov [#allocation34]  }
 0x1ae   : > { %5364 = dma.hbm_to_vmem [thread:$0]  (%p133_p5), %s7674_s6, 16, %s1228_s4, [#allocation30]  }
 0x1af   : > { %s1252_s23 = sshll.u32 %s7079_s7, 4  ;;  %s6570_s8 = sshra.s32 %s7688_s5, 4  ;;  %s1253_s23 = int_to_ptr.vmem [resolvable:$true] %s1252_s23  ;;  %s6571_s8 = int_to_ptr.hbm [resolvable:$true] %s6570_s8 }
 0x1b0   : > { %s6572_s3 = scalar_lea.hbm %s6571_s8, 16  ;;  %s6576_s18 = scalar_lea.hbm %s8432_s13, 16 }
 0x1b1   : > { %p6573_p6 = scmp.ne.s32.totalorder %s6571_s8, %s6572_s3  ;;  %p6577_p11 = scmp.lt.s32.totalorder %s6571_s8, %s8432_s13 }
 0x1b2   : > { %p6578_p12 = scmp.lt.s32.totalorder %s6576_s18, %s6572_s3 }
 0x1b3   : > { %s1277_s9 = sshll.u32 %s8433_s12, 4  ;;  %p6574_p7 = pnand %p6573_p6, %p133_p5  ;;  %s7699_s9 = int_to_ptr.hbm [resolvable:$true] %s1277_s9 }
 0x1b4   : > { %p6579_p13 = por %p6578_p12, %p6577_p11 }
 0x1b5   : > { %p6575_p10 = pneg %p6574_p7 }
 0x1b7   : > { %p6580_p0 = pnand %p6579_p13, %p6575_p10 }
 0x1b9   : > { %6583 = shalt.err (!%p6580_p0)
}
 0x1ba   : > { %s8434_s6 = sld [smem:[#allocation94_spill]]  ;;  %s7080_s7 = smov [#allocation37]  }
 0x1bb   : > { %5368 = dma.hbm_to_vmem [thread:$0]  (%p133_p5), %s7688_s5, 256, %s1253_s23, [#allocation33], %s8421_s22, %s8421_s22, %s8423_s0  }
 0x1bc   : > { %s1279_s2 = sshll.u32 %s7080_s7, 4  ;;  %s6598_s8 = sshra.s32 %s7699_s9, 4  ;;  %s1280_s2 = int_to_ptr.vmem [resolvable:$true] %s1279_s2  ;;  %s6599_s8 = int_to_ptr.hbm [resolvable:$true] %s6598_s8 }
 0x1bd   : > { %s6600_s3 = scalar_lea.hbm %s6599_s8, 1  ;;  %s6604_s18 = scalar_lea.hbm %s8433_s12, 1 }
 0x1be   : > { %p6601_p1 = scmp.ne.s32.totalorder %s6599_s8, %s6600_s3  ;;  %p6605_p6 = scmp.lt.s32.totalorder %s6599_s8, %s8433_s12 }
 0x1bf   : > { %p6606_p7 = scmp.lt.s32.totalorder %s6604_s18, %s6600_s3 }
 0x1c0   : > { %s1304_s4 = sshll.u32 %s8434_s6, 4  ;;  %p6602_p2 = pnand %p6601_p1, %p133_p5  ;;  %s7713_s4 = int_to_ptr.hbm [resolvable:$true] %s1304_s4 }
 0x1c1   : > { %p6607_p10 = por %p6606_p7, %p6605_p6 }
 0x1c2   : > { %p6603_p3 = pneg %p6602_p2 }
 0x1c4   : > { %p6608_p11 = pnand %p6607_p10, %p6603_p3 }
 0x1c6   : > { %6611 = shalt.err (!%p6608_p11)
}
 0x1c7   : > { %s8435_s22 = sld [smem:[#allocation96_spill]]  ;;  %s7081_s0 = smov [#allocation40]  }
 0x1c8   : > { %5372 = dma.hbm_to_vmem [thread:$0]  (%p133_p5), %s7699_s9, 16, %s1280_s2, [#allocation36]  }
 0x1c9   : > { %s1306_s5 = sshll.u32 %s7081_s0, 4  ;;  %s6626_s7 = sshra.s32 %s7713_s4, 4  ;;  %s1307_s5 = int_to_ptr.vmem [resolvable:$true] %s1306_s5  ;;  %s6627_s7 = int_to_ptr.hbm [resolvable:$true] %s6626_s7 }
 0x1ca   : > { %s6628_s8 = scalar_lea.hbm %s6627_s7, 4  ;;  %s6632_s3 = scalar_lea.hbm %s8434_s6, 4 }
 0x1cb   : > { %p6629_p12 = scmp.ne.s32.totalorder %s6627_s7, %s6628_s8  ;;  %p6633_p1 = scmp.lt.s32.totalorder %s6627_s7, %s8434_s6 }
 0x1cc   : > { %p6634_p2 = scmp.lt.s32.totalorder %s6632_s3, %s6628_s8 }
 0x1cd   : > { %s1327_s23 = sshll.u32 %s8435_s22, 4  ;;  %p6630_p13 = pnand %p6629_p12, %p133_p5  ;;  %s7724_s23 = int_to_ptr.hbm [resolvable:$true] %s1327_s23 }
 0x1ce   : > { %p6635_p3 = por %p6634_p2, %p6633_p1 }
 0x1cf   : > { %p6631_p0 = pneg %p6630_p13 }
 0x1d1   : > { %p6636_p6 = pnand %p6635_p3, %p6631_p0 }
 0x1d3   : > { %6639 = shalt.err (!%p6636_p6)
}
 0x1d4   : > { %s8436_s9 = sld [smem:[#allocation99_spill]]  ;;  %s7082_s2 = smov [#allocation43]  }
 0x1d5   : > { %5376 = dma.hbm_to_vmem [thread:$0]  (%p133_p5), %s7713_s4, 64, %s1307_s5, [#allocation39]  }
 0x1d6   : > { %s1329_s18 = sshll.u32 %s7082_s2, 4  ;;  %s6654_s12 = sshra.s32 %s7724_s23, 4  ;;  %s1330_s18 = int_to_ptr.vmem [resolvable:$true] %s1329_s18  ;;  %s6655_s12 = int_to_ptr.hbm [resolvable:$true] %s6654_s12 }
 0x1d7   : > { %s6656_s7 = scalar_lea.hbm %s6655_s12, 1024  ;;  %s6660_s8 = scalar_lea.hbm %s8435_s22, 1024 }
 0x1d8   : > { %p6657_p7 = scmp.ne.s32.totalorder %s6655_s12, %s6656_s7  ;;  %p6661_p12 = scmp.lt.s32.totalorder %s6655_s12, %s8435_s22 }
 0x1d9   : > { %p6662_p13 = scmp.lt.s32.totalorder %s6660_s8, %s6656_s7 }
 0x1da   : > { %s1357_s0 = sshll.u32 %s8436_s9, 4  ;;  %p6658_p10 = pnand %p6657_p7, %p133_p5  ;;  %s1358_s0 = int_to_ptr.hbm [resolvable:$true] %s1357_s0 }
 0x1db   : > { %p6663_p0 = por %p6662_p13, %p6661_p12 }
 0x1dc   : > { %p6659_p11 = pneg %p6658_p10 }
 0x1de   : > { %p6664_p1 = pnand %p6663_p0, %p6659_p11 }
 0x1e0   : > { %6667 = shalt.err (!%p6664_p1)
}
 0x1e1   : > { %s7083_s3 = smov 256   ;;  %s8437_s4 = sld [smem:[#allocation100_spill]] }
 0x1e2   : > { %s7084_s5 = smov 16   ;;  %s7085_s2 = smov [#allocation46]  }
 0x1e3   : > { %5380 = dma.hbm_to_vmem [thread:$0]  (%p133_p5), %s7724_s23, 16384, %s1330_s18, [#allocation42], %s7083_s3, %s7083_s3, %s7084_s5  }
 0x1e4   : > { %s1359_s6 = sshll.u32 %s7085_s2, 4  ;;  %s6682_s12 = sshra.s32 %s1358_s0, 4  ;;  %s1360_s6 = int_to_ptr.vmem [resolvable:$true] %s1359_s6  ;;  %s6683_s12 = int_to_ptr.hbm [resolvable:$true] %s6682_s12 }
 0x1e5   : > { %s6684_s7 = scalar_lea.hbm %s6683_s12, 2  ;;  %s6688_s8 = scalar_lea.hbm %s8436_s9, 2 }
 0x1e6   : > { %p6685_p2 = scmp.ne.s32.totalorder %s6683_s12, %s6684_s7  ;;  %p6689_p7 = scmp.lt.s32.totalorder %s6683_s12, %s8436_s9 }
 0x1e7   : > { %s1383_s13 = sshll.u32 %s8437_s4, 4  ;;  %p6690_p10 = scmp.lt.s32.totalorder %s6688_s8, %s6684_s7  ;;  %s7744_s13 = int_to_ptr.hbm [resolvable:$true] %s1383_s13 }
 0x1e8   : > { %p6686_p3 = pnand %p6685_p2, %p133_p5 }
 0x1e9   : > { %p6691_p11 = por %p6690_p10, %p6689_p7 }
 0x1ea   : > { %p6687_p6 = pneg %p6686_p3 }
 0x1ec   : > { %p6692_p12 = pnand %p6691_p11, %p6687_p6 }
 0x1ee   : > { %6695 = shalt.err (!%p6692_p12)
}
 0x1ef   : > { %s8438_s23 = sld [smem:[#allocation102_spill]]  ;;  %s7086_s3 = smov [#allocation49]  }
 0x1f0   : > { %5384 = dma.hbm_to_vmem [thread:$0]  (%p133_p5), %s1358_s0, 32, %s1360_s6, [#allocation45]  }
 0x1f1   : > { %s1385_s5 = sshll.u32 %s7086_s3, 4  ;;  %s6710_s2 = sshra.s32 %s7744_s13, 4  ;;  %s1386_s5 = int_to_ptr.vmem [resolvable:$true] %s1385_s5  ;;  %s6711_s2 = int_to_ptr.hbm [resolvable:$true] %s6710_s2 }
 0x1f2   : > { %s6712_s12 = scalar_lea.hbm %s6711_s2, 1  ;;  %s6716_s7 = scalar_lea.hbm %s8437_s4, 1 }
 0x1f3   : > { %p6713_p13 = scmp.ne.s32.totalorder %s6711_s2, %s6712_s12  ;;  %p6717_p2 = scmp.lt.s32.totalorder %s6711_s2, %s8437_s4 }
 0x1f4   : > { %p6718_p3 = scmp.lt.s32.totalorder %s6716_s7, %s6712_s12 }
 0x1f5   : > { %s1407_s18 = sshll.u32 %s8438_s23, 4  ;;  %p6714_p0 = pnand %p6713_p13, %p133_p5  ;;  %s7753_s18 = int_to_ptr.hbm [resolvable:$true] %s1407_s18 }
 0x1f6   : > { %p6719_p6 = por %p6718_p3, %p6717_p2 }
 0x1f7   : > { %p6715_p1 = pneg %p6714_p0 }
 0x1f9   : > { %p6720_p7 = pnand %p6719_p6, %p6715_p1 }
 0x1fb   : > { %6723 = shalt.err (!%p6720_p7)
}
 0x1fc   : > { %5388 = dma.hbm_to_vmem [thread:$0]  (%p133_p5), %s7744_s13, 16, %s1386_s5, [#allocation48]  }
 0x1fd   : > { %s7087_s6 = smov [#allocation52]   ;;  %s1437_s8 = sshll.u32 %s7359_s19, 4  ;;  %s1438_s8 = int_to_ptr.hbm [resolvable:$true] %s1437_s8 }
 0x1fe   : > { %s1409_s0 = sshll.u32 %s7087_s6, 4  ;;  %s6738_s3 = sshra.s32 %s7753_s18, 4  ;;  %s1410_s0 = int_to_ptr.vmem [resolvable:$true] %s1409_s0  ;;  %s6739_s3 = int_to_ptr.hbm [resolvable:$true] %s6738_s3 }
 0x1ff   : > { %s6740_s2 = scalar_lea.hbm %s6739_s3, 1  ;;  %s6744_s12 = scalar_lea.hbm %s8438_s23, 1 }
 0x200   : > { %p6741_p10 = scmp.ne.s32.totalorder %s6739_s3, %s6740_s2  ;;  %p6745_p13 = scmp.lt.s32.totalorder %s6739_s3, %s8438_s23 }
 0x201   : > { %p6746_p0 = scmp.lt.s32.totalorder %s6744_s12, %s6740_s2 }
 0x202   : > { %p6742_p11 = pnand %p6741_p10, %p133_p5 }
 0x203   : > { %p6747_p1 = por %p6746_p0, %p6745_p13 }
 0x204   : > { %p6743_p12 = pneg %p6742_p11 }
 0x206   : > { %p6748_p2 = pnand %p6747_p1, %p6743_p12 }
 0x208   : > { %6751 = shalt.err (!%p6748_p2)
}
 0x209   : > { %5392 = dma.hbm_to_vmem [thread:$0]  (%p133_p5), %s7753_s18, 16, %s1410_s0, [#allocation51]  }
 0x20a   : > { %s7088_s13 = smov [#allocation55]   ;;  %s6766_s7 = sshra.s32 %s1438_s8, 4  ;;  %s6767_s7 = int_to_ptr.hbm [resolvable:$true] %s6766_s7 }
 0x20b   : > { %s1439_s5 = sshll.u32 %s7088_s13, 4  ;;  %s6768_s6 = scalar_lea.hbm %s6767_s7, 1  ;;  %s1440_s5 = int_to_ptr.vmem [resolvable:$true] %s1439_s5 }
 0x20c   : > { %p6769_p3 = scmp.ne.s32.totalorder %s6767_s7, %s6768_s6  ;;  %s6772_s3 = scalar_lea.hbm %s7359_s19, 1 }
 0x20d   : > { %p6773_p10 = scmp.lt.s32.totalorder %s6767_s7, %s7359_s19  ;;  %p6774_p11 = scmp.lt.s32.totalorder %s6772_s3, %s6768_s6 }
 0x20e   : > { %p6770_p6 = pnand %p6769_p3, %p133_p5 }
 0x20f   : > { %p6775_p12 = por %p6774_p11, %p6773_p10 }
 0x210   : > { %p6771_p7 = pneg %p6770_p6 }
 0x212   : > { %p6776_p13 = pnand %p6775_p12, %p6771_p7 }
 0x214   : > { %6779 = shalt.err (!%p6776_p13)
}
 0x215   : > { %5396 = dma.hbm_to_vmem [thread:$0]  (%p133_p5), %s1438_s8, 16, %s1440_s5, [#allocation54]  }
 0x216 PF: > { %s8439_s18 = sld [smem:[#allocation73_spill]]  ;;  %s1450_s0 = sand.u32 1, %s6962_s10  }
 0x217   : > { %s5194_s2 = sshll.u32 %s6966_s11, 3  ;;  %p5499_p0 = scmp.lt.s32.totalorder %s6966_s11, 2 }
 0x218   : > { %s5193_s12 = sshll.u32 %s1450_s0, 3  ;;  %s1451_s5 = scalar_lea.sflag [#allocation7], %s1450_s0 }
 0x219   : > { %s1454_s6 = scalar_lea.vmem [#allocation6], %s5193_s12  ;;  %p7784_p1 = pnand %p5499_p0, %p7400_p4 }
 0x21a   : > { %s1462_s3 = sshll.u32 %s1454_s6, 4  ;;  %s1463_s3 = int_to_ptr.vmem [resolvable:$true] %s1462_s3 }
 0x21b   : > { %p6798_p3 = pneg %p7784_p1 }
 0x21c   : > { %s1458_s13 = scalar_lea.hbm %s8439_s18, %s5194_s2  ;;  %s6801_s11 = scalar_lea.hbm %s8439_s18, 16 }
 0x21d   : > { %s1460_s7 = sshll.u32 %s1458_s13, 4  ;;  %s1461_s7 = int_to_ptr.hbm [resolvable:$true] %s1460_s7 }
 0x21e   : > { %s6794_s4 = sshra.s32 %s1461_s7, 4  ;;  %s6795_s4 = int_to_ptr.hbm [resolvable:$true] %s6794_s4 }
 0x21f   : > { %s6796_s9 = scalar_lea.hbm %s6795_s4, 8  ;;  %p6802_p10 = scmp.lt.s32.totalorder %s6795_s4, %s8439_s18 }
 0x220   : > { %p6797_p2 = scmp.ne.s32.totalorder %s6795_s4, %s6796_s9  ;;  %p6803_p11 = scmp.lt.s32.totalorder %s6801_s11, %s6796_s9 }
 0x222   : > { %p6799_p6 = pnand %p6798_p3, %p6797_p2  ;;  %p6804_p12 = por %p6803_p11, %p6802_p10 }
 0x224   : > { %p6800_p7 = pneg %p6799_p6 }
 0x226   : > { %p6805_p13 = pnand %p6804_p12, %p6800_p7 }
 0x228   : > { %6808 = shalt.err (!%p6805_p13)
}
 0x229   : > { %5466 = dma.hbm_to_vmem [thread:$0]  (!%p7784_p1), %s1461_s7, 128, %s1463_s3, %s1451_s5  }
 0x22a   : > { %1471 = sbr.rel (%p7413_p9) target bundleno = 10733 (0x29ed), region = 184  ;;  %s8441_s26 = sld [smem:[#allocation106_spill]] (!%p7413_p9) }
 0x230   : > { %s1473_s2 = sand.u32 1, %s8441_s26  }
 0x231   : > { %s7797_s12 = sshll.u32 %s1473_s2, 3  ;;  %s1474_s13 = scalar_lea.sflag [#allocation7], %s1473_s2 }
 0x232   : > { %s1477_s6 = scalar_lea.vmem [#allocation6], %s7797_s12 }
 0x233   : > { %6885 = dma.done.wait (%p7409_p8), %s1474_s13, 128  }
 0x234   : > { %6887 = vsyncadd (%p7409_p8), %s1474_s13, 4294967168 }
 0x235   : > { %6889 = dma.done.wait (%p133_p5), [#allocation9], 32  }
 0x236   : > { %6891 = vsyncadd (%p133_p5), [#allocation9], 4294967264 }
 0x237   : > { %6893 = dma.done.wait (%p133_p5), [#allocation12], 32  }
 0x238   : > { %6895 = vsyncadd (%p133_p5), [#allocation12], 4294967264 }
 0x239   : > { %6897 = dma.done.wait (%p133_p5), [#allocation15], 1024  }
 0x23a   : > { %6899 = vsyncadd (%p133_p5), [#allocation15], 4294966272 }
 0x23b   : > { %6901 = dma.done.wait (%p133_p5), [#allocation18], 32  }
 0x23c   : > { %6903 = vsyncadd (%p133_p5), [#allocation18], 4294967264 }
 0x23d   : > { %6905 = dma.done.wait (%p133_p5), [#allocation21], 528  }
 0x23e   : > { %6907 = vsyncadd (%p133_p5), [#allocation21], 4294966768 }
 0x23f   : > { %6909 = dma.done.wait (%p133_p5), [#allocation24], 528  }
 0x240   : > { %6911 = vsyncadd (%p133_p5), [#allocation24], 4294966768 }
 0x241   : > { %6913 = dma.done.wait (%p133_p5), [#allocation27], 768  }
 0x242   : > { %6915 = vsyncadd (%p133_p5), [#allocation27], 4294966528 }
 0x243   : > { %6917 = dma.done.wait (%p133_p5), [#allocation30], 32  }
 0x244   : > { %6919 = vsyncadd (%p133_p5), [#allocation30], 4294967264 }
 0x245   : > { %6921 = dma.done.wait (%p133_p5), [#allocation33], 512  }
 0x246   : > { %6923 = vsyncadd (%p133_p5), [#allocation33], 4294966784 }
 0x247   : > { %6925 = dma.done.wait (%p133_p5), [#allocation36], 32  }
 0x248   : > { %6927 = vsyncadd (%p133_p5), [#allocation36], 4294967264 }
 0x249   : > { %6929 = dma.done.wait (%p133_p5), [#allocation39], 128  }
 0x24a   : > { %6931 = vsyncadd (%p133_p5), [#allocation39], 4294967168 }
 0x24b   : > { %6933 = dma.done.wait (%p133_p5), [#allocation42], 16448  }
 0x24c   : > { %6935 = vsyncadd (%p133_p5), [#allocation42], 4294950848 }
 0x24d   : > { %6937 = dma.done.wait (%p133_p5), [#allocation45], 64  }
 0x24e   : > { %6939 = vsyncadd (%p133_p5), [#allocation45], 4294967232 }
 0x24f   : > { %6941 = dma.done.wait (%p133_p5), [#allocation48], 4112  }
 0x250   : > { %6943 = vsyncadd (%p133_p5), [#allocation48], 4294963184 }
 0x251   : > { %6945 = dma.done.wait (%p133_p5), [#allocation51], 32  }
 0x252   : > { %6947 = vsyncadd (%p133_p5), [#allocation51], 4294967264 }
 0x253   : > { %6949 = dma.done.wait (%p133_p5), [#allocation54], 32  }
 0x254   : > { %6951 = vsyncadd (%p133_p5), [#allocation54], 4294967264  ;;  %s8443_s1 = sld [smem:[#allocation105_spill]]  ;;  %p1735_p4 = scmp.lt.s32.totalorder %s7385_s15, 1  ;;  %vm1744_vm0 = vcmask 64512   ;;  %v1738_v6 = vld [vmem:[%s1477_s6] sm:$0xff] }
 0x255   : > { %s8444_s9 = sld [smem:[#allocation75_spill]]  ;;  %v7886_v4 = vld [vmem:[#allocation10] sm:$0x1]  ;;  %v5791_v7 = vld [vmem:[#allocation8] ss:$0 sm:$0xff]  ;;  %vm1768_vm1 = vcmask 785408  }
 0x256   : > { %s8445_s4 = sld [smem:[#allocation74_spill]]  ;;  %s8462_s15 = smov (!%p1735_p4, %s7385_s15), 1  ;;  %v7893_v10 = vmov 0.0  }
 0x257   : > { %s7895_s3 = smov 0  }
 0x25a   : > { %s1737_s7 = scalar_lea.vmem %s8443_s1, %s8462_s15 }
 0x25b   : > { %v7875_v0 = vld [vmem:[%s8444_s9] sm:$0xff]  ;;  %v7878_v1 = vld [vmem:[%s8444_s9 + $0x8] sm:$0xff]  ;;  %v7881_v2 = vld [vmem:[%s8444_s9 + $0x10] sm:$0xff] }
 0x25c   : > { %v7884_v3 = vld [vmem:[%s8444_s9 + $0x18] sm:$0xff]  ;;  %v1739_v5 = vld [vmem:[%s8445_s4] sm:$0xff] }
 0x25d   : > { %1763 = vmatpush.msra.mxu0 %v1739_v5 }
 0x25e   : > { %5229 = vmatmul.msk.f32.vlgmr.msra.gmra.mxu0 %vm1744_vm0, %v1738_v6 }
 0x2db   : > { %v1765_v8 = vpop.f32.mrf.mxu0 }
 0x2dc   : > { %v1766_v9 = vadd.f32 %v5791_v7, %v1765_v8 }
 0x2de   : > { %1769 = vst.msk [vmem:[#allocation4] sm:$0xff] %vm1768_vm1, %v1766_v9 }
 0x2df LB: >> { %1802 = vmatpush.msra.mxu0 %v7884_v3  ;;  %s7089_s8 = smov 96   ;;  %vm1787_vm2 = vcmask 261120   ;;  %s7090_s5 = smov 64   ;;  %vm1854_vm7 = vcmask 253952   ;;  %s6974_s3 = sphi %s7895_s3, %s1780_s3   ;;  %v6970_v10 = vphi %v7893_v10, %v1848_v10  }
 0x2e0   : >> { %1785 = vrot.lane.b32.xlu0 %v6970_v10, %s7089_s8  ;;  %s1782_s11 = scalar_lea.vmem [#allocation4], %s6974_s3  ;;  %s1853_s26 = scalar_lea.vmem [#allocation2], %s6974_s3 }
 0x2e1   : >> { %1803 = vmatpush.msra.mxu0 %v7881_v2  ;;  %s1780_s3 = sadd.s32 1, %s6974_s3  }
 0x2e2   : >> { %p1777_p5 = scmp.ge.s32.totalorder %s1780_s3, 8  }
 0x2e3   : >> { %1804 = vmatpush.msra.mxu0 %v7878_v1  ;;  %s8446_s0 = sld [smem:[#allocation77_spill]] (%p1777_p5)  ;;  %v7935_v48 = vld [vmem:[#allocation13] sm:$0x1] (%p1777_p5)  ;;  %v5798_v49 = vld [vmem:[#allocation11] ss:$0 sm:$0xff] (%p1777_p5)  ;;  %v6976_v52 = vmov (%p1777_p5), 0.0  }
 0x2e4   : > { %s8448_s12 = sld [smem:[#allocation78_spill]] (%p1777_p5)  ;;  %s7938_s13 = smov (%p1777_p5), 0  }
 0x2e5   : >> { %1805 = vmatpush.msra.mxu0 %v7875_v0  ;;  %v1783_v14 = vld [vmem:[%s1782_s11] sm:$0x1] }
 0x2e9   : > { %s8447_s2 = smov (%p1777_p5), %s8446_s0  ;;  %v1860_v39 = vld [vmem:[%s8446_s0 + $0x18] sm:$0xff] (%p1777_p5) }
 0x2ea   : > { %v1859_v40 = vld [vmem:[%s8447_s2 + $0x10] sm:$0xff] (%p1777_p5)  ;;  %v1858_v41 = vld [vmem:[%s8447_s2 + $0x8] sm:$0xff] (%p1777_p5)  ;;  %v1857_v42 = vld [vmem:[%s8447_s2] sm:$0xff] (%p1777_p5) }
 0x2eb   : > { %v7924_v44 = vld [vmem:[%s8448_s12] sm:$0xff] (%p1777_p5)  ;;  %v7927_v45 = vld [vmem:[%s8448_s12 + $0x8] sm:$0xff] (%p1777_p5)  ;;  %v7930_v46 = vld [vmem:[%s8448_s12 + $0x10] sm:$0xff] (%p1777_p5) }
 0x2ec   : > { %v7933_v47 = vld [vmem:[%s8448_s12 + $0x18] sm:$0xff] (%p1777_p5) }
 0x352   : >> { %v1786_v11 = vpop.permute.xlu0 %1785 }
 0x353   : >> { %5230 = vmatmul.msk.f32.vlgmr.msra.gmra.mxu0 %vm1787_vm2, %v1786_v11 }
 0x354   : > { %1881 = vmatpush.msra.mxu0 (%p1777_p5), %v1860_v39 }
 0x356   : > { %1882 = vmatpush.msra.mxu0 (%p1777_p5), %v1859_v40 }
 0x358   : > { %1883 = vmatpush.msra.mxu0 (%p1777_p5), %v1858_v41 }
 0x35a   : > { %1884 = vmatpush.msra.mxu0 (%p1777_p5), %v1857_v42 }
 0x3d0   : >> { %v1807_v12 = vpop.f32.mrf.mxu0 }
 0x3d1   : >> { %v1808_v13 = vadd.f32 %v1807_v12, %v7886_v4 }
 0x3d3   : >> { %1831 = vrot.lane.b32.xlu0 %v1808_v13, %s7090_s5  ;;  %v1810_v15 = vadd.f32 %v1808_v13, %v1783_v14 }
 0x3d5   : >> { %v5231_v16 = vmul.f32 -1.442695, %v1810_v15 }
 0x3d7   : >> { %5792 = vpow2.f32 %v5231_v16 }
 0x3dd   : >> { %v5793_v17 = vpop.eup %5792 }
 0x3de   : >> { %v1814_v18 = vadd.f32 1.0, %v5793_v17 }
 0x3e0   : >> { %5794 = vrcp.f32 %v1814_v18  ;;  %v1826_v24 = vand.u32 2147483648, %v1814_v18  ;;  %vm1820_vm4 = vweird.f32 %v1814_v18  ;;  %v1824_v25 = vand.u32 2147483647, %v1814_v18 }
 0x3e2   : >> { %v1827_v27 = vor.u32 1.1754944e-38, %v1826_v24  ;;  %vm1825_vm6 = vcmp.eq.f32.partialorder %v1824_v25, 8.507059e+37 }
 0x3e6   : >> { %v5795_v19 = vpop.eup %5794 }
 0x3e7   : >> { %v1816_v20 = vmul.f32 %v5795_v19, %v1814_v18  ;;  %vm1821_vm3 = vweird.f32 %v5795_v19 }
 0x3e8   : >> { %vm1822_vm5 = vmor %vm1820_vm4, %vm1821_vm3 }
 0x3e9   : >> { %v1817_v21 = vsub.f32 1.0, %v1816_v20 }
 0x3eb   : >> { %v1818_v22 = vmul.f32 %v5795_v19, %v1817_v21 }
 0x3ed   : >> { %v1819_v23 = vadd.f32 %v5795_v19, %v1818_v22 }
 0x3ef   : >> { %v1823_v26 = vsel %vm1822_vm5, %v5795_v19, %v1819_v23 }
 0x3f0   : >> { %v1828_v29 = vsel %vm1825_vm6, %v1827_v27, %v1823_v26 }
 0x3f1   : >> { %v1841_v34 = vsub.f32 1.0, %v1828_v29  ;;  %v1847_v37 = vmul.f32 %v6970_v10, %v1828_v29 }
 0x445   : >> { %v1832_v28 = vpop.permute.xlu0 %1831 }
 0x446   : >> { %v1834_v30 = vmul.f32 %v1832_v28, %v1828_v29 }
 0x448   : >> { %1836 = vrot.lane.b32.xlu1 %v1834_v30, %s7090_s5 }
 0x4ba   : >> { %v1837_v31 = vpop.permute.xlu1 %1836 }
 0x4bb   : >> { %v1839_v32 = vadd.f32 %v1837_v31, %v1783_v14 }
 0x4bd   : >> { %5796 = vtanh.f32 %v1839_v32 }
 0x4c3   : >> { %v5797_v33 = vpop.eup %5796 }
 0x4c4   : >> { %1843 = vrot.lane.b32.xlu1 %v5797_v33, %s7089_s8 }
 0x536   : >> { %v1844_v35 = vpop.permute.xlu1 %1843 }
 0x537   : >> { %v1846_v36 = vmul.f32 %v1844_v35, %v1841_v34 }
 0x539   : >> { %v1848_v10 = vadd.f32 %v1847_v37, %v1846_v36  }
 0x53b   : >> { %1850 = vrot.lane.b32.xlu2 %v1848_v10, %s7089_s8 }
 0x592   : > { %1779 = sbr.rel (!%p1777_p5) target bundleno = 735 (0x2df), region = 437 }
 0x595   : >> { %v1851_v38 = vpop.permute.xlu2 %1850 }
 0x596   : >> { %1855 = vst.msk [vmem:[%s1853_s26] sm:$0x1] %vm1854_vm7, %v1851_v38 }
 0x59d   : > { %v1856_v43 = vld [vmem:[#allocation2] sm:$0xff] }
 0x59e   : > { %5232 = vmatmul.msk.f32.vlgmr.msra.gmra.mxu0 %vm1787_vm2, %v1856_v43 }
 0x61b   : > { %v1886_v50 = vpop.f32.mrf.mxu0 }
 0x61c   : > { %v1887_v51 = vadd.f32 %v5798_v49, %v1886_v50 }
 0x61e   : > { %1889 = vst.msk [vmem:[#allocation4] sm:$0xff] %vm1768_vm1, %v1887_v51 }
 0x61f LB: >> { %1921 = vmatpush.msra.mxu0 %v7933_v47  ;;  %s7091_s6 = smov 96   ;;  %s7092_s1 = smov 64   ;;  %s6982_s13 = sphi %s7938_s13, %s1900_s13   ;;  %v6978_v52 = vphi %v6976_v52, %v1967_v52  }
 0x620   : >> { %1905 = vrot.lane.b32.xlu0 %v6978_v52, %s7091_s6  ;;  %s1902_s4 = scalar_lea.vmem [#allocation4], %s6982_s13  ;;  %s1972_s3 = scalar_lea.vmem [#allocation2], %s6982_s13 }
 0x621   : >> { %1922 = vmatpush.msra.mxu0 %v7930_v46  ;;  %s1900_s13 = sadd.s32 1, %s6982_s13  }
 0x622   : >> { %p1897_p8 = scmp.ge.s32.totalorder %s1900_s13, 8  }
 0x623   : >> { %1923 = vmatpush.msra.mxu0 %v7927_v45  ;;  %v1979_v17 = vld [vmem:[#allocation14 + $0x18] sm:$0xff] (%p1897_p8)  ;;  %v1978_v18 = vld [vmem:[#allocation14 + $0x10] sm:$0xff] (%p1897_p8)  ;;  %v1977_v19 = vld [vmem:[#allocation14 + $0x8] sm:$0xff] (%p1897_p8)  ;;  %v6984_v30 = vmov (%p1897_p8), 0.0   ;;  %s7970_s8 = smov (%p1897_p8), 0  }
 0x624   : > { %v1976_v20 = vld [vmem:[#allocation14] sm:$0xff] (%p1897_p8)  ;;  %v7961_v23 = vld [vmem:[#allocation16 + $0x8] sm:$0xff] (%p1897_p8)  ;;  %v7963_v24 = vld [vmem:[#allocation16 + $0x10] sm:$0xff] (%p1897_p8) }
 0x625   : >> { %1924 = vmatpush.msra.mxu0 %v7924_v44  ;;  %v1903_v56 = vld [vmem:[%s1902_s4] sm:$0x1]  ;;  %v7959_v22 = vld [vmem:[#allocation16] sm:$0xff] (%p1897_p8)  ;;  %v7965_v25 = vld [vmem:[#allocation16 + $0x18] sm:$0xff] (%p1897_p8) }
 0x626   : > { %v7967_v26 = vld [vmem:[#allocation19] sm:$0x1] (%p1897_p8)  ;;  %v5805_v27 = vld [vmem:[#allocation17] ss:$0 sm:$0xff] (%p1897_p8) }
 0x692   : >> { %v1906_v53 = vpop.permute.xlu0 %1905 }
 0x693   : >> { %5233 = vmatmul.msk.f32.vlgmr.msra.gmra.mxu0 %vm1787_vm2, %v1906_v53 }
 0x694   : > { %1999 = vmatpush.msra.mxu0 (%p1897_p8), %v1979_v17 }
 0x696   : > { %2000 = vmatpush.msra.mxu0 (%p1897_p8), %v1978_v18 }
 0x698   : > { %2001 = vmatpush.msra.mxu0 (%p1897_p8), %v1977_v19 }
 0x69a   : > { %2002 = vmatpush.msra.mxu0 (%p1897_p8), %v1976_v20 }
 0x710   : >> { %v1926_v54 = vpop.f32.mrf.mxu0 }
 0x711   : >> { %v1927_v55 = vadd.f32 %v1926_v54, %v7935_v48 }
 0x713   : >> { %1950 = vrot.lane.b32.xlu0 %v1927_v55, %s7092_s1  ;;  %v1929_v57 = vadd.f32 %v1927_v55, %v1903_v56 }
 0x715   : >> { %v5234_v58 = vmul.f32 -1.442695, %v1929_v57 }
 0x717   : >> { %5799 = vpow2.f32 %v5234_v58 }
 0x71d   : >> { %v5800_v59 = vpop.eup %5799 }
 0x71e   : >> { %v1933_v60 = vadd.f32 1.0, %v5800_v59 }
 0x720   : >> { %5801 = vrcp.f32 %v1933_v60  ;;  %v1945_v2 = vand.u32 2147483648, %v1933_v60  ;;  %vm1939_vm9 = vweird.f32 %v1933_v60  ;;  %v1943_v3 = vand.u32 2147483647, %v1933_v60 }
 0x722   : >> { %v1946_v5 = vor.u32 1.1754944e-38, %v1945_v2  ;;  %vm1944_vm11 = vcmp.eq.f32.partialorder %v1943_v3, 8.507059e+37 }
 0x726   : >> { %v5802_v61 = vpop.eup %5801 }
 0x727   : >> { %v1935_v62 = vmul.f32 %v5802_v61, %v1933_v60  ;;  %vm1940_vm8 = vweird.f32 %v5802_v61 }
 0x728   : >> { %vm1941_vm10 = vmor %vm1939_vm9, %vm1940_vm8 }
 0x729   : >> { %v1936_v63 = vsub.f32 1.0, %v1935_v62 }
 0x72b   : >> { %v1937_v0 = vmul.f32 %v5802_v61, %v1936_v63 }
 0x72d   : >> { %v1938_v1 = vadd.f32 %v5802_v61, %v1937_v0 }
 0x72f   : >> { %v1942_v4 = vsel %vm1941_vm10, %v5802_v61, %v1938_v1 }
 0x730   : >> { %v1947_v7 = vsel %vm1944_vm11, %v1946_v5, %v1942_v4 }
 0x731   : >> { %v1960_v12 = vsub.f32 1.0, %v1947_v7  ;;  %v1966_v15 = vmul.f32 %v6978_v52, %v1947_v7 }
 0x785   : >> { %v1951_v6 = vpop.permute.xlu0 %1950 }
 0x786   : >> { %v1953_v8 = vmul.f32 %v1951_v6, %v1947_v7 }
 0x788   : >> { %1955 = vrot.lane.b32.xlu1 %v1953_v8, %s7092_s1 }
 0x7fa   : >> { %v1956_v9 = vpop.permute.xlu1 %1955 }
 0x7fb   : >> { %v1958_v10 = vadd.f32 %v1956_v9, %v1903_v56 }
 0x7fd   : >> { %5803 = vtanh.f32 %v1958_v10 }
 0x803   : >> { %v5804_v11 = vpop.eup %5803 }
 0x804   : >> { %1962 = vrot.lane.b32.xlu1 %v5804_v11, %s7091_s6 }
 0x876   : >> { %v1963_v13 = vpop.permute.xlu1 %1962 }
 0x877   : >> { %v1965_v14 = vmul.f32 %v1963_v13, %v1960_v12 }
 0x879   : >> { %v1967_v52 = vadd.f32 %v1966_v15, %v1965_v14  }
 0x87b   : >> { %1969 = vrot.lane.b32.xlu2 %v1967_v52, %s7091_s6 }
 0x8d2   : > { %1899 = sbr.rel (!%p1897_p8) target bundleno = 1567 (0x61f), region = 448 }
 0x8d5   : >> { %v1970_v16 = vpop.permute.xlu2 %1969 }
 0x8d6   : >> { %1974 = vst.msk [vmem:[%s1972_s3] sm:$0x1] %vm1854_vm7, %v1970_v16 }
 0x8dd   : > { %v1975_v21 = vld [vmem:[#allocation2] sm:$0xff] }
 0x8de   : > { %5235 = vmatmul.msk.f32.vlgmr.msra.gmra.mxu0 %vm1787_vm2, %v1975_v21 }
 0x95b   : > { %v2004_v28 = vpop.f32.mrf.mxu0 }
 0x95c   : > { %v2005_v29 = vadd.f32 %v5805_v27, %v2004_v28 }
 0x95e   : > { %2007 = vst.msk [vmem:[#allocation4] sm:$0xff] %vm1768_vm1, %v2005_v29 }
 0x95f LB: >> { %2039 = vmatpush.msra.mxu0 %v7965_v25  ;;  %s7093_s5 = smov 96   ;;  %s7094_s11 = smov 64   ;;  %s6990_s8 = sphi %s7970_s8, %s2018_s8   ;;  %v6986_v30 = vphi %v6984_v30, %v2085_v30  }
 0x960   : >> { %2023 = vrot.lane.b32.xlu0 %v6986_v30, %s7093_s5  ;;  %s2020_s26 = scalar_lea.vmem [#allocation4], %s6990_s8  ;;  %s2090_s0 = scalar_lea.vmem [#allocation2], %s6990_s8 }
 0x961   : >> { %2040 = vmatpush.msra.mxu0 %v7963_v24  ;;  %s2018_s8 = sadd.s32 1, %s6990_s8  }
 0x962   : >> { %p2015_p9 = scmp.ge.s32.totalorder %s2018_s8, 8  }
 0x963   : >> { %2041 = vmatpush.msra.mxu0 %v7961_v23  ;;  %v2097_v59 = vld [vmem:[#allocation20 + $0x18] sm:$0xff] (%p2015_p9)  ;;  %v2096_v60 = vld [vmem:[#allocation20 + $0x10] sm:$0xff] (%p2015_p9)  ;;  %v2095_v61 = vld [vmem:[#allocation20 + $0x8] sm:$0xff] (%p2015_p9)  ;;  %s7095_s13 = smov (%p2015_p9), 94   ;;  %s7096_s6 = smov (%p2015_p9), 96   ;;  %vm2137_vm1 = vcmask (%p2015_p9), 15360  }
 0x964   : > { %v2094_v62 = vld [vmem:[#allocation20] sm:$0xff] (%p2015_p9)  ;;  %s7097_s1 = smov (%p2015_p9), 126   ;;  %s7098_s4 = smov (%p2015_p9), 62   ;;  %vm2216_vm3 = vcmask (%p2015_p9), 1041408  }
 0x965   : >> { %2042 = vmatpush.msra.mxu0 %v7959_v22  ;;  %v2021_v34 = vld [vmem:[%s2020_s26] sm:$0x1]  ;;  %v5812_v0 = vld [vmem:[#allocation22] ss:$0 sm:$0xff] (%p2015_p9)  ;;  %s7099_s3 = smov (%p2015_p9), 124   ;;  %s7100_s8 = smov (%p2015_p9), 122  }
 0x966   : > { %v8007_v7 = vld [vmem:[#allocation23] sm:$0xff] (%p2015_p9)  ;;  %s7103_s26 = smov (%p2015_p9), 90  }
 0x967   : > { %5242 = vmatpush.msk.msra.mxu3 (%p2015_p9), %vm2216_vm3, %v8007_v7  ;;  %v2424_v29 = vrot.slane (%p2015_p9), %v8007_v7, 4 }
 0x9d2   : >> { %v2024_v31 = vpop.permute.xlu0 %2023 }
 0x9d3   : >> { %5236 = vmatmul.msk.f32.vlgmr.msra.gmra.mxu0 %vm1787_vm2, %v2024_v31 }
 0x9d4   : > { %2117 = vmatpush.msra.mxu0 (%p2015_p9), %v2097_v59 }
 0x9d6   : > { %2118 = vmatpush.msra.mxu0 (%p2015_p9), %v2096_v60 }
 0x9d8   : > { %2119 = vmatpush.msra.mxu0 (%p2015_p9), %v2095_v61 }
 0x9da   : > { %2120 = vmatpush.msra.mxu0 (%p2015_p9), %v2094_v62 }
 0xa50   : >> { %v2044_v32 = vpop.f32.mrf.mxu0 }
 0xa51   : >> { %v2045_v33 = vadd.f32 %v2044_v32, %v7967_v26 }
 0xa53   : >> { %2068 = vrot.lane.b32.xlu0 %v2045_v33, %s7094_s11  ;;  %v2047_v35 = vadd.f32 %v2045_v33, %v2021_v34 }
 0xa55   : >> { %v5237_v36 = vmul.f32 -1.442695, %v2047_v35 }
 0xa57   : >> { %5806 = vpow2.f32 %v5237_v36 }
 0xa5d   : >> { %v5807_v37 = vpop.eup %5806 }
 0xa5e   : >> { %v2051_v38 = vadd.f32 1.0, %v5807_v37 }
 0xa60   : >> { %5808 = vrcp.f32 %v2051_v38  ;;  %v2063_v44 = vand.u32 2147483648, %v2051_v38  ;;  %vm2057_vm13 = vweird.f32 %v2051_v38  ;;  %v2061_v45 = vand.u32 2147483647, %v2051_v38 }
 0xa62   : >> { %v2064_v47 = vor.u32 1.1754944e-38, %v2063_v44  ;;  %vm2062_vm15 = vcmp.eq.f32.partialorder %v2061_v45, 8.507059e+37 }
 0xa66   : >> { %v5809_v39 = vpop.eup %5808 }
 0xa67   : >> { %v2053_v40 = vmul.f32 %v5809_v39, %v2051_v38  ;;  %vm2058_vm12 = vweird.f32 %v5809_v39 }
 0xa68   : >> { %vm2059_vm14 = vmor %vm2057_vm13, %vm2058_vm12 }
 0xa69   : >> { %v2054_v41 = vsub.f32 1.0, %v2053_v40  ;;  %v2319_v40 = vrot.slane (%p2015_p9), %v8007_v7, 2 }
 0xa6b   : >> { %v2055_v42 = vmul.f32 %v5809_v39, %v2054_v41 }
 0xa6d   : >> { %v2056_v43 = vadd.f32 %v5809_v39, %v2055_v42 }
 0xa6f   : >> { %v2060_v46 = vsel %vm2059_vm14, %v5809_v39, %v2056_v43 }
 0xa70   : >> { %v2065_v49 = vsel %vm2062_vm15, %v2064_v47, %v2060_v46 }
 0xa71   : >> { %v2078_v54 = vsub.f32 1.0, %v2065_v49  ;;  %v2084_v57 = vmul.f32 %v6986_v30, %v2065_v49 }
 0xac5   : >> { %v2069_v48 = vpop.permute.xlu0 %2068 }
 0xac6   : >> { %v2071_v50 = vmul.f32 %v2069_v48, %v2065_v49 }
 0xac8   : >> { %2073 = vrot.lane.b32.xlu1 %v2071_v50, %s7094_s11  ;;  %s7102_s11 = smov (%p2015_p9), 92  }
 0xb3a   : >> { %v2074_v51 = vpop.permute.xlu1 %2073 }
 0xb3b   : >> { %v2076_v52 = vadd.f32 %v2074_v51, %v2021_v34 }
 0xb3d   : >> { %5810 = vtanh.f32 %v2076_v52 }
 0xb43   : >> { %v5811_v53 = vpop.eup %5810 }
 0xb44   : >> { %2080 = vrot.lane.b32.xlu1 %v5811_v53, %s7093_s5 }
 0xbb6   : >> { %v2081_v55 = vpop.permute.xlu1 %2080 }
 0xbb7   : >> { %v2083_v56 = vmul.f32 %v2081_v55, %v2078_v54 }
 0xbb9   : >> { %v2085_v30 = vadd.f32 %v2084_v57, %v2083_v56  }
 0xbbb   : >> { %2087 = vrot.lane.b32.xlu2 %v2085_v30, %s7093_s5  ;;  %s7101_s5 = smov (%p2015_p9), 64  }
 0xc12   : > { %2017 = sbr.rel (!%p2015_p9) target bundleno = 2399 (0x95f), region = 459 }
 0xc15   : >> { %v2088_v58 = vpop.permute.xlu2 %2087 }
 0xc16   : >> { %2092 = vst.msk [vmem:[%s2090_s0] sm:$0x1] %vm1854_vm7, %v2088_v58  ;;  %s7104_s0 = smov (%p2015_p9), 88  }
 0xc1d   : > { %v2093_v63 = vld [vmem:[#allocation2] sm:$0xff] }
 0xc1e   : > { %5238 = vmatmul.msk.f32.vlgmr.msra.gmra.mxu0 %vm1787_vm2, %v2093_v63 }
 0xc9b   : > { %v2122_v1 = vpop.f32.mrf.mxu0 }
 0xc9c   : > { %v7991_v2 = vadd.f32 %v5812_v0, %v2122_v1 }
 0xc9e   : > { %2243 = vrot.lane.b32.xlu2 %v7991_v2, %s7095_s13  ;;  %2135 = vrot.lane.b32.xlu0 %v7991_v2, %s7096_s6  ;;  %v7996_v3 = vmul.f32 0.70710677, %v7991_v2  ;;  %s7105_s13 = smov 60   ;;  %s7106_s6 = smov 86  }
 0xca6   : > { %2241 = vrot.lane.b32.xlu2 %v7996_v3, %s7097_s1 }
 0xcf8   : > { %v2244_v25 = vpop.permute.xlu2 %2243 }
 0xd00   : > { %v2242_v28 = vpop.permute.xlu2 %2241 }
 0xd10   : > { %v2136_v4 = vpop.permute.xlu0 %2135 }
 0xd11   : > { %5239 = vmatpush.xpose.msk.msra.mxu1 %vm2137_vm1, %v2136_v4 }
 0xd14   : > { %5240 = vmatmul.msk.f32.vlgmr.msra.gmra.mxu1 %vm2137_vm1, %v7996_v3 }
 0xd15   : > { %5247 = vmatpush.msk.msrb.mxu1 %vm2216_vm3, %v2319_v40 }
 0xd91   : > { %v2160_v5 = vpop.f32.mrf.mxu1 }
 0xd92   : > { %v2163_v6 = vsel %vm1744_vm0, %v2160_v5, -inf }
 0xd93   : > { %2164 = vmax.xlane.f32.xlu0 %v2163_v6 }
 0xda7   : > { %2293 = vrot.lane.b32.xlu0 %v7991_v2, %s7098_s4  ;;  %s7107_s4 = smov 118  }
 0xdaf   : > { %2346 = vrot.lane.b32.xlu0 %v7996_v3, %s7099_s3  ;;  %s7108_s3 = smov 58  }
 0xdb7   : > { %2451 = vrot.lane.b32.xlu0 %v7996_v3, %s7100_s8  ;;  %s7109_s8 = smov 120  }
 0xe06   : > { %v2165_v8 = vpop.xlane.xlu0 %2164 }
 0xe07   : > { %v2166_v9 = vsub.f32 %v2160_v5, %v2165_v8 }
 0xe09   : > { %v2167_v10 = vmul.f32 1.442695, %v2166_v9 }
 0xe0b   : > { %5815 = vpow2.f32 %v2167_v10 }
 0xe11   : > { %v5816_v11 = vpop.eup %5815 }
 0xe12   : > { %v2169_v12 = vsel %vm1744_vm0, %v5816_v11, 0.0 }
 0xe13   : > { %2170 = vadd.xlane.f32.xlu1 %v2169_v12 }
 0xe19   : > { %v2294_v13 = vpop.permute.xlu0 %2293 }
 0xe1a   : > { %2314 = vmatpush.msrb.mxu3 %v2294_v13 }
 0xe21   : > { %v2347_v38 = vpop.permute.xlu0 %2346 }
 0xe29   : > { %v2452_v63 = vpop.permute.xlu0 %2451 }
 0xe2c   : > { %2187 = vrot.lane.b32.xlu1 %v7991_v2, %s7101_s5  ;;  %s7110_s5 = smov 56  }
 0xe86   : > { %v2171_v14 = vpop.xlane.xlu1 %2170 }
 0xe87   : > { %5817 = vrcp.f32 %v2171_v14  ;;  %v2183_v20 = vand.u32 2147483648, %v2171_v14  ;;  %vm2177_vm5 = vweird.f32 %v2171_v14  ;;  %v2181_v21 = vand.u32 2147483647, %v2171_v14 }
 0xe89   : > { %v2184_v23 = vor.u32 1.1754944e-38, %v2183_v20  ;;  %vm2182_vm7 = vcmp.eq.f32.partialorder %v2181_v21, 8.507059e+37 }
 0xe8d   : > { %v5818_v15 = vpop.eup %5817 }
 0xe8e   : > { %v2173_v16 = vmul.f32 %v5818_v15, %v2171_v14  ;;  %vm2178_vm4 = vweird.f32 %v5818_v15 }
 0xe8f   : > { %vm2179_vm6 = vmor %vm2177_vm5, %vm2178_vm4 }
 0xe90   : > { %v2174_v17 = vsub.f32 1.0, %v2173_v16 }
 0xe92   : > { %v2175_v18 = vmul.f32 %v5818_v15, %v2174_v17 }
 0xe94   : > { %v2176_v19 = vadd.f32 %v5818_v15, %v2175_v18 }
 0xe96   : > { %v2180_v22 = vsel %vm2179_vm6, %v5818_v15, %v2176_v19 }
 0xe97   : > { %v2185_v24 = vsel %vm2182_vm7, %v2184_v23, %v2180_v22  ;;  %v2529_v23 = vrot.slane %v8007_v7, 6 }
 0xe98   : > { %v2186_v27 = vmul.f32 %v5816_v11, %v2185_v24 }
 0xe9e   : > { %v2188_v26 = vpop.permute.xlu1 %2187 }
 0xe9f   : > { %2208 = vmatpush.msra.mxu2 %v2188_v26 }
 0xea0   : > { %5241 = vmatmul.msk.f32.vlgmr.msra.gmra.mxu2 %vm1744_vm0, %v2186_v27 }
 0xea1   : > { %5244 = vmatpush.xpose.msk.msrb.mxu2 %vm2137_vm1, %v2244_v25 }
 0xea8   : > { %5245 = vmatmul.msk.f32.vlgmr.msrb.gmra.mxu2 %vm2137_vm1, %v2242_v28 }
 0xf23   : > { %v2210_v30 = vpop.f32.mrf.mxu2 }
 0xf24   : > { %5243 = vmatmul.msk.f32.vlgmr.msra.gmra.mxu3 %vm2137_vm1, %v2210_v30 }
 0xf25   : > { %5252 = vmatpush.msk.msra.mxu3 %vm2216_vm3, %v2424_v29 }
 0xf2b   : > { %v2266_v31 = vpop.f32.mrf.mxu2 }
 0xf2c   : > { %v2269_v32 = vsel %vm1744_vm0, %v2266_v31, -inf }
 0xf2d   : > { %2270 = vmax.xlane.f32.xlu2 %v2269_v32 }
 0xf45   : > { %2348 = vrot.lane.b32.xlu2 %v7991_v2, %s7102_s11  ;;  %s7111_s11 = smov 116  }
 0xfa0   : > { %v2271_v33 = vpop.xlane.xlu2 %2270 }
 0xfa1   : > { %v2272_v34 = vsub.f32 %v2266_v31, %v2271_v33 }
 0xfa3   : > { %v2273_v35 = vmul.f32 1.442695, %v2272_v34 }
 0xfa5   : > { %5819 = vpow2.f32 %v2273_v35 }
 0xfa7   : > { %v8031_v61 = vpop.f32.mrf.mxu3 }
 0xfa8   : > { %v2349_v36 = vpop.permute.xlu2 %2348 }
 0xfa9   : > { %5249 = vmatpush.xpose.msk.msrb.mxu0 %vm2137_vm1, %v2349_v36 }
 0xfab   : > { %v5820_v37 = vpop.eup %5819 }
 0xfac   : > { %5250 = vmatmul.msk.f32.vlgmr.msrb.gmra.mxu0 %vm2137_vm1, %v2347_v38  ;;  %v2275_v39 = vsel %vm1744_vm0, %v5820_v37, 0.0 }
 0xfad   : > { %2276 = vadd.xlane.f32.xlu1 %v2275_v39 }
 0xfc6   : > { %2453 = vrot.lane.b32.xlu1 %v7991_v2, %s7103_s26  ;;  %s7112_s26 = smov 54  }
0x1020   : > { %v2277_v41 = vpop.xlane.xlu1 %2276 }
0x1021   : > { %5821 = vrcp.f32 %v2277_v41  ;;  %v2289_v47 = vand.u32 2147483648, %v2277_v41  ;;  %v2287_v49 = vand.u32 2147483647, %v2277_v41  ;;  %vm2283_vm9 = vweird.f32 %v2277_v41 }
0x1023   : > { %v2290_v51 = vor.u32 1.1754944e-38, %v2289_v47  ;;  %vm2288_vm11 = vcmp.eq.f32.partialorder %v2287_v49, 8.507059e+37 }
0x1027   : > { %v5822_v42 = vpop.eup %5821 }
0x1028   : > { %v2279_v43 = vmul.f32 %v5822_v42, %v2277_v41  ;;  %vm2284_vm8 = vweird.f32 %v5822_v42 }
0x1029   : > { %v2371_v44 = vpop.f32.mrf.mxu0  ;;  %vm2285_vm10 = vmor %vm2283_vm9, %vm2284_vm8 }
0x102a   : > { %v2280_v45 = vsub.f32 1.0, %v2279_v43  ;;  %v2374_v46 = vsel %vm1744_vm0, %v2371_v44, -inf }
0x102b   : > { %2375 = vmax.xlane.f32.xlu2 %v2374_v46 }
0x102c   : > { %v2281_v48 = vmul.f32 %v5822_v42, %v2280_v45 }
0x102e   : > { %v2282_v50 = vadd.f32 %v5822_v42, %v2281_v48 }
0x1030   : > { %v2286_v52 = vsel %vm2285_vm10, %v5822_v42, %v2282_v50  ;;  %v5813_v42 = vld [vmem:[#allocation25] ss:$0 sm:$0xff] }
0x1031   : > { %v2291_v53 = vsel %vm2288_vm11, %v2290_v51, %v2286_v52  ;;  %v2240_v43 = vadd.f32 %v5813_v42, %v8031_v61 }
0x1032   : > { %v2292_v54 = vmul.f32 %v5820_v37, %v2291_v53 }
0x1034   : > { %5246 = vmatmul.msk.f32.vlgmr.msrb.gmra.mxu3 %vm1744_vm0, %v2292_v54 }
0x1038   : > { %v2454_v55 = vpop.permute.xlu1 %2453 }
0x1039   : > { %5254 = vmatpush.xpose.msk.msra.mxu1 %vm2137_vm1, %v2454_v55 }
0x109e   : > { %v2376_v56 = vpop.xlane.xlu2 %2375 }
0x109f   : > { %v2377_v57 = vsub.f32 %v2371_v44, %v2376_v56 }
0x10a1   : > { %v2378_v58 = vmul.f32 1.442695, %v2377_v57 }
0x10a3   : > { %5823 = vpow2.f32 %v2378_v58 }
0x10a9   : > { %v5824_v59 = vpop.eup %5823 }
0x10aa   : > { %v2380_v60 = vsel %vm1744_vm0, %v5824_v59, 0.0 }
0x10ab   : > { %2381 = vadd.xlane.f32.xlu1 %v2380_v60  ;;  %v8067_v60 = vld [vmem:[#allocation23 + $0x8] sm:$0xff] }
0x10b7   : > { %v2316_v62 = vpop.f32.mrf.mxu3 }
0x10b8   : > { %5248 = vmatmul.msk.f32.vlgmr.msrb.gmra.mxu1 %vm2137_vm1, %v2316_v62 }
0x10c0   : > { %5255 = vmatmul.msk.f32.vlgmr.msra.gmra.mxu1 %vm2137_vm1, %v2452_v63 }
0x10c4   : > { %2558 = vrot.lane.b32.xlu1 %v7991_v2, %s7104_s0  ;;  %s7113_s0 = smov 82  }
0x111e   : > { %v2382_v0 = vpop.xlane.xlu1 %2381 }
0x111f   : > { %5825 = vrcp.f32 %v2382_v0  ;;  %v2394_v16 = vand.u32 2147483648, %v2382_v0  ;;  %vm2388_vm13 = vweird.f32 %v2382_v0  ;;  %v2392_v18 = vand.u32 2147483647, %v2382_v0 }
0x1121   : > { %v2395_v21 = vor.u32 1.1754944e-38, %v2394_v16  ;;  %vm2393_vm15 = vcmp.eq.f32.partialorder %v2392_v18, 8.507059e+37 }
0x1125   : > { %v5826_v8 = vpop.eup %5825 }
0x1126   : > { %v2384_v9 = vmul.f32 %v5826_v8, %v2382_v0  ;;  %vm2389_vm12 = vweird.f32 %v5826_v8 }
0x1127   : > { %vm2390_vm14 = vmor %vm2388_vm13, %vm2389_vm12 }
0x1128   : > { %v2385_v11 = vsub.f32 1.0, %v2384_v9 }
0x112a   : > { %v2386_v14 = vmul.f32 %v5826_v8, %v2385_v11 }
0x112c   : > { %v2387_v15 = vadd.f32 %v5826_v8, %v2386_v14 }
0x112e   : > { %v2391_v20 = vsel %vm2390_vm14, %v5826_v8, %v2387_v15  ;;  %v2739_v8 = vrot.slane %v8067_v60, 2 }
0x112f   : > { %v2396_v22 = vsel %vm2393_vm15, %v2395_v21, %v2391_v20 }
0x1130   : > { %v2397_v25 = vmul.f32 %v5824_v59, %v2396_v22 }
0x1135   : > { %v8036_v1 = vpop.f32.mrf.mxu1 }
0x1136   : > { %v2559_v4 = vpop.permute.xlu1 %2558  ;;  %v2345_v45 = vadd.f32 %v8036_v1, %v2240_v43 }
0x1137   : > { %5259 = vmatpush.xpose.msk.msrb.mxu3 %vm2137_vm1, %v2559_v4 }
0x113d   : > { %v2476_v5 = vpop.f32.mrf.mxu1 }
0x113e   : > { %v2479_v6 = vsel %vm1744_vm0, %v2476_v5, -inf }
0x113f   : > { %2480 = vmax.xlane.f32.xlu0 %v2479_v6 }
0x1153   : > { %2398 = vrot.lane.b32.xlu0 %v7991_v2, %s7105_s13  ;;  %s7114_s13 = smov 114  }
0x115b   : > { %2663 = vrot.lane.b32.xlu0 %v7991_v2, %s7106_s6  ;;  %s7115_s6 = smov 84  }
0x1163   : > { %2661 = vrot.lane.b32.xlu0 %v7996_v3, %s7107_s4  ;;  %s7116_s4 = smov 52  }
0x11b2   : > { %v2481_v10 = vpop.xlane.xlu0 %2480 }
0x11b3   : > { %v2482_v12 = vsub.f32 %v2476_v5, %v2481_v10 }
0x11b5   : > { %v2483_v13 = vmul.f32 1.442695, %v2482_v12 }
0x11b7   : > { %5827 = vpow2.f32 %v2483_v13 }
0x11bd   : > { %v5828_v17 = vpop.eup %5827 }
0x11be   : > { %v2485_v19 = vsel %vm1744_vm0, %v5828_v17, 0.0 }
0x11bf   : > { %2486 = vadd.xlane.f32.xlu2 %v2485_v19 }
0x11c5   : > { %v2399_v24 = vpop.permute.xlu0 %2398 }
0x11c6   : > { %2419 = vmatpush.msra.mxu2 %v2399_v24 }
0x11c7   : > { %5251 = vmatmul.msk.f32.vlgmr.msra.gmra.mxu2 %vm1744_vm0, %v2397_v25 }
0x11c8   : > { %5257 = vmatpush.msk.msrb.mxu2 %vm2216_vm3, %v2529_v23 }
0x11cd   : > { %v2664_v26 = vpop.permute.xlu0 %2663 }
0x11ce   : > { %5264 = vmatpush.xpose.msk.msra.mxu2 %vm2137_vm1, %v2664_v26 }
0x11d5   : > { %v2662_v44 = vpop.permute.xlu0 %2661 }
0x11d7   : > { %2503 = vrot.lane.b32.xlu2 %v7991_v2, %s7108_s3  ;;  %s7117_s3 = smov 50  }
0x11df   : > { %2556 = vrot.lane.b32.xlu2 %v7996_v3, %s7109_s8  ;;  %s7118_s8 = smov 78  }
0x1232   : > { %v2487_v27 = vpop.xlane.xlu2 %2486 }
0x1233   : > { %5829 = vrcp.f32 %v2487_v27  ;;  %v2499_v31 = vand.u32 2147483648, %v2487_v27  ;;  %v2497_v33 = vand.u32 2147483647, %v2487_v27  ;;  %vm2493_vm5 = vweird.f32 %v2487_v27 }
0x1235   : > { %v2500_v35 = vor.u32 1.1754944e-38, %v2499_v31  ;;  %vm2498_vm7 = vcmp.eq.f32.partialorder %v2497_v33, 8.507059e+37 }
0x1239   : > { %v5830_v28 = vpop.eup %5829 }
0x123a   : > { %v2489_v7 = vmul.f32 %v5830_v28, %v2487_v27  ;;  %v2504_v29 = vpop.permute.xlu2 %2503  ;;  %vm2494_vm4 = vweird.f32 %v5830_v28 }
0x123b   : > { %2524 = vmatpush.msra.mxu0 %v2504_v29  ;;  %vm2495_vm6 = vmor %vm2493_vm5, %vm2494_vm4 }
0x123c   : > { %v2490_v30 = vsub.f32 1.0, %v2489_v7 }
0x123d   : > { %5262 = vmatpush.msk.msrb.mxu0 %vm2216_vm3, %v8067_v60 }
0x123e   : > { %v2491_v32 = vmul.f32 %v5830_v28, %v2490_v30 }
0x1240   : > { %v2492_v34 = vadd.f32 %v5830_v28, %v2491_v32 }
0x1242   : > { %v2496_v36 = vsel %vm2495_vm6, %v5830_v28, %v2492_v34  ;;  %v2557_v40 = vpop.permute.xlu2 %2556 }
0x1243   : > { %v2501_v37 = vsel %vm2498_vm7, %v2500_v35, %v2496_v36 }
0x1244   : > { %v2502_v38 = vmul.f32 %v5828_v17, %v2501_v37 }
0x1246   : > { %5256 = vmatmul.msk.f32.vlgmr.msra.gmra.mxu0 %vm1744_vm0, %v2502_v38 }
0x124a   : > { %v2421_v39 = vpop.f32.mrf.mxu2 }
0x124b   : > { %5253 = vmatmul.msk.f32.vlgmr.msra.gmra.mxu3 %vm2137_vm1, %v2421_v39 }
0x1253   : > { %5260 = vmatmul.msk.f32.vlgmr.msrb.gmra.mxu3 %vm2137_vm1, %v2557_v40 }
0x12c3   : > { %v2526_v41 = vpop.f32.mrf.mxu0 }
0x12c4   : > { %5258 = vmatmul.msk.f32.vlgmr.msrb.gmra.mxu2 %vm2137_vm1, %v2526_v41 }
0x12cc   : > { %5265 = vmatmul.msk.f32.vlgmr.msra.gmra.mxu2 %vm2137_vm1, %v2662_v44 }
0x12ce   : > { %v2447_v46 = vpop.f32.mrf.mxu3 }
0x12cf   : > { %v2450_v47 = vadd.f32 %v2447_v46, %v2345_v45 }
0x12d6   : > { %v2581_v48 = vpop.f32.mrf.mxu3 }
0x12d7   : > { %v2584_v49 = vsel %vm1744_vm0, %v2581_v48, -inf }
0x12d8   : > { %2585 = vmax.xlane.f32.xlu2 %v2584_v49 }
0x1347   : > { %v2552_v50 = vpop.f32.mrf.mxu2 }
0x1348   : > { %v8058_v51 = vadd.f32 %v2552_v50, %v2450_v47 }
0x134b   : > { %v2586_v52 = vpop.xlane.xlu2 %2585 }
0x134c   : > { %v2587_v53 = vsub.f32 %v2581_v48, %v2586_v52 }
0x134e   : > { %v2588_v54 = vmul.f32 1.442695, %v2587_v53 }
0x134f   : > { %v2686_v55 = vpop.f32.mrf.mxu2 }
0x1350   : > { %5831 = vpow2.f32 %v2588_v54  ;;  %v2689_v56 = vsel %vm1744_vm0, %v2686_v55, -inf }
0x1351   : > { %2690 = vmax.xlane.f32.xlu0 %v2689_v56 }
0x1356   : > { %v5832_v57 = vpop.eup %5831 }
0x1357   : > { %v2590_v58 = vsel %vm1744_vm0, %v5832_v57, 0.0 }
0x1358   : > { %2591 = vadd.xlane.f32.xlu1 %v2590_v58 }
0x1365   : > { %2608 = vrot.lane.b32.xlu0 %v7991_v2, %s7110_s5  ;;  %s7119_s5 = smov 110  }
0x136d   : > { %2766 = vrot.lane.b32.xlu0 %v7996_v3, %s7111_s11  ;;  %s7120_s11 = smov 80  }
0x1371   : > { %2713 = vrot.lane.b32.xlu1 %v7991_v2, %s7112_s26  ;;  %s7121_s26 = smov 112  }
0x1375   : > { %2873 = vrot.lane.b32.xlu0 %v7991_v2, %s7113_s0  ;;  %s7122_s0 = smov 48  }
0x1379   : > { %2871 = vrot.lane.b32.xlu1 %v7996_v3, %s7114_s13  ;;  %s7123_s13 = smov 108  }
0x13c4   : > { %v2691_v59 = vpop.xlane.xlu0 %2690 }
0x13c5   : > { %v2692_v61 = vsub.f32 %v2686_v55, %v2691_v59 }
0x13c7   : > { %v2693_v62 = vmul.f32 1.442695, %v2692_v61 }
0x13c9   : > { %5833 = vpow2.f32 %v2693_v62 }
0x13cb   : > { %v2592_v63 = vpop.xlane.xlu1 %2591 }
0x13cc   : > { %5835 = vrcp.f32 %v2592_v63  ;;  %v2604_v9 = vand.u32 2147483648, %v2592_v63  ;;  %v2602_v11 = vand.u32 2147483647, %v2592_v63  ;;  %vm2598_vm9 = vweird.f32 %v2592_v63 }
0x13ce   : > { %v2605_v14 = vor.u32 1.1754944e-38, %v2604_v9  ;;  %vm2603_vm11 = vcmp.eq.f32.partialorder %v2602_v11, 8.507059e+37 }
0x13cf   : > { %v5834_v0 = vpop.eup %5833 }
0x13d0   : > { %v2695_v1 = vsel %vm1744_vm0, %v5834_v0, 0.0 }
0x13d1   : > { %2696 = vadd.xlane.f32.xlu2 %v2695_v1 }
0x13d2   : > { %v5836_v4 = vpop.eup %5835 }
0x13d3   : > { %v2594_v5 = vmul.f32 %v5836_v4, %v2592_v63  ;;  %vm2599_vm8 = vweird.f32 %v5836_v4 }
0x13d4   : > { %vm2600_vm10 = vmor %vm2598_vm9, %vm2599_vm8 }
0x13d5   : > { %v2595_v6 = vsub.f32 1.0, %v2594_v5 }
0x13d7   : > { %v2596_v10 = vmul.f32 %v5836_v4, %v2595_v6  ;;  %v2609_v12 = vpop.permute.xlu0 %2608 }
0x13d8   : > { %2629 = vmatpush.msrb.mxu1 %v2609_v12 }
0x13d9   : > { %v2597_v13 = vadd.f32 %v5836_v4, %v2596_v10  ;;  %v2844_v10 = vrot.slane %v8067_v60, 4 }
0x13da   : > { %5267 = vmatpush.msk.msra.mxu1 %vm2216_vm3, %v2739_v8 }
0x13db   : > { %v2601_v15 = vsel %vm2600_vm10, %v5836_v4, %v2597_v13  ;;  %v2949_v4 = vrot.slane %v8067_v60, 6 }
0x13dc   : > { %v2606_v16 = vsel %vm2603_vm11, %v2605_v14, %v2601_v15 }
0x13dd   : > { %v2607_v17 = vmul.f32 %v5832_v57, %v2606_v16 }
0x13df   : > { %5261 = vmatmul.msk.f32.vlgmr.msrb.gmra.mxu1 %vm1744_vm0, %v2607_v17  ;;  %v2767_v18 = vpop.permute.xlu0 %2766 }
0x13e3   : > { %v2714_v19 = vpop.permute.xlu1 %2713 }
0x13e4   : > { %2734 = vmatpush.msra.mxu3 %v2714_v19 }
0x13e6   : > { %5272 = vmatpush.msk.msrb.mxu3 %vm2216_vm3, %v2844_v10 }
0x13e7   : > { %v2874_v20 = vpop.permute.xlu0 %2873 }
0x13e8   : > { %5274 = vmatpush.xpose.msk.msrb.mxu1 %vm2137_vm1, %v2874_v20 }
0x13e9   : > { %2768 = vrot.lane.b32.xlu2 %v7991_v2, %s7115_s6  ;;  %s7124_s6 = smov 46  }
0x13eb   : > { %v2872_v38 = vpop.permute.xlu1 %2871 }
0x1444   : > { %v2697_v21 = vpop.xlane.xlu2 %2696 }
0x1445   : > { %5837 = vrcp.f32 %v2697_v21  ;;  %v2709_v26 = vand.u32 2147483648, %v2697_v21  ;;  %v2707_v28 = vand.u32 2147483647, %v2697_v21  ;;  %vm2703_vm13 = vweird.f32 %v2697_v21 }
0x1447   : > { %v2710_v29 = vor.u32 1.1754944e-38, %v2709_v26  ;;  %vm2708_vm15 = vcmp.eq.f32.partialorder %v2707_v28, 8.507059e+37 }
0x144b   : > { %v5838_v22 = vpop.eup %5837 }
0x144c   : > { %v2699_v23 = vmul.f32 %v5838_v22, %v2697_v21  ;;  %v2769_v24 = vpop.permute.xlu2 %2768  ;;  %vm2704_vm12 = vweird.f32 %v5838_v22 }
0x144d   : > { %5269 = vmatpush.xpose.msk.msra.mxu0 %vm2137_vm1, %v2769_v24  ;;  %vm2705_vm14 = vmor %vm2703_vm13, %vm2704_vm12 }
0x144e   : > { %v2700_v25 = vsub.f32 1.0, %v2699_v23 }
0x1450   : > { %v2701_v27 = vmul.f32 %v5838_v22, %v2700_v25 }
0x1452   : > { %v2702_v7 = vadd.f32 %v5838_v22, %v2701_v27 }
0x1454   : > { %v2706_v30 = vsel %vm2705_vm14, %v5838_v22, %v2702_v7 }
0x1455   : > { %v2711_v31 = vsel %vm2708_vm15, %v2710_v29, %v2706_v30 }
0x1456   : > { %v2712_v32 = vmul.f32 %v5834_v0, %v2711_v31 }
0x1458   : > { %5266 = vmatmul.msk.f32.vlgmr.msra.gmra.mxu3 %vm1744_vm0, %v2712_v32 }
0x145c   : > { %v2631_v33 = vpop.f32.mrf.mxu1 }
0x145d   : > { %5263 = vmatmul.msk.f32.vlgmr.msrb.gmra.mxu0 %vm2137_vm1, %v2631_v33 }
0x1465   : > { %5270 = vmatmul.msk.f32.vlgmr.msra.gmra.mxu0 %vm2137_vm1, %v2767_v18 }
0x14da   : > { %v2657_v34 = vpop.f32.mrf.mxu0 }
0x14db   : > { %v2660_v35 = vadd.f32 %v2657_v34, %v8058_v51  ;;  %v2736_v36 = vpop.f32.mrf.mxu3 }
0x14dc   : > { %5268 = vmatmul.msk.f32.vlgmr.msra.gmra.mxu1 %vm2137_vm1, %v2736_v36 }
0x14e2   : > { %v2791_v37 = vpop.f32.mrf.mxu0 }
0x14e3   : > { %v2794_v39 = vsel %vm1744_vm0, %v2791_v37, -inf }
0x14e4   : > { %2795 = vmax.xlane.f32.xlu2 %v2794_v39  ;;  %5275 = vmatmul.msk.f32.vlgmr.msrb.gmra.mxu1 %vm2137_vm1, %v2872_v38 }
0x1557   : > { %v2796_v40 = vpop.xlane.xlu2 %2795 }
0x1558   : > { %v2797_v41 = vsub.f32 %v2791_v37, %v2796_v40 }
0x1559   : > { %v2762_v42 = vpop.f32.mrf.mxu1 }
0x155a   : > { %v2798_v43 = vmul.f32 1.442695, %v2797_v41  ;;  %v8085_v44 = vadd.f32 %v2762_v42, %v2660_v35 }
0x155c   : > { %5839 = vpow2.f32 %v2798_v43 }
0x1561   : > { %v2896_v45 = vpop.f32.mrf.mxu1 }
0x1562   : > { %v5840_v46 = vpop.eup %5839  ;;  %v2899_v47 = vsel %vm1744_vm0, %v2896_v45, -inf }
0x1563   : > { %2900 = vmax.xlane.f32.xlu0 %v2899_v47  ;;  %v2800_v48 = vsel %vm1744_vm0, %v5840_v46, 0.0 }
0x1564   : > { %2801 = vadd.xlane.f32.xlu1 %v2800_v48 }
0x1577   : > { %2818 = vrot.lane.b32.xlu0 %v7991_v2, %s7116_s4  ;;  %s7125_s4 = smov 106  }
0x157d   : > { %2923 = vrot.lane.b32.xlu1 %v7991_v2, %s7117_s3  ;;  %s7126_s3 = smov 76  }
0x157f   : > { %3083 = vrot.lane.b32.xlu0 %v7991_v2, %s7118_s8  ;;  %s7127_s8 = smov 74  }
0x1585   : > { %3081 = vrot.lane.b32.xlu1 %v7996_v3, %s7119_s5  ;;  %s7128_s5 = smov 44  }
0x15d6   : > { %v2901_v49 = vpop.xlane.xlu0 %2900 }
0x15d7   : > { %v2902_v50 = vsub.f32 %v2896_v45, %v2901_v49  ;;  %v2802_v51 = vpop.xlane.xlu1 %2801 }
0x15d8   : > { %5841 = vrcp.f32 %v2802_v51  ;;  %v2814_v57 = vand.u32 2147483648, %v2802_v51  ;;  %v2812_v61 = vand.u32 2147483647, %v2802_v51  ;;  %vm2808_vm5 = vweird.f32 %v2802_v51 }
0x15d9   : > { %v2903_v52 = vmul.f32 1.442695, %v2902_v50 }
0x15da   : > { %v2815_v63 = vor.u32 1.1754944e-38, %v2814_v57  ;;  %vm2813_vm7 = vcmp.eq.f32.partialorder %v2812_v61, 8.507059e+37 }
0x15db   : > { %5843 = vpow2.f32 %v2903_v52 }
0x15de   : > { %v5842_v53 = vpop.eup %5841 }
0x15df   : > { %v2804_v54 = vmul.f32 %v5842_v53, %v2802_v51  ;;  %vm2809_vm4 = vweird.f32 %v5842_v53 }
0x15e0   : > { %vm2810_vm6 = vmor %vm2808_vm5, %vm2809_vm4 }
0x15e1   : > { %v5844_v55 = vpop.eup %5843  ;;  %v2805_v56 = vsub.f32 1.0, %v2804_v54 }
0x15e2   : > { %v2905_v58 = vsel %vm1744_vm0, %v5844_v55, 0.0 }
0x15e3   : > { %v2806_v59 = vmul.f32 %v5842_v53, %v2805_v56  ;;  %2906 = vadd.xlane.f32.xlu2 %v2905_v58  ;;  %v8123_v58 = vld [vmem:[#allocation23 + $0x10] sm:$0xff] }
0x15e4   : > { %v3264_v61 = vrot.slane %v8123_v58, 4 }
0x15e5   : > { %v2807_v62 = vadd.f32 %v5842_v53, %v2806_v59  ;;  %v3159_v59 = vrot.slane %v8123_v58, 2 }
0x15e7   : > { %v2811_v0 = vsel %vm2810_vm6, %v5842_v53, %v2807_v62 }
0x15e8   : > { %v2816_v1 = vsel %vm2813_vm7, %v2815_v63, %v2811_v0 }
0x15e9   : > { %v2819_v5 = vpop.permute.xlu0 %2818  ;;  %v2817_v6 = vmul.f32 %v5840_v46, %v2816_v1 }
0x15ea   : > { %2839 = vmatpush.msrb.mxu2 %v2819_v5 }
0x15eb   : > { %5271 = vmatmul.msk.f32.vlgmr.msrb.gmra.mxu2 %vm1744_vm0, %v2817_v6 }
0x15ec   : > { %5277 = vmatpush.msk.msra.mxu2 %vm2216_vm3, %v2949_v4 }
0x15ef   : > { %v2924_v8 = vpop.permute.xlu1 %2923 }
0x15f0   : > { %2944 = vmatpush.msrb.mxu0 %v2924_v8 }
0x15f1   : > { %v3084_v9 = vpop.permute.xlu0 %3083 }
0x15f2   : > { %5284 = vmatpush.xpose.msk.msrb.mxu2 %vm2137_vm1, %v3084_v9  ;;  %5282 = vmatpush.msk.msra.mxu0 %vm2216_vm3, %v8123_v58 }
0x15f7   : > { %v3082_v26 = vpop.permute.xlu1 %3081 }
0x15fb   : > { %2978 = vrot.lane.b32.xlu2 %v7991_v2, %s7120_s11  ;;  %s7129_s11 = smov 42  }
0x1603   : > { %2976 = vrot.lane.b32.xlu2 %v7996_v3, %s7121_s26 }
0x1656   : > { %v2907_v11 = vpop.xlane.xlu2 %2906 }
0x1657   : > { %5845 = vrcp.f32 %v2907_v11  ;;  %v2919_v16 = vand.u32 2147483648, %v2907_v11  ;;  %v2917_v18 = vand.u32 2147483647, %v2907_v11  ;;  %vm2913_vm9 = vweird.f32 %v2907_v11 }
0x1659   : > { %v2920_v20 = vor.u32 1.1754944e-38, %v2919_v16  ;;  %vm2918_vm11 = vcmp.eq.f32.partialorder %v2917_v18, 8.507059e+37 }
0x165d   : > { %v5846_v12 = vpop.eup %5845 }
0x165e   : > { %v2909_v13 = vmul.f32 %v5846_v12, %v2907_v11  ;;  %v2979_v14 = vpop.permute.xlu2 %2978  ;;  %vm2914_vm8 = vweird.f32 %v5846_v12 }
0x165f   : > { %5279 = vmatpush.xpose.msk.msra.mxu3 %vm2137_vm1, %v2979_v14  ;;  %vm2915_vm10 = vmor %vm2913_vm9, %vm2914_vm8 }
0x1660   : > { %v2910_v15 = vsub.f32 1.0, %v2909_v13 }
0x1662   : > { %v2911_v17 = vmul.f32 %v5846_v12, %v2910_v15 }
0x1664   : > { %v2912_v19 = vadd.f32 %v5846_v12, %v2911_v17 }
0x1666   : > { %v2916_v60 = vsel %vm2915_vm10, %v5846_v12, %v2912_v19  ;;  %v2977_v24 = vpop.permute.xlu2 %2976 }
0x1667   : > { %v2921_v21 = vsel %vm2918_vm11, %v2920_v20, %v2916_v60 }
0x1668   : > { %v2922_v22 = vmul.f32 %v5844_v55, %v2921_v21 }
0x166a   : > { %5276 = vmatmul.msk.f32.vlgmr.msrb.gmra.mxu0 %vm1744_vm0, %v2922_v22 }
0x166e   : > { %v2841_v23 = vpop.f32.mrf.mxu2 }
0x166f   : > { %5273 = vmatmul.msk.f32.vlgmr.msrb.gmra.mxu3 %vm2137_vm1, %v2841_v23 }
0x1677   : > { %5280 = vmatmul.msk.f32.vlgmr.msra.gmra.mxu3 %vm2137_vm1, %v2977_v24 }
0x16e7   : > { %v2946_v25 = vpop.f32.mrf.mxu0 }
0x16e8   : > { %5278 = vmatmul.msk.f32.vlgmr.msra.gmra.mxu2 %vm2137_vm1, %v2946_v25 }
0x16f0   : > { %5285 = vmatmul.msk.f32.vlgmr.msrb.gmra.mxu2 %vm2137_vm1, %v3082_v26 }
0x16f2   : > { %v2867_v27 = vpop.f32.mrf.mxu3 }
0x16f3   : > { %v2870_v28 = vadd.f32 %v2867_v27, %v8085_v44 }
0x16fa   : > { %v3001_v7 = vpop.f32.mrf.mxu3 }
0x16fb   : > { %v3004_v29 = vsel %vm1744_vm0, %v3001_v7, -inf }
0x16fc   : > { %3005 = vmax.xlane.f32.xlu0 %v3004_v29 }
0x176b   : > { %v2972_v30 = vpop.f32.mrf.mxu2 }
0x176c   : > { %v8111_v31 = vadd.f32 %v2972_v30, %v2870_v28 }
0x176f   : > { %v3006_v32 = vpop.xlane.xlu0 %3005 }
0x1770   : > { %v3007_v33 = vsub.f32 %v3001_v7, %v3006_v32 }
0x1772   : > { %v3008_v34 = vmul.f32 1.442695, %v3007_v33 }
0x1773   : > { %v3106_v35 = vpop.f32.mrf.mxu2 }
0x1774   : > { %5847 = vpow2.f32 %v3008_v34  ;;  %v3109_v36 = vsel %vm1744_vm0, %v3106_v35, -inf }
0x1775   : > { %3110 = vmax.xlane.f32.xlu2 %v3109_v36 }
0x177a   : > { %v5848_v37 = vpop.eup %5847 }
0x177b   : > { %v3010_v38 = vsel %vm1744_vm0, %v5848_v37, 0.0 }
0x177c   : > { %3011 = vadd.xlane.f32.xlu1 %v3010_v38 }
0x178d   : > { %3028 = vrot.lane.b32.xlu2 %v7991_v2, %s7122_s0  ;;  %s7130_s0 = smov 70  }
0x1795   : > { %3186 = vrot.lane.b32.xlu2 %v7996_v3, %s7123_s13  ;;  %3133 = vrot.lane.b32.xlu1 %v7991_v2, %s7124_s6  ;;  %s7131_s13 = smov 104   ;;  %s7132_s6 = smov 102  }
0x179d   : > { %3291 = vrot.lane.b32.xlu1 %v7996_v3, %s7125_s4  ;;  %s7133_s4 = smov 72  }
0x17e8   : > { %v3111_v39 = vpop.xlane.xlu2 %3110 }
0x17e9   : > { %v3112_v40 = vsub.f32 %v3106_v35, %v3111_v39 }
0x17eb   : > { %v3113_v41 = vmul.f32 1.442695, %v3112_v40 }
0x17ed   : > { %5849 = vpow2.f32 %v3113_v41 }
0x17ef   : > { %v3012_v42 = vpop.xlane.xlu1 %3011 }
0x17f0   : > { %5851 = vrcp.f32 %v3012_v42  ;;  %v3029_v43 = vpop.permute.xlu2 %3028  ;;  %v3024_v49 = vand.u32 2147483648, %v3012_v42  ;;  %v3022_v51 = vand.u32 2147483647, %v3012_v42  ;;  %vm3018_vm13 = vweird.f32 %v3012_v42 }
0x17f1   : > { %3049 = vmatpush.msra.mxu1 %v3029_v43 }
0x17f2   : > { %v3025_v53 = vor.u32 1.1754944e-38, %v3024_v49  ;;  %vm3023_vm15 = vcmp.eq.f32.partialorder %v3022_v51, 8.507059e+37 }
0x17f3   : > { %v5850_v44 = vpop.eup %5849  ;;  %5287 = vmatpush.msk.msrb.mxu1 %vm2216_vm3, %v3159_v59 }
0x17f4   : > { %v3115_v45 = vsel %vm1744_vm0, %v5850_v44, 0.0 }
0x17f5   : > { %3116 = vadd.xlane.f32.xlu0 %v3115_v45  ;;  %v3369_v45 = vrot.slane %v8123_v58, 6 }
0x17f6   : > { %v5852_v46 = vpop.eup %5851 }
0x17f7   : > { %v3014_v47 = vmul.f32 %v5852_v46, %v3012_v42  ;;  %vm3019_vm12 = vweird.f32 %v5852_v46 }
0x17f8   : > { %vm3020_vm14 = vmor %vm3018_vm13, %vm3019_vm12  ;;  %v3187_v16 = vpop.permute.xlu2 %3186 }
0x17f9   : > { %v3015_v48 = vsub.f32 1.0, %v3014_v47 }
0x17fb   : > { %v3016_v50 = vmul.f32 %v5852_v46, %v3015_v48 }
0x17fd   : > { %v3017_v52 = vadd.f32 %v5852_v46, %v3016_v50 }
0x17ff   : > { %v3021_v54 = vsel %vm3020_vm14, %v5852_v46, %v3017_v52 }
0x1800   : > { %v3026_v55 = vsel %vm3023_vm15, %v3025_v53, %v3021_v54 }
0x1801   : > { %v3027_v56 = vmul.f32 %v5848_v37, %v3026_v55 }
0x1803   : > { %5281 = vmatmul.msk.f32.vlgmr.msra.gmra.mxu1 %vm1744_vm0, %v3027_v56 }
0x1807   : > { %v3134_v57 = vpop.permute.xlu1 %3133 }
0x1808   : > { %3154 = vmatpush.msrb.mxu3 %v3134_v57 }
0x1809   : > { %3188 = vrot.lane.b32.xlu0 %v7991_v2, %s7126_s3  ;;  %s7134_s3 = smov 40  }
0x180a   : > { %5292 = vmatpush.msk.msra.mxu3 %vm2216_vm3, %v3264_v61 }
0x180f   : > { %v3292_v60 = vpop.permute.xlu1 %3291 }
0x1811   : > { %3293 = vrot.lane.b32.xlu0 %v7991_v2, %s7127_s8  ;;  %s7135_s8 = smov 38  }
0x1868   : > { %v3117_v62 = vpop.xlane.xlu0 %3116 }
0x1869   : > { %5853 = vrcp.f32 %v3117_v62  ;;  %v3129_v4 = vand.u32 2147483648, %v3117_v62  ;;  %v3127_v6 = vand.u32 2147483647, %v3117_v62  ;;  %vm3123_vm5 = vweird.f32 %v3117_v62 }
0x186b   : > { %v3130_v9 = vor.u32 1.1754944e-38, %v3129_v4  ;;  %vm3128_vm7 = vcmp.eq.f32.partialorder %v3127_v6, 8.507059e+37 }
0x186f   : > { %v5854_v63 = vpop.eup %5853 }
0x1870   : > { %v3119_v0 = vmul.f32 %v5854_v63, %v3117_v62  ;;  %vm3124_vm4 = vweird.f32 %v5854_v63 }
0x1871   : > { %vm3125_vm6 = vmor %vm3123_vm5, %vm3124_vm4 }
0x1872   : > { %v3120_v1 = vsub.f32 1.0, %v3119_v0 }
0x1874   : > { %v3121_v5 = vmul.f32 %v5854_v63, %v3120_v1 }
0x1876   : > { %v3122_v8 = vadd.f32 %v5854_v63, %v3121_v5 }
0x1878   : > { %v3126_v10 = vsel %vm3125_vm6, %v5854_v63, %v3122_v8 }
0x1879   : > { %v3131_v11 = vsel %vm3128_vm7, %v3130_v9, %v3126_v10 }
0x187a   : > { %v3132_v12 = vmul.f32 %v5850_v44, %v3131_v11 }
0x187b   : > { %v3189_v13 = vpop.permute.xlu0 %3188 }
0x187c   : > { %5286 = vmatmul.msk.f32.vlgmr.msrb.gmra.mxu3 %vm1744_vm0, %v3132_v12  ;;  %5289 = vmatpush.xpose.msk.msrb.mxu0 %vm2137_vm1, %v3189_v13 }
0x1880   : > { %v3051_v14 = vpop.f32.mrf.mxu1 }
0x1881   : > { %5283 = vmatmul.msk.f32.vlgmr.msra.gmra.mxu0 %vm2137_vm1, %v3051_v14 }
0x1883   : > { %v3294_v15 = vpop.permute.xlu0 %3293 }
0x1884   : > { %5294 = vmatpush.xpose.msk.msra.mxu1 %vm2137_vm1, %v3294_v15 }
0x1889   : > { %5290 = vmatmul.msk.f32.vlgmr.msrb.gmra.mxu0 %vm2137_vm1, %v3187_v16 }
0x18fe   : > { %v3077_v17 = vpop.f32.mrf.mxu0 }
0x18ff   : > { %v3080_v18 = vadd.f32 %v3077_v17, %v8111_v31  ;;  %v3156_v19 = vpop.f32.mrf.mxu3 }
0x1900   : > { %5288 = vmatmul.msk.f32.vlgmr.msrb.gmra.mxu1 %vm2137_vm1, %v3156_v19 }
0x1906   : > { %v3211_v20 = vpop.f32.mrf.mxu0 }
0x1907   : > { %v3214_v21 = vsel %vm1744_vm0, %v3211_v20, -inf }
0x1908   : > { %3215 = vmax.xlane.f32.xlu2 %v3214_v21  ;;  %5295 = vmatmul.msk.f32.vlgmr.msra.gmra.mxu1 %vm2137_vm1, %v3292_v60  ;;  %v8171_v60 = vld [vmem:[#allocation23 + $0x18] sm:$0xff] }
0x197b   : > { %v3216_v22 = vpop.xlane.xlu2 %3215 }
0x197c   : > { %v3217_v23 = vsub.f32 %v3211_v20, %v3216_v22 }
0x197d   : > { %v3182_v24 = vpop.f32.mrf.mxu1 }
0x197e   : > { %v3218_v25 = vmul.f32 1.442695, %v3217_v23  ;;  %v8140_v26 = vadd.f32 %v3182_v24, %v3080_v18 }
0x1980   : > { %5855 = vpow2.f32 %v3218_v25 }
0x1985   : > { %v3316_v27 = vpop.f32.mrf.mxu1 }
0x1986   : > { %v5856_v28 = vpop.eup %5855  ;;  %v3319_v7 = vsel %vm1744_vm0, %v3316_v27, -inf }
0x1987   : > { %3320 = vmax.xlane.f32.xlu0 %v3319_v7  ;;  %v3220_v29 = vsel %vm1744_vm0, %v5856_v28, 0.0 }
0x1988   : > { %3221 = vadd.xlane.f32.xlu1 %v3220_v29 }
0x199b   : > { %3238 = vrot.lane.b32.xlu0 %v7991_v2, %s7128_s5  ;;  %s7136_s5 = smov 66  }
0x19a1   : > { %3343 = vrot.lane.b32.xlu1 %v7991_v2, %s7129_s11  ;;  %s7137_s11 = smov 100  }
0x19a3   : > { %3503 = vrot.lane.b32.xlu0 %v7991_v2, %s7130_s0  ;;  %s7138_s0 = smov 68  }
0x19a9   : > { %3396 = vrot.lane.b32.xlu1 %v7996_v3, %s7131_s13  ;;  %s7139_s13 = smov 98  }
0x19ab   : > { %3501 = vrot.lane.b32.xlu0 %v7996_v3, %s7132_s6  ;;  %s7140_s6 = smov 36  }
0x19fa   : > { %v3321_v30 = vpop.xlane.xlu0 %3320 }
0x19fb   : > { %v3322_v31 = vsub.f32 %v3316_v27, %v3321_v30  ;;  %v3222_v32 = vpop.xlane.xlu1 %3221 }
0x19fc   : > { %5857 = vrcp.f32 %v3222_v32  ;;  %v3234_v38 = vand.u32 2147483648, %v3222_v32  ;;  %v3232_v41 = vand.u32 2147483647, %v3222_v32  ;;  %vm3228_vm9 = vweird.f32 %v3222_v32 }
0x19fd   : > { %v3323_v33 = vmul.f32 1.442695, %v3322_v31 }
0x19fe   : > { %v3235_v43 = vor.u32 1.1754944e-38, %v3234_v38  ;;  %vm3233_vm11 = vcmp.eq.f32.partialorder %v3232_v41, 8.507059e+37 }
0x19ff   : > { %5859 = vpow2.f32 %v3323_v33 }
0x1a02   : > { %v5858_v34 = vpop.eup %5857 }
0x1a03   : > { %v3224_v35 = vmul.f32 %v5858_v34, %v3222_v32  ;;  %vm3229_vm8 = vweird.f32 %v5858_v34 }
0x1a04   : > { %vm3230_vm10 = vmor %vm3228_vm9, %vm3229_vm8 }
0x1a05   : > { %v5860_v36 = vpop.eup %5859  ;;  %v3225_v37 = vsub.f32 1.0, %v3224_v35 }
0x1a06   : > { %v3325_v39 = vsel %vm1744_vm0, %v5860_v36, 0.0 }
0x1a07   : > { %v3226_v40 = vmul.f32 %v5858_v34, %v3225_v37  ;;  %3326 = vadd.xlane.f32.xlu2 %v3325_v39 }
0x1a09   : > { %v3227_v42 = vadd.f32 %v5858_v34, %v3226_v40 }
0x1a0b   : > { %v3231_v44 = vsel %vm3230_vm10, %v5858_v34, %v3227_v42  ;;  %v3579_v34 = vrot.slane %v8171_v60, 2 }
0x1a0c   : > { %v3236_v46 = vsel %vm3233_vm11, %v3235_v43, %v3231_v44 }
0x1a0d   : > { %v3239_v47 = vpop.permute.xlu0 %3238  ;;  %v3237_v48 = vmul.f32 %v5856_v28, %v3236_v46 }
0x1a0e   : > { %3259 = vmatpush.msra.mxu2 %v3239_v47 }
0x1a0f   : > { %5291 = vmatmul.msk.f32.vlgmr.msra.gmra.mxu2 %vm1744_vm0, %v3237_v48 }
0x1a10   : > { %5297 = vmatpush.msk.msrb.mxu2 %vm2216_vm3, %v3369_v45 }
0x1a13   : > { %v3344_v49 = vpop.permute.xlu1 %3343 }
0x1a14   : > { %3364 = vmatpush.msra.mxu0 %v3344_v49 }
0x1a15   : > { %v3504_v50 = vpop.permute.xlu0 %3503 }
0x1a16   : > { %5304 = vmatpush.xpose.msk.msra.mxu2 %vm2137_vm1, %v3504_v50  ;;  %5302 = vmatpush.msk.msrb.mxu0 %vm2216_vm3, %v8171_v60 }
0x1a1b   : > { %v3397_v4 = vpop.permute.xlu1 %3396 }
0x1a1d   : > { %v3502_v6 = vpop.permute.xlu0 %3501 }
0x1a1f   : > { %3398 = vrot.lane.b32.xlu2 %v7991_v2, %s7133_s4  ;;  %s7141_s4 = smov 34  }
0x1a7a   : > { %v3327_v51 = vpop.xlane.xlu2 %3326 }
0x1a7b   : > { %5861 = vrcp.f32 %v3327_v51  ;;  %v3339_v56 = vand.u32 2147483648, %v3327_v51  ;;  %v3337_v58 = vand.u32 2147483647, %v3327_v51  ;;  %vm3333_vm13 = vweird.f32 %v3327_v51 }
0x1a7d   : > { %v3340_v61 = vor.u32 1.1754944e-38, %v3339_v56  ;;  %vm3338_vm15 = vcmp.eq.f32.partialorder %v3337_v58, 8.507059e+37 }
0x1a81   : > { %v5862_v52 = vpop.eup %5861 }
0x1a82   : > { %v3329_v53 = vmul.f32 %v5862_v52, %v3327_v51  ;;  %v3399_v54 = vpop.permute.xlu2 %3398  ;;  %vm3334_vm12 = vweird.f32 %v5862_v52 }
0x1a83   : > { %5299 = vmatpush.xpose.msk.msrb.mxu3 %vm2137_vm1, %v3399_v54  ;;  %vm3335_vm14 = vmor %vm3333_vm13, %vm3334_vm12 }
0x1a84   : > { %v3330_v55 = vsub.f32 1.0, %v3329_v53 }
0x1a86   : > { %v3331_v57 = vmul.f32 %v5862_v52, %v3330_v55 }
0x1a88   : > { %v3332_v59 = vadd.f32 %v5862_v52, %v3331_v57 }
0x1a8a   : > { %v3336_v62 = vsel %vm3335_vm14, %v5862_v52, %v3332_v59 }
0x1a8b   : > { %v3341_v63 = vsel %vm3338_vm15, %v3340_v61, %v3336_v62 }
0x1a8c   : > { %v3342_v0 = vmul.f32 %v5860_v36, %v3341_v63 }
0x1a8e   : > { %5296 = vmatmul.msk.f32.vlgmr.msra.gmra.mxu0 %vm1744_vm0, %v3342_v0 }
0x1a92   : > { %v3261_v1 = vpop.f32.mrf.mxu2 }
0x1a93   : > { %5293 = vmatmul.msk.f32.vlgmr.msra.gmra.mxu3 %vm2137_vm1, %v3261_v1 }
0x1a9b   : > { %5300 = vmatmul.msk.f32.vlgmr.msrb.gmra.mxu3 %vm2137_vm1, %v3397_v4 }
0x1b0b   : > { %v3366_v5 = vpop.f32.mrf.mxu0 }
0x1b0c   : > { %5298 = vmatmul.msk.f32.vlgmr.msrb.gmra.mxu2 %vm2137_vm1, %v3366_v5 }
0x1b14   : > { %5305 = vmatmul.msk.f32.vlgmr.msra.gmra.mxu2 %vm2137_vm1, %v3502_v6 }
0x1b16   : > { %v3287_v8 = vpop.f32.mrf.mxu3 }
0x1b17   : > { %v3290_v9 = vadd.f32 %v3287_v8, %v8140_v26 }
0x1b1e   : > { %v3421_v10 = vpop.f32.mrf.mxu3 }
0x1b1f   : > { %v3424_v11 = vsel %vm1744_vm0, %v3421_v10, -inf }
0x1b20   : > { %3425 = vmax.xlane.f32.xlu2 %v3424_v11 }
0x1b8f   : > { %v3392_v12 = vpop.f32.mrf.mxu2 }
0x1b90   : > { %v8163_v13 = vadd.f32 %v3392_v12, %v3290_v9 }
0x1b93   : > { %v3426_v14 = vpop.xlane.xlu2 %3425 }
0x1b94   : > { %v3427_v15 = vsub.f32 %v3421_v10, %v3426_v14 }
0x1b96   : > { %v3428_v16 = vmul.f32 1.442695, %v3427_v15 }
0x1b97   : > { %v3526_v17 = vpop.f32.mrf.mxu2 }
0x1b98   : > { %5863 = vpow2.f32 %v3428_v16  ;;  %v3529_v18 = vsel %vm1744_vm0, %v3526_v17, -inf }
0x1b99   : > { %3530 = vmax.xlane.f32.xlu1 %v3529_v18 }
0x1b9e   : > { %v5864_v19 = vpop.eup %5863 }
0x1b9f   : > { %v3430_v20 = vsel %vm1744_vm0, %v5864_v19, 0.0 }
0x1ba0   : > { %3431 = vadd.xlane.f32.xlu0 %v3430_v20 }
0x1bb2   : > { %3448 = vrot.lane.b32.xlu1 %v7991_v2, %s7134_s3  ;;  %s8215_s3 = smov 0  }
0x1bb4   : > { %3553 = vrot.lane.b32.xlu0 %v7991_v2, %s7135_s8 }
0x1bba   : > { %3713 = vrot.lane.b32.xlu1 %v7991_v2, %s7136_s5 }
0x1bbc   : > { %3606 = vrot.lane.b32.xlu0 %v7996_v3, %s7137_s11 }
0x1c0c   : > { %v3531_v21 = vpop.xlane.xlu1 %3530 }
0x1c0d   : > { %v3532_v22 = vsub.f32 %v3526_v17, %v3531_v21 }
0x1c0f   : > { %v3533_v23 = vmul.f32 1.442695, %v3532_v22 }
0x1c11   : > { %5865 = vpow2.f32 %v3533_v23 }
0x1c13   : > { %v3432_v24 = vpop.xlane.xlu0 %3431 }
0x1c14   : > { %5867 = vrcp.f32 %v3432_v24  ;;  %v3444_v29 = vand.u32 2147483648, %v3432_v24  ;;  %v3442_v31 = vand.u32 2147483647, %v3432_v24  ;;  %vm3438_vm5 = vweird.f32 %v3432_v24 }
0x1c16   : > { %v3445_v33 = vor.u32 1.1754944e-38, %v3444_v29  ;;  %vm3443_vm7 = vcmp.eq.f32.partialorder %v3442_v31, 8.507059e+37 }
0x1c17   : > { %v5866_v25 = vpop.eup %5865 }
0x1c18   : > { %v3535_v26 = vsel %vm1744_vm0, %v5866_v25, 0.0 }
0x1c19   : > { %3536 = vadd.xlane.f32.xlu2 %v3535_v26 }
0x1c1a   : > { %v5868_v27 = vpop.eup %5867 }
0x1c1b   : > { %v3434_v28 = vmul.f32 %v5868_v27, %v3432_v24  ;;  %vm3439_vm4 = vweird.f32 %v5868_v27 }
0x1c1c   : > { %vm3440_vm6 = vmor %vm3438_vm5, %vm3439_vm4 }
0x1c1d   : > { %v3435_v7 = vsub.f32 1.0, %v3434_v28  ;;  %v3684_v28 = vrot.slane %v8171_v60, 4 }
0x1c1f   : > { %v3436_v30 = vmul.f32 %v5868_v27, %v3435_v7  ;;  %v3789_v7 = vrot.slane %v8171_v60, 6 }
0x1c21   : > { %v3437_v32 = vadd.f32 %v5868_v27, %v3436_v30 }
0x1c23   : > { %v3441_v35 = vsel %vm3440_vm6, %v5868_v27, %v3437_v32 }
0x1c24   : > { %v3449_v36 = vpop.permute.xlu1 %3448  ;;  %v3446_v37 = vsel %vm3443_vm7, %v3445_v33, %v3441_v35 }
0x1c25   : > { %3469 = vmatpush.msrb.mxu1 %v3449_v36  ;;  %v3447_v38 = vmul.f32 %v5864_v19, %v3446_v37 }
0x1c26   : > { %v3554_v39 = vpop.permute.xlu0 %3553 }
0x1c27   : > { %5307 = vmatpush.msk.msra.mxu1 %vm2216_vm3, %v3579_v34  ;;  %3574 = vmatpush.msra.mxu3 %v3554_v39 }
0x1c28   : > { %5301 = vmatmul.msk.f32.vlgmr.msrb.gmra.mxu1 %vm1744_vm0, %v3447_v38 }
0x1c29   : > { %5312 = vmatpush.msk.msrb.mxu3 %vm2216_vm3, %v3684_v28 }
0x1c2c   : > { %v3714_v40 = vpop.permute.xlu1 %3713 }
0x1c2d   : > { %5314 = vmatpush.xpose.msk.msrb.mxu1 %vm2137_vm1, %v3714_v40 }
0x1c2e   : > { %v3607_v54 = vpop.permute.xlu0 %3606 }
0x1c31   : > { %3608 = vrot.lane.b32.xlu2 %v7991_v2, %s7138_s0 }
0x1c39   : > { %3711 = vrot.lane.b32.xlu2 %v7996_v3, %s7139_s13 }
0x1c8c   : > { %v3537_v41 = vpop.xlane.xlu2 %3536 }
0x1c8d   : > { %5869 = vrcp.f32 %v3537_v41  ;;  %v3549_v46 = vand.u32 2147483648, %v3537_v41  ;;  %v3547_v48 = vand.u32 2147483647, %v3537_v41  ;;  %vm3543_vm9 = vweird.f32 %v3537_v41 }
0x1c8f   : > { %v3550_v50 = vor.u32 1.1754944e-38, %v3549_v46  ;;  %vm3548_vm11 = vcmp.eq.f32.partialorder %v3547_v48, 8.507059e+37 }
0x1c93   : > { %v5870_v42 = vpop.eup %5869 }
0x1c94   : > { %v3539_v43 = vmul.f32 %v5870_v42, %v3537_v41  ;;  %v3609_v44 = vpop.permute.xlu2 %3608  ;;  %vm3544_vm8 = vweird.f32 %v5870_v42 }
0x1c95   : > { %5309 = vmatpush.xpose.msk.msra.mxu0 %vm2137_vm1, %v3609_v44  ;;  %vm3545_vm10 = vmor %vm3543_vm9, %vm3544_vm8  ;;  %v3819_v44 = vld [vmem:[#allocation26 + $0x8] sm:$0xff] }
0x1c96   : > { %v3540_v45 = vsub.f32 1.0, %v3539_v43  ;;  %v3820_v43 = vld [vmem:[#allocation26 + $0x10] sm:$0xff] }
0x1c98   : > { %v3541_v47 = vmul.f32 %v5870_v42, %v3540_v45  ;;  %v3818_v45 = vld [vmem:[#allocation26] sm:$0xff] }
0x1c9a   : > { %v3542_v49 = vadd.f32 %v5870_v42, %v3541_v47 }
0x1c9c   : > { %v3546_v51 = vsel %vm3545_vm10, %v5870_v42, %v3542_v49  ;;  %v3712_v59 = vpop.permute.xlu2 %3711  ;;  %v3821_v42 = vld [vmem:[#allocation26 + $0x18] sm:$0xff] }
0x1c9d   : > { %v3551_v52 = vsel %vm3548_vm11, %v3550_v50, %v3546_v51  ;;  %v8208_v51 = vld [vmem:[#allocation28] sm:$0xff] }
0x1c9e   : > { %v3552_v3 = vmul.f32 %v5866_v25, %v3551_v52  ;;  %v8210_v52 = vld [vmem:[#allocation28 + $0x8] sm:$0xff] }
0x1ca0   : > { %5306 = vmatmul.msk.f32.vlgmr.msra.gmra.mxu3 %vm1744_vm0, %v3552_v3  ;;  %v8212_v3 = vld [vmem:[#allocation31] sm:$0x1] }
0x1ca1   : > { %3841 = vmatpush.msra.mxu3 %v3821_v42 }
0x1ca3   : > { %3842 = vmatpush.msra.mxu3 %v3820_v43 }
0x1ca5   : > { %v3471_v53 = vpop.f32.mrf.mxu1  ;;  %3843 = vmatpush.msra.mxu3 %v3819_v44 }
0x1ca6   : > { %5303 = vmatmul.msk.f32.vlgmr.msrb.gmra.mxu0 %vm2137_vm1, %v3471_v53  ;;  %v5814_v53 = vld [vmem:[#allocation29] ss:$0 sm:$0xff] }
0x1ca7   : > { %3844 = vmatpush.msra.mxu3 %v3818_v45 }
0x1cae   : > { %5310 = vmatmul.msk.f32.vlgmr.msra.gmra.mxu0 %vm2137_vm1, %v3607_v54 }
0x1d23   : > { %v3497_v55 = vpop.f32.mrf.mxu0  ;;  %v3576_v57 = vpop.f32.mrf.mxu3 }
0x1d24   : > { %v3500_v56 = vadd.f32 %v3497_v55, %v8163_v13  ;;  %5308 = vmatmul.msk.f32.vlgmr.msra.gmra.mxu1 %vm2137_vm1, %v3576_v57 }
0x1d2b   : > { %v3631_v58 = vpop.f32.mrf.mxu0 }
0x1d2c   : > { %v3634_v61 = vsel %vm1744_vm0, %v3631_v58, -inf  ;;  %5315 = vmatmul.msk.f32.vlgmr.msrb.gmra.mxu1 %vm2137_vm1, %v3712_v59 }
0x1d2d   : > { %3635 = vmax.xlane.f32.xlu0 %v3634_v61 }
0x1da0   : > { %v3636_v62 = vpop.xlane.xlu0 %3635 }
0x1da1   : > { %v3637_v63 = vsub.f32 %v3631_v58, %v3636_v62  ;;  %v3602_v0 = vpop.f32.mrf.mxu1 }
0x1da2   : > { %v8190_v4 = vadd.f32 %v3602_v0, %v3500_v56  ;;  %v6992_v56 = vmov 0.0  }
0x1da3   : > { %v3638_v1 = vmul.f32 1.442695, %v3637_v63 }
0x1da5   : > { %5871 = vpow2.f32 %v3638_v1 }
0x1da9   : > { %v3736_v5 = vpop.f32.mrf.mxu1 }
0x1daa   : > { %v3739_v8 = vsel %vm1744_vm0, %v3736_v5, -inf }
0x1dab   : > { %v5872_v6 = vpop.eup %5871  ;;  %3740 = vmax.xlane.f32.xlu1 %v3739_v8 }
0x1dac   : > { %v3640_v9 = vsel %vm1744_vm0, %v5872_v6, 0.0 }
0x1dad   : > { %3641 = vadd.xlane.f32.xlu2 %v3640_v9 }
0x1dc4   : > { %3658 = vrot.lane.b32.xlu1 %v7991_v2, %s7140_s6 }
0x1dc5   : > { %3763 = vrot.lane.b32.xlu2 %v7991_v2, %s7141_s4 }
0x1e1e   : > { %v3741_v10 = vpop.xlane.xlu1 %3740 }
0x1e1f   : > { %v3742_v11 = vsub.f32 %v3736_v5, %v3741_v10 }
0x1e20   : > { %v3642_v12 = vpop.xlane.xlu2 %3641 }
0x1e21   : > { %5873 = vrcp.f32 %v3642_v12  ;;  %v3743_v13 = vmul.f32 1.442695, %v3742_v11  ;;  %v3654_v22 = vand.u32 2147483648, %v3642_v12  ;;  %vm3648_vm13 = vweird.f32 %v3642_v12 }
0x1e22   : > { %v3652_v2 = vand.u32 2147483647, %v3642_v12 }
0x1e23   : > { %5875 = vpow2.f32 %v3743_v13  ;;  %v3655_v24 = vor.u32 1.1754944e-38, %v3654_v22 }
0x1e24   : > { %vm3653_vm15 = vcmp.eq.f32.partialorder %v3652_v2, 8.507059e+37 }
0x1e27   : > { %v5874_v14 = vpop.eup %5873 }
0x1e28   : > { %v3644_v15 = vmul.f32 %v5874_v14, %v3642_v12  ;;  %v3764_v16 = vpop.permute.xlu2 %3763  ;;  %vm3649_vm12 = vweird.f32 %v5874_v14 }
0x1e29   : > { %3784 = vmatpush.msrb.mxu0 %v3764_v16  ;;  %v5876_v17 = vpop.eup %5875  ;;  %vm3650_vm14 = vmor %vm3648_vm13, %vm3649_vm12 }
0x1e2a   : > { %v3645_v18 = vsub.f32 1.0, %v3644_v15  ;;  %v3745_v19 = vsel %vm1744_vm0, %v5876_v17, 0.0 }
0x1e2b   : > { %3746 = vadd.xlane.f32.xlu0 %v3745_v19 }
0x1e2c   : > { %v3646_v20 = vmul.f32 %v5874_v14, %v3645_v18 }
0x1e2e   : > { %v3647_v21 = vadd.f32 %v5874_v14, %v3646_v20 }
0x1e30   : > { %v3651_v23 = vsel %vm3650_vm14, %v5874_v14, %v3647_v21 }
0x1e31   : > { %v3656_v25 = vsel %vm3653_vm15, %v3655_v24, %v3651_v23 }
0x1e32   : > { %v3657_v27 = vmul.f32 %v5872_v6, %v3656_v25 }
0x1e36   : > { %v3659_v26 = vpop.permute.xlu1 %3658 }
0x1e37   : > { %3679 = vmatpush.msrb.mxu2 %v3659_v26 }
0x1e38   : > { %5311 = vmatmul.msk.f32.vlgmr.msrb.gmra.mxu2 %vm1744_vm0, %v3657_v27 }
0x1e39   : > { %5317 = vmatpush.msk.msra.mxu2 %vm2216_vm3, %v3789_v7 }
0x1e9e   : > { %v3747_v29 = vpop.xlane.xlu0 %3746 }
0x1e9f   : > { %5877 = vrcp.f32 %v3747_v29  ;;  %v3759_v33 = vand.u32 2147483648, %v3747_v29  ;;  %v3757_v35 = vand.u32 2147483647, %v3747_v29  ;;  %vm3753_vm5 = vweird.f32 %v3747_v29 }
0x1ea1   : > { %v3760_v37 = vor.u32 1.1754944e-38, %v3759_v33  ;;  %vm3758_vm7 = vcmp.eq.f32.partialorder %v3757_v35, 8.507059e+37 }
0x1ea5   : > { %v5878_v30 = vpop.eup %5877 }
0x1ea6   : > { %v3749_v31 = vmul.f32 %v5878_v30, %v3747_v29  ;;  %vm3754_vm4 = vweird.f32 %v5878_v30 }
0x1ea7   : > { %vm3755_vm6 = vmor %vm3753_vm5, %vm3754_vm4 }
0x1ea8   : > { %v3750_v32 = vsub.f32 1.0, %v3749_v31 }
0x1eaa   : > { %v3751_v34 = vmul.f32 %v5878_v30, %v3750_v32 }
0x1eac   : > { %v3752_v36 = vadd.f32 %v5878_v30, %v3751_v34 }
0x1eae   : > { %v3756_v38 = vsel %vm3755_vm6, %v5878_v30, %v3752_v36 }
0x1eaf   : > { %v3761_v39 = vsel %vm3758_vm7, %v3760_v37, %v3756_v38 }
0x1eb0   : > { %v3762_v40 = vmul.f32 %v5876_v17, %v3761_v39 }
0x1eb2   : > { %5316 = vmatmul.msk.f32.vlgmr.msrb.gmra.mxu0 %vm1744_vm0, %v3762_v40  ;;  %vm3849_vm0 = vcmask 392192  }
0x1ebb   : > { %v3681_v60 = vpop.f32.mrf.mxu2 }
0x1ebc   : > { %5313 = vmatmul.msk.f32.vlgmr.msrb.gmra.mxu3 %vm2137_vm1, %v3681_v60 }
0x1f2f   : > { %v3786_v41 = vpop.f32.mrf.mxu0 }
0x1f30   : > { %5318 = vmatmul.msk.f32.vlgmr.msra.gmra.mxu2 %vm2137_vm1, %v3786_v41 }
0x1f3f   : > { %v3707_v46 = vpop.f32.mrf.mxu3 }
0x1f40   : > { %v3710_v47 = vadd.f32 %v3707_v46, %v8190_v4 }
0x1fb3   : > { %v3812_v48 = vpop.f32.mrf.mxu2 }
0x1fb4   : > { %v3815_v49 = vadd.f32 %v3812_v48, %v3710_v47 }
0x1fb6   : > { %3816 = vst.msk [vmem:[#allocation2] sm:$0xff] %vm1787_vm2, %v3815_v49 }
0x1fbd   : > { %v3817_v50 = vld [vmem:[#allocation2] sm:$0xff] }
0x1fbe   : > { %5319 = vmatmul.msk.f32.vlgmr.msra.gmra.mxu3 %vm1787_vm2, %v3817_v50 }
0x2041   : > { %v3846_v54 = vpop.f32.mrf.mxu3 }
0x2042   : > { %v3847_v55 = vadd.f32 %v5814_v53, %v3846_v54 }
0x2044   : > { %3850 = vst.msk [vmem:[#allocation5] sm:$0xff] %vm3849_vm0, %v3847_v55 }
0x2045 LB: >> { %3883 = vmatpush.msra.mxu0 %v8210_v52  ;;  %s7142_s8 = smov 112   ;;  %vm3866_vm1 = vcmask 130048   ;;  %s7143_s5 = smov 96   ;;  %vm3933_vm11 = vcmask 122880   ;;  %s6998_s3 = sphi %s8215_s3, %s3859_s3   ;;  %v6994_v56 = vphi %v6992_v56, %v3927_v56  }
0x2046   : >> { %3864 = vrot.lane.b32.xlu0 %v6994_v56, %s7142_s8  ;;  %s3861_s11 = scalar_lea.vmem [#allocation5], %s6998_s3  ;;  %s7144_s0 = smov 32  }
0x2047   : >> { %3884 = vmatpush.msra.mxu0 %v8208_v51  ;;  %s3932_s13 = scalar_lea.vmem [#allocation3], %s6998_s3  ;;  %s3859_s3 = sadd.s32 1, %s6998_s3  }
0x2048   : >> { %p3856_p0 = scmp.ge.s32.totalorder %s3859_s3, 8  }
0x2049   : > { %v3937_v24 = vld [vmem:[#allocation32 + $0x8] sm:$0xff] (%p3856_p0)  ;;  %v3936_v25 = vld [vmem:[#allocation32] sm:$0xff] (%p3856_p0)  ;;  %v8233_v27 = vld [vmem:[#allocation34] sm:$0xff] (%p3856_p0)  ;;  %v7000_v32 = vmov (%p3856_p0), 0.0   ;;  %v7004_v33 = vmov (%p3856_p0), 0.0   ;;  %s8240_s6 = smov (%p3856_p0), 0  }
0x204a   : > { %v8235_v28 = vld [vmem:[#allocation34 + $0x8] sm:$0xff] (%p3856_p0)  ;;  %v8237_v7 = vld [vmem:[#allocation37] sm:$0x1] (%p3856_p0)  ;;  %v5885_v29 = vld [vmem:[#allocation35] ss:$0 sm:$0xff] (%p3856_p0) }
0x204b   : >> { %v3862_v61 = vld [vmem:[%s3861_s11] sm:$0x1] }
0x20b8   : >> { %v3865_v57 = vpop.permute.xlu0 %3864 }
0x20b9   : >> { %5320 = vmatmul.msk.f32.vlgmr.msra.gmra.mxu0 %vm3866_vm1, %v3865_v57 }
0x20ba   : > { %3960 = vmatpush.msra.mxu0 (%p3856_p0), %v3937_v24 }
0x20bc   : > { %3961 = vmatpush.msra.mxu0 (%p3856_p0), %v3936_v25 }
0x2136   : >> { %v3886_v58 = vpop.f32.mrf.mxu0 }
0x2137   : >> { %v3887_v59 = vadd.f32 %v3886_v58, %v8212_v3 }
0x2139   : >> { %3910 = vrot.lane.b32.xlu0 %v3887_v59, %s7143_s5  ;;  %v3889_v62 = vadd.f32 %v3887_v59, %v3862_v61 }
0x213b   : >> { %v5321_v63 = vmul.f32 -1.442695, %v3889_v62 }
0x213d   : >> { %5879 = vpow2.f32 %v5321_v63 }
0x2143   : >> { %v5880_v0 = vpop.eup %5879 }
0x2144   : >> { %v3893_v1 = vadd.f32 1.0, %v5880_v0 }
0x2146   : >> { %5881 = vrcp.f32 %v3893_v1  ;;  %v3905_v10 = vand.u32 2147483648, %v3893_v1  ;;  %vm3899_vm8 = vweird.f32 %v3893_v1  ;;  %v3903_v11 = vand.u32 2147483647, %v3893_v1 }
0x2148   : >> { %v3906_v13 = vor.u32 1.1754944e-38, %v3905_v10  ;;  %vm3904_vm10 = vcmp.eq.f32.partialorder %v3903_v11, 8.507059e+37 }
0x214c   : >> { %v5882_v4 = vpop.eup %5881 }
0x214d   : >> { %v3895_v5 = vmul.f32 %v5882_v4, %v3893_v1  ;;  %vm3900_vm3 = vweird.f32 %v5882_v4 }
0x214e   : >> { %vm3901_vm9 = vmor %vm3899_vm8, %vm3900_vm3 }
0x214f   : >> { %v3896_v6 = vsub.f32 1.0, %v3895_v5 }
0x2151   : >> { %v3897_v8 = vmul.f32 %v5882_v4, %v3896_v6 }
0x2153   : >> { %v3898_v9 = vadd.f32 %v5882_v4, %v3897_v8 }
0x2155   : >> { %v3902_v12 = vsel %vm3901_vm9, %v5882_v4, %v3898_v9 }
0x2156   : >> { %v3907_v15 = vsel %vm3904_vm10, %v3906_v13, %v3902_v12 }
0x2157   : >> { %v3920_v20 = vsub.f32 1.0, %v3907_v15  ;;  %v3926_v2 = vmul.f32 %v6994_v56, %v3907_v15 }
0x21ab   : >> { %v3911_v14 = vpop.permute.xlu0 %3910 }
0x21ac   : >> { %v3913_v16 = vmul.f32 %v3911_v14, %v3907_v15 }
0x21ae   : >> { %3915 = vrot.lane.b32.xlu1 %v3913_v16, %s7144_s0 }
0x2220   : >> { %v3916_v17 = vpop.permute.xlu1 %3915 }
0x2221   : >> { %v3918_v18 = vadd.f32 %v3916_v17, %v3862_v61 }
0x2223   : >> { %5883 = vtanh.f32 %v3918_v18 }
0x2229   : >> { %v5884_v19 = vpop.eup %5883 }
0x222a   : >> { %3922 = vrot.lane.b32.xlu1 %v5884_v19, %s7142_s8 }
0x229c   : >> { %v3923_v21 = vpop.permute.xlu1 %3922 }
0x229d   : >> { %v3925_v22 = vmul.f32 %v3923_v21, %v3920_v20 }
0x229f   : >> { %v3927_v56 = vadd.f32 %v3926_v2, %v3925_v22  }
0x22a1   : >> { %3929 = vrot.lane.b32.xlu2 %v3927_v56, %s7142_s8 }
0x22f8   : > { %3858 = sbr.rel (!%p3856_p0) target bundleno = 8261 (0x2045), region = 470 }
0x22fb   : >> { %v3930_v23 = vpop.permute.xlu2 %3929 }
0x22fc   : >> { %3934 = vst.msk [vmem:[%s3932_s13] sm:$0x1] %vm3933_vm11, %v3930_v23 }
0x2303   : > { %v3935_v26 = vld [vmem:[#allocation3] sm:$0xff] }
0x2304   : > { %5322 = vmatmul.msk.f32.vlgmr.msra.gmra.mxu0 %vm3866_vm1, %v3935_v26 }
0x2381   : > { %v3963_v30 = vpop.f32.mrf.mxu0 }
0x2382   : > { %v3964_v31 = vadd.f32 %v5885_v29, %v3963_v30 }
0x2384   : > { %3966 = vst.msk [vmem:[#allocation5] sm:$0xff] %vm3849_vm0, %v3964_v31 }
0x2385 LB: >> { %3999 = vmatpush.msra.mxu0 %v8235_v28  ;;  %s7145_s4 = smov 112   ;;  %s7146_s3 = smov 96   ;;  %s7010_s6 = sphi %s8240_s6, %s3975_s6   ;;  %v7006_v33 = vphi %v7004_v33, %v7005_v33   ;;  %v7002_v32 = vphi %v7000_v32, %v7001_v32  }
0x2386   : >> { %3981 = vrot.lane.b32.xlu0 %v7006_v33, %s7145_s4  ;;  %s3978_s8 = scalar_lea.vmem [#allocation5], %s7010_s6  ;;  %s7147_s5 = smov 32  }
0x2387   : >> { %4000 = vmatpush.msra.mxu0 %v8233_v27  ;;  %s3975_s6 = sadd.s32 1, %s7010_s6  }
0x2388   : >> { %p3972_p1 = scmp.ge.s32.totalorder %s3975_s6, 8  }
0x2389   : > { %s8450_s11 = sld [smem:[#allocation92_spill]] (%p3972_p1)  ;;  %v4255_v17 = vld [vmem:[#allocation43 + $0x1f0] sm:$0xff] (%p3972_p1)  ;;  %v4253_v18 = vld [vmem:[#allocation43 + $0x1e0] sm:$0xff] (%p3972_p1)  ;;  %vm4700_vm0 = vcmask (%p3972_p1), 0  }
0x238a   : > { %v4223_v19 = vld [vmem:[#allocation43 + $0xf0] sm:$0xff] (%p3972_p1)  ;;  %v4221_v22 = vld [vmem:[#allocation43 + $0xe0] sm:$0xff] (%p3972_p1)  ;;  %s8453_s0 = sld [smem:[#allocation97_spill]] (%p3972_p1) }
0x238b   : >> { %v3979_v37 = vld [vmem:[%s3978_s8] sm:$0x1]  ;;  %v4287_v20 = vld [vmem:[#allocation43 + $0x2f0] sm:$0xff] (%p3972_p1)  ;;  %v4285_v2 = vld [vmem:[#allocation43 + $0x2e0] sm:$0xff] (%p3972_p1)  ;;  %s8454_s6 = sld [smem:[#allocation104_spill]] (%p3972_p1)  ;;  %s7150_s8 = smov (%p3972_p1), 125  }
0x238c   : > { %v4251_v21 = vld [vmem:[#allocation43 + $0x1d0] sm:$0xff] (%p3972_p1)  ;;  %v4249_v25 = vld [vmem:[#allocation43 + $0x1c0] sm:$0xff] (%p3972_p1) }
0x238d   : > { %v4219_v23 = vld [vmem:[#allocation43 + $0xd0] sm:$0xff] (%p3972_p1)  ;;  %v4217_v26 = vld [vmem:[#allocation43 + $0xc0] sm:$0xff] (%p3972_p1) }
0x238e   : > { %v4283_v24 = vld [vmem:[#allocation43 + $0x2d0] sm:$0xff] (%p3972_p1)  ;;  %v4281_v27 = vld [vmem:[#allocation43 + $0x2c0] sm:$0xff] (%p3972_p1) }
0x238f   : > { %s8451_s13 = smov (%p3972_p1), %s8450_s11  ;;  %v4063_v62 = vld [vmem:[%s8450_s11 + $0x60] sm:$0xff] (%p3972_p1)  ;;  %v4247_v28 = vld [vmem:[#allocation43 + $0x1b0] sm:$0xff] (%p3972_p1) }
0x2390   : > { %v4064_v63 = vld [vmem:[%s8451_s13 + $0x68] sm:$0xff] (%p3972_p1)  ;;  %v4065_v0 = vld [vmem:[%s8451_s13 + $0x70] sm:$0xff] (%p3972_p1)  ;;  %4092 = vmatpush.msra.mxu3 (%p3972_p1), %v4063_v62  ;;  %v4059_v1 = vld [vmem:[%s8451_s13 + $0x40] sm:$0xff] (%p3972_p1) }
0x2391   : > { %4112 = vmatpush.msra.mxu1 (%p3972_p1), %v4064_v63  ;;  %v4060_v4 = vld [vmem:[%s8451_s13 + $0x48] sm:$0xff] (%p3972_p1)  ;;  %v4061_v5 = vld [vmem:[%s8451_s13 + $0x50] sm:$0xff] (%p3972_p1)  ;;  %4132 = vmatpush.msra.mxu2 (%p3972_p1), %v4065_v0  ;;  %v4055_v6 = vld [vmem:[%s8451_s13 + $0x20] sm:$0xff] (%p3972_p1) }
0x2392   : > { %v4056_v8 = vld [vmem:[%s8451_s13 + $0x28] sm:$0xff] (%p3972_p1)  ;;  %4093 = vmatpush.msra.mxu3 (%p3972_p1), %v4059_v1  ;;  %v4057_v9 = vld [vmem:[%s8451_s13 + $0x30] sm:$0xff] (%p3972_p1)  ;;  %v4051_v10 = vld [vmem:[%s8451_s13] sm:$0xff] (%p3972_p1) }
0x2393   : > { %4113 = vmatpush.msra.mxu1 (%p3972_p1), %v4060_v4  ;;  %4133 = vmatpush.msra.mxu2 (%p3972_p1), %v4061_v5  ;;  %v4052_v11 = vld [vmem:[%s8451_s13 + $0x8] sm:$0xff] (%p3972_p1)  ;;  %v4053_v12 = vld [vmem:[%s8451_s13 + $0x10] sm:$0xff] (%p3972_p1)  ;;  %v4066_v13 = vld [vmem:[%s8451_s13 + $0x78] sm:$0xff] (%p3972_p1) }
0x2394   : > { %4094 = vmatpush.msra.mxu3 (%p3972_p1), %v4055_v6  ;;  %v4062_v14 = vld [vmem:[%s8451_s13 + $0x58] sm:$0xff] (%p3972_p1)  ;;  %v4245_v30 = vld [vmem:[#allocation43 + $0x1a0] sm:$0xff] (%p3972_p1) }
0x2395   : > { %4114 = vmatpush.msra.mxu1 (%p3972_p1), %v4056_v8  ;;  %4134 = vmatpush.msra.mxu2 (%p3972_p1), %v4057_v9  ;;  %v4058_v15 = vld [vmem:[%s8451_s13 + $0x38] sm:$0xff] (%p3972_p1)  ;;  %v4213_v31 = vld [vmem:[#allocation43 + $0xa0] sm:$0xff] (%p3972_p1)  ;;  %v4254_v9 = vld [vmem:[#allocation43 + $0x1e8] sm:$0xff] (%p3972_p1) }
0x2396   : > { %4095 = vmatpush.msra.mxu3 (%p3972_p1), %v4051_v10  ;;  %v4054_v16 = vld [vmem:[%s8451_s13 + $0x18] sm:$0xff] (%p3972_p1)  ;;  %v4313_v62 = vld [vmem:[#allocation43 + $0x3c0] sm:$0xff] (%p3972_p1) }
0x2397   : > { %4115 = vmatpush.msra.mxu1 (%p3972_p1), %v4052_v11  ;;  %4135 = vmatpush.msra.mxu2 (%p3972_p1), %v4053_v12  ;;  %v4279_v29 = vld [vmem:[#allocation43 + $0x2b0] sm:$0xff] (%p3972_p1)  ;;  %v4261_v63 = vld [vmem:[#allocation43 + $0x220] sm:$0xff] (%p3972_p1)  ;;  %v4256_v4 = vld [vmem:[#allocation43 + $0x1f8] sm:$0xff] (%p3972_p1) }
0x2398   : > { %4152 = vmatpush.msrb.mxu3 (%p3972_p1), %v4066_v13  ;;  %v4225_v0 = vld [vmem:[#allocation43 + $0x100] sm:$0xff] (%p3972_p1)  ;;  %v4311_v1 = vld [vmem:[#allocation43 + $0x3b0] sm:$0xff] (%p3972_p1)  ;;  %v4252_v13 = vld [vmem:[#allocation43 + $0x1d8] sm:$0xff] (%p3972_p1) }
0x2399   : > { %4347 = vmatpush.msrb.mxu1 (%p3972_p1), %v4255_v17  ;;  %4367 = vmatpush.msrb.mxu2 (%p3972_p1), %v4287_v20  ;;  %v4195_v5 = vld [vmem:[#allocation43 + $0x10] sm:$0xff] (%p3972_p1)  ;;  %v4309_v8 = vld [vmem:[#allocation43 + $0x3a0] sm:$0xff] (%p3972_p1)  ;;  %v4250_v17 = vld [vmem:[#allocation43 + $0x1c8] sm:$0xff] (%p3972_p1) }
0x239a   : > { %4153 = vmatpush.msrb.mxu3 (%p3972_p1), %v4062_v14  ;;  %v4259_v6 = vld [vmem:[#allocation43 + $0x210] sm:$0xff] (%p3972_p1)  ;;  %v4193_v10 = vld [vmem:[#allocation43] sm:$0xff] (%p3972_p1)  ;;  %v4224_v14 = vld [vmem:[#allocation43 + $0xf8] sm:$0xff] (%p3972_p1) }
0x239b   : > { %4348 = vmatpush.msrb.mxu1 (%p3972_p1), %v4253_v18  ;;  %4368 = vmatpush.msrb.mxu2 (%p3972_p1), %v4285_v2  ;;  %v4257_v11 = vld [vmem:[#allocation43 + $0x200] sm:$0xff] (%p3972_p1)  ;;  %v4307_v12 = vld [vmem:[#allocation43 + $0x390] sm:$0xff] (%p3972_p1)  ;;  %v4222_v18 = vld [vmem:[#allocation43 + $0xe8] sm:$0xff] (%p3972_p1) }
0x239c   : > { %4154 = vmatpush.msrb.mxu3 (%p3972_p1), %v4058_v15  ;;  %v4288_v15 = vld [vmem:[#allocation43 + $0x2f8] sm:$0xff] (%p3972_p1)  ;;  %v4303_v20 = vld [vmem:[#allocation43 + $0x370] sm:$0xff] (%p3972_p1) }
0x239d   : > { %4349 = vmatpush.msrb.mxu1 (%p3972_p1), %v4251_v21  ;;  %4369 = vmatpush.msrb.mxu2 (%p3972_p1), %v4283_v24  ;;  %v4248_v21 = vld [vmem:[#allocation43 + $0x1b8] sm:$0xff] (%p3972_p1)  ;;  %v4246_v24 = vld [vmem:[#allocation43 + $0x1a8] sm:$0xff] (%p3972_p1) }
0x239e   : > { %4155 = vmatpush.msrb.mxu3 (%p3972_p1), %v4054_v16  ;;  %v4305_v16 = vld [vmem:[#allocation43 + $0x380] sm:$0xff] (%p3972_p1)  ;;  %v4284_v2 = vld [vmem:[#allocation43 + $0x2d8] sm:$0xff] (%p3972_p1) }
0x239f   : > { %4350 = vmatpush.msrb.mxu1 (%p3972_p1), %v4249_v25  ;;  %4370 = vmatpush.msrb.mxu2 (%p3972_p1), %v4281_v27  ;;  %v4218_v25 = vld [vmem:[#allocation43 + $0xc8] sm:$0xff] (%p3972_p1)  ;;  %v4299_v27 = vld [vmem:[#allocation43 + $0x350] sm:$0xff] (%p3972_p1) }
0x23a1   : > { %4351 = vmatpush.msrb.mxu1 (%p3972_p1), %v4247_v28  ;;  %4371 = vmatpush.msrb.mxu2 (%p3972_p1), %v4279_v29  ;;  %v4244_v28 = vld [vmem:[#allocation43 + $0x198] sm:$0xff] (%p3972_p1)  ;;  %v4295_v29 = vld [vmem:[#allocation43 + $0x330] sm:$0xff] (%p3972_p1) }
0x23a3   : > { %4352 = vmatpush.msrb.mxu1 (%p3972_p1), %v4245_v30  ;;  %v4293_v30 = vld [vmem:[#allocation43 + $0x320] sm:$0xff] (%p3972_p1) }
0x23f8   : >> { %v3982_v34 = vpop.permute.xlu0 %3981 }
0x23f9   : >> { %5323 = vmatmul.msk.f32.vlgmr.msra.gmra.mxu0 %vm3866_vm1, %v3982_v34  ;;  %v4211_v34 = vld [vmem:[#allocation43 + $0x90] sm:$0xff] (%p3972_p1) }
0x23fa   : > { %4327 = vmatpush.msra.mxu0 (%p3972_p1), %v4223_v19  ;;  %v4286_v19 = vld [vmem:[#allocation43 + $0x2e8] sm:$0xff] (%p3972_p1) }
0x23fc   : > { %4328 = vmatpush.msra.mxu0 (%p3972_p1), %v4221_v22  ;;  %v4220_v22 = vld [vmem:[#allocation43 + $0xd8] sm:$0xff] (%p3972_p1) }
0x23fe   : > { %4329 = vmatpush.msra.mxu0 (%p3972_p1), %v4219_v23  ;;  %v4301_v23 = vld [vmem:[#allocation43 + $0x360] sm:$0xff] (%p3972_p1) }
0x2400   : > { %4330 = vmatpush.msra.mxu0 (%p3972_p1), %v4217_v26  ;;  %v4282_v26 = vld [vmem:[#allocation43 + $0x2c8] sm:$0xff] (%p3972_p1) }
0x2476   : >> { %v4002_v35 = vpop.f32.mrf.mxu0 }
0x2477   : >> { %v4003_v36 = vadd.f32 %v4002_v35, %v8237_v7  ;;  %v4215_v7 = vld [vmem:[#allocation43 + $0xb0] sm:$0xff] (%p3972_p1) }
0x2478   : > { %4331 = vmatpush.msra.mxu0 (%p3972_p1), %v4215_v7  ;;  %v4275_v35 = vld [vmem:[#allocation43 + $0x290] sm:$0xff] (%p3972_p1)  ;;  %v4297_v7 = vld [vmem:[#allocation43 + $0x340] sm:$0xff] (%p3972_p1) }
0x2479   : >> { %4026 = vrot.lane.b32.xlu0 %v4003_v36, %s7146_s3  ;;  %v4005_v38 = vadd.f32 %v4003_v36, %v3979_v37  ;;  %v4241_v36 = vld [vmem:[#allocation43 + $0x180] sm:$0xff] (%p3972_p1)  ;;  %s7149_s3 = smov (%p3972_p1), 127  }
0x247a   : > { %4332 = vmatpush.msra.mxu0 (%p3972_p1), %v4213_v31  ;;  %v4291_v31 = vld [vmem:[#allocation43 + $0x310] sm:$0xff] (%p3972_p1) }
0x247b   : >> { %v5324_v39 = vmul.f32 -1.442695, %v4005_v38  ;;  %v4273_v38 = vld [vmem:[#allocation43 + $0x280] sm:$0xff] (%p3972_p1) }
0x247c   : > { %4333 = vmatpush.msra.mxu0 (%p3972_p1), %v4211_v34  ;;  %v4242_v34 = vld [vmem:[#allocation43 + $0x188] sm:$0xff] (%p3972_p1) }
0x247d   : >> { %5886 = vpow2.f32 %v5324_v39  ;;  %v4239_v39 = vld [vmem:[#allocation43 + $0x170] sm:$0xff] (%p3972_p1) }
0x2483   : >> { %v5887_v40 = vpop.eup %5886 }
0x2484   : >> { %v4009_v60 = vadd.f32 1.0, %v5887_v40  ;;  %v4207_v40 = vld [vmem:[#allocation43 + $0x70] sm:$0xff] (%p3972_p1) }
0x2486   : >> { %5888 = vrcp.f32 %v4009_v60  ;;  %v4021_v46 = vand.u32 2147483648, %v4009_v60  ;;  %vm4015_vm13 = vweird.f32 %v4009_v60  ;;  %v4019_v47 = vand.u32 2147483647, %v4009_v60 }
0x2488   : >> { %v4022_v49 = vor.u32 1.1754944e-38, %v4021_v46  ;;  %vm4020_vm15 = vcmp.eq.f32.partialorder %v4019_v47, 8.507059e+37  ;;  %v4203_v46 = vld [vmem:[#allocation43 + $0x50] sm:$0xff] (%p3972_p1) }
0x2489   : > { %v4267_v47 = vld [vmem:[#allocation43 + $0x250] sm:$0xff] (%p3972_p1) }
0x248c   : >> { %v5889_v41 = vpop.eup %5888 }
0x248d   : >> { %v4011_v42 = vmul.f32 %v5889_v41, %v4009_v60  ;;  %vm4016_vm12 = vweird.f32 %v5889_v41  ;;  %v4271_v60 = vld [vmem:[#allocation43 + $0x270] sm:$0xff] (%p3972_p1) }
0x248e   : >> { %vm4017_vm14 = vmor %vm4015_vm13, %vm4016_vm12 }
0x248f   : >> { %v4012_v43 = vsub.f32 1.0, %v4011_v42  ;;  %v4205_v42 = vld [vmem:[#allocation43 + $0x60] sm:$0xff] (%p3972_p1) }
0x2491   : >> { %v4013_v44 = vmul.f32 %v5889_v41, %v4012_v43  ;;  %v4269_v43 = vld [vmem:[#allocation43 + $0x260] sm:$0xff] (%p3972_p1) }
0x2493   : >> { %v4014_v45 = vadd.f32 %v5889_v41, %v4013_v44  ;;  %v4235_v44 = vld [vmem:[#allocation43 + $0x150] sm:$0xff] (%p3972_p1) }
0x2495   : >> { %v4018_v48 = vsel %vm4017_vm14, %v5889_v41, %v4014_v45  ;;  %v4237_v41 = vld [vmem:[#allocation43 + $0x160] sm:$0xff] (%p3972_p1) }
0x2496   : >> { %v4023_v51 = vsel %vm4020_vm15, %v4022_v49, %v4018_v48  ;;  %v4233_v48 = vld [vmem:[#allocation43 + $0x140] sm:$0xff] (%p3972_p1) }
0x2497   : >> { %v4036_v55 = vsub.f32 1.0, %v4023_v51  ;;  %v4042_v57 = vmul.f32 %v7006_v33, %v4023_v51 }
0x24eb   : >> { %v4027_v50 = vpop.permute.xlu0 %4026 }
0x24ec   : >> { %v4029_v52 = vmul.f32 %v4027_v50, %v4023_v51  ;;  %v4319_v50 = vld [vmem:[#allocation43 + $0x3f0] sm:$0xff] (%p3972_p1) }
0x24ee   : >> { %4031 = vrot.lane.b32.xlu1 %v4029_v52, %s7147_s5  ;;  %v4231_v52 = vld [vmem:[#allocation43 + $0x130] sm:$0xff] (%p3972_p1) }
0x2560   : >> { %v4032_v3 = vpop.permute.xlu1 %4031 }
0x2561   : >> { %v4034_v53 = vadd.f32 %v4032_v3, %v3979_v37  ;;  %v4209_v37 = vld [vmem:[#allocation43 + $0x80] sm:$0xff] (%p3972_p1) }
0x2562   : > { %4334 = vmatpush.msra.mxu0 (%p3972_p1), %v4209_v37  ;;  %v4201_v3 = vld [vmem:[#allocation43 + $0x40] sm:$0xff] (%p3972_p1)  ;;  %v4214_v37 = vld [vmem:[#allocation43 + $0xa8] sm:$0xff] (%p3972_p1) }
0x2563   : >> { %5890 = vtanh.f32 %v4034_v53  ;;  %v4317_v53 = vld [vmem:[#allocation43 + $0x3e0] sm:$0xff] (%p3972_p1) }
0x2564   : > { %4335 = vmatpush.msra.mxu0 (%p3972_p1), %v4207_v40  ;;  %v4318_v40 = vld [vmem:[#allocation43 + $0x3e8] sm:$0xff] (%p3972_p1) }
0x2566   : > { %4336 = vmatpush.msra.mxu0 (%p3972_p1), %v4205_v42  ;;  %v4276_v42 = vld [vmem:[#allocation43 + $0x298] sm:$0xff] (%p3972_p1) }
0x2568   : > { %4337 = vmatpush.msra.mxu0 (%p3972_p1), %v4203_v46  ;;  %v4274_v46 = vld [vmem:[#allocation43 + $0x288] sm:$0xff] (%p3972_p1) }
0x2569   : >> { %v5891_v54 = vpop.eup %5890 }
0x256a   : >> { %4038 = vrot.lane.b32.xlu1 %v5891_v54, %s7145_s4  ;;  %v4265_v54 = vld [vmem:[#allocation43 + $0x240] sm:$0xff] (%p3972_p1)  ;;  %4338 = vmatpush.msra.mxu0 (%p3972_p1), %v4201_v3  ;;  %v4232_v3 = vld [vmem:[#allocation43 + $0x138] sm:$0xff] (%p3972_p1)  ;;  %s7148_s4 = smov (%p3972_p1), 2  }
0x25dc   : >> { %v4039_v56 = vpop.permute.xlu1 %4038 }
0x25dd   : >> { %v4041_v58 = vmul.f32 %v4039_v56, %v4036_v55  ;;  %v4229_v55 = vld [vmem:[#allocation43 + $0x120] sm:$0xff] (%p3972_p1)  ;;  %v4199_v56 = vld [vmem:[#allocation43 + $0x30] sm:$0xff] (%p3972_p1) }
0x25de   : > { %4339 = vmatpush.msra.mxu0 (%p3972_p1), %v4199_v56  ;;  %v4230_v56 = vld [vmem:[#allocation43 + $0x128] sm:$0xff] (%p3972_p1) }
0x25df   : >> { %v4043_v59 = vadd.f32 %v4042_v57, %v4041_v58   ;;  %v4315_v57 = vld [vmem:[#allocation43 + $0x3d0] sm:$0xff] (%p3972_p1) }
0x25e0   : > { %3974 = sbr.rel (!%p3972_p1) target bundleno = 9093 (0x2385), region = 481  ;;  %v4263_v58 = vld [vmem:[#allocation43 + $0x230] sm:$0xff] (%p3972_p1) }
0x25e1   : >> { %v8252_v32 = vadd.f32 %v7002_v32, %v4043_v59   ;;  %v7005_v33 = vmov %v4043_v59   ;;  %4047 = vrot.lane.b32.xlu0 (%p3972_p1), %v4043_v59, %s7121_s26  ;;  %v4227_v59 = vld [vmem:[#allocation43 + $0x110] sm:$0xff] (%p3972_p1)  ;;  %s8452_s26 = sld [smem:[#allocation103_spill]] (%p3972_p1) }
0x25e2   : > { %v4243_v33 = vld [vmem:[#allocation43 + $0x190] sm:$0xff] (%p3972_p1) }
0x25e3   : >> { %v8449_v61 = vmov %v8252_v32  ;;  %4353 = vmatpush.msrb.mxu1 (%p3972_p1), %v4243_v33  ;;  %v4216_v33 = vld [vmem:[#allocation43 + $0xb8] sm:$0xff] (%p3972_p1) }
0x25e4   : >> { %v7001_v32 = vmov %v8449_v61   ;;  %v4045_v45 = vmul.f32 (%p3972_p1), 0.125, %v8449_v61  ;;  %v4197_v61 = vld [vmem:[#allocation43 + $0x20] sm:$0xff] (%p3972_p1) }
0x25e5   : > { %v4277_v32 = vld [vmem:[#allocation43 + $0x2a0] sm:$0xff]  ;;  %4354 = vmatpush.msrb.mxu1 %v4241_v36  ;;  %4340 = vmatpush.msra.mxu0 %v4197_v61  ;;  %v4320_v36 = vld [vmem:[#allocation43 + $0x3f8] sm:$0xff] }
0x25e6   : > { %4372 = vmatpush.msrb.mxu2 %v4277_v32  ;;  %v4289_v32 = vld [vmem:[#allocation43 + $0x300] sm:$0xff]  ;;  %v4228_v61 = vld [vmem:[#allocation43 + $0x118] sm:$0xff] }
0x25e7   : > { %4355 = vmatpush.msrb.mxu1 %v4239_v39  ;;  %4341 = vmatpush.msra.mxu0 %v4195_v5  ;;  %v4278_v39 = vld [vmem:[#allocation43 + $0x2a8] sm:$0xff]  ;;  %v4304_v5 = vld [vmem:[#allocation43 + $0x378] sm:$0xff] }
0x25e8   : > { %4373 = vmatpush.msrb.mxu2 %v4275_v35  ;;  %v4280_v35 = vld [vmem:[#allocation43 + $0x2b8] sm:$0xff] }
0x25e9   : > { %4356 = vmatpush.msrb.mxu1 %v4237_v41  ;;  %4342 = vmatpush.msra.mxu0 %v4193_v10  ;;  %v4238_v41 = vld [vmem:[#allocation43 + $0x168] sm:$0xff]  ;;  %v4196_v10 = vld [vmem:[#allocation43 + $0x18] sm:$0xff] }
0x25ea   : > { %4374 = vmatpush.msrb.mxu2 %v4273_v38  ;;  %v4240_v38 = vld [vmem:[#allocation43 + $0x178] sm:$0xff] }
0x25eb   : > { %4357 = vmatpush.msrb.mxu1 %v4235_v44  ;;  %4407 = vmatpush.msrb.mxu0 %v4224_v14  ;;  %v4210_v44 = vld [vmem:[#allocation43 + $0x88] sm:$0xff] }
0x25ec   : > { %4375 = vmatpush.msrb.mxu2 %v4271_v60  ;;  %v4212_v60 = vld [vmem:[#allocation43 + $0x98] sm:$0xff]  ;;  %v4258_v14 = vld [vmem:[#allocation43 + $0x208] sm:$0xff] }
0x25ed   : > { %4358 = vmatpush.msrb.mxu1 %v4233_v48  ;;  %4408 = vmatpush.msrb.mxu0 %v4222_v18  ;;  %v4208_v48 = vld [vmem:[#allocation43 + $0x78] sm:$0xff]  ;;  %v4067_v18 = vld [vmem:[#allocation38] sm:$0xf] }
0x25ee   : > { %4376 = vmatpush.msrb.mxu2 %v4269_v43  ;;  %v4316_v43 = vld [vmem:[#allocation43 + $0x3d8] sm:$0xff] }
0x25ef   : > { %4359 = vmatpush.msrb.mxu1 %v4231_v52  ;;  %4409 = vmatpush.msrb.mxu0 %v4220_v22  ;;  %v4206_v52 = vld [vmem:[#allocation43 + $0x68] sm:$0xff] }
0x25f0   : > { %4377 = vmatpush.msrb.mxu2 %v4267_v47  ;;  %v4314_v47 = vld [vmem:[#allocation43 + $0x3c8] sm:$0xff] }
0x25f1   : > { %4360 = vmatpush.msrb.mxu1 %v4229_v55  ;;  %4410 = vmatpush.msrb.mxu0 %v4218_v25  ;;  %v4204_v55 = vld [vmem:[#allocation43 + $0x58] sm:$0xff] }
0x25f2   : > { %4378 = vmatpush.msrb.mxu2 %v4265_v54  ;;  %v4310_v54 = vld [vmem:[#allocation43 + $0x3a8] sm:$0xff] }
0x25f3   : > { %4361 = vmatpush.msrb.mxu1 %v4227_v59  ;;  %4411 = vmatpush.msrb.mxu0 %v4216_v33  ;;  %v4202_v59 = vld [vmem:[#allocation43 + $0x48] sm:$0xff] }
0x25f4   : > { %4379 = vmatpush.msrb.mxu2 %v4263_v58  ;;  %v4308_v58 = vld [vmem:[#allocation43 + $0x398] sm:$0xff] }
0x25f5   : > { %4362 = vmatpush.msrb.mxu1 %v4225_v0  ;;  %4412 = vmatpush.msrb.mxu0 %v4214_v37  ;;  %v4200_v0 = vld [vmem:[#allocation43 + $0x38] sm:$0xff] }
0x25f6   : > { %4380 = vmatpush.msrb.mxu2 %v4261_v63  ;;  %v4306_v63 = vld [vmem:[#allocation43 + $0x388] sm:$0xff] }
0x25f7   : > { %4413 = vmatpush.msrb.mxu0 %v4212_v60 }
0x25f8   : > { %4381 = vmatpush.msrb.mxu2 %v4259_v6  ;;  %v4198_v6 = vld [vmem:[#allocation43 + $0x28] sm:$0xff] }
0x25f9   : > { %4414 = vmatpush.msrb.mxu0 %v4210_v44 }
0x25fa   : > { %4382 = vmatpush.msrb.mxu2 %v4257_v11  ;;  %v4260_v11 = vld [vmem:[#allocation43 + $0x218] sm:$0xff] }
0x25fb   : > { %4415 = vmatpush.msrb.mxu0 %v4208_v48 }
0x25fd   : > { %4416 = vmatpush.msrb.mxu0 %v4206_v52 }
0x25ff   : > { %4417 = vmatpush.msrb.mxu0 %v4204_v55  ;;  %v4518_v55 = vld [vmem:[#allocation47 + $0x60] sm:$0xff] }
0x2601   : > { %4418 = vmatpush.msrb.mxu0 %v4202_v59  ;;  %v4536_v59 = vld [vmem:[#allocation47 + $0xf0] sm:$0xff] }
0x2603   : > { %4419 = vmatpush.msrb.mxu0 %v4200_v0  ;;  %v4534_v0 = vld [vmem:[#allocation47 + $0xe0] sm:$0xff] }
0x2605   : > { %4420 = vmatpush.msrb.mxu0 %v4198_v6  ;;  %v4532_v6 = vld [vmem:[#allocation47 + $0xd0] sm:$0xff] }
0x2607   : > { %4421 = vmatpush.msrb.mxu0 %v4196_v10  ;;  %v4510_v10 = vld [vmem:[#allocation47 + $0x20] sm:$0xff] }
0x2653   : > { %v4048_v49 = vpop.permute.xlu0 %4047 }
0x2654   : > { %v4050_v51 = vsel %vm3866_vm1, %v4048_v49, %v4045_v45  ;;  %v4236_v45 = vld [vmem:[#allocation43 + $0x158] sm:$0xff]  ;;  %v4234_v49 = vld [vmem:[#allocation43 + $0x148] sm:$0xff] }
0x2655   : > { %5325 = vmatmul.msk.f32.vlgmr.msra.gmra.mxu3 %vm1787_vm2, %v4050_v51  ;;  %5326 = vmatmul.msk.f32.vlgmr.msra.gmra.mxu1 %vm1787_vm2, %v4050_v51 }
0x2656   : > { %5327 = vmatmul.msk.f32.vlgmr.msra.gmra.mxu2 %vm1787_vm2, %v4050_v51  ;;  %4387 = vmatpush.msra.mxu3 %v4319_v50  ;;  %v4272_v50 = vld [vmem:[#allocation43 + $0x278] sm:$0xff] }
0x2657   : > { %4427 = vmatpush.msra.mxu1 %v4256_v4  ;;  %4447 = vmatpush.msra.mxu2 %v4288_v15  ;;  %v4264_v4 = vld [vmem:[#allocation43 + $0x238] sm:$0xff]  ;;  %v4298_v15 = vld [vmem:[#allocation43 + $0x348] sm:$0xff] }
0x2658   : > { %4388 = vmatpush.msra.mxu3 %v4317_v53  ;;  %v4270_v53 = vld [vmem:[#allocation43 + $0x268] sm:$0xff] }
0x2659   : > { %4428 = vmatpush.msra.mxu1 %v4254_v9  ;;  %4448 = vmatpush.msra.mxu2 %v4286_v19  ;;  %v4302_v9 = vld [vmem:[#allocation43 + $0x368] sm:$0xff]  ;;  %v4164_v19 = vld [vmem:[#allocation40] sm:$0xf] }
0x265a   : > { %4389 = vmatpush.msra.mxu3 %v4315_v57  ;;  %v4268_v57 = vld [vmem:[#allocation43 + $0x258] sm:$0xff]  ;;  %v4165_v22 = vmul.f32 0.999995, %v4164_v19  ;;  %v4526_v19 = vld [vmem:[#allocation47 + $0xa0] sm:$0xff] }
0x265b   : > { %4429 = vmatpush.msra.mxu1 %v4252_v13  ;;  %4449 = vmatpush.msra.mxu2 %v4284_v2  ;;  %v4194_v13 = vld [vmem:[#allocation43 + $0x8] sm:$0xff] }
0x265c   : > { %4390 = vmatpush.msra.mxu3 %v4313_v62  ;;  %v4266_v62 = vld [vmem:[#allocation43 + $0x248] sm:$0xff]  ;;  %4422 = vmatpush.msrb.mxu0 %v4194_v13  ;;  %v4167_v33 = vperm.slane %v4165_v22, 0  ;;  %v4169_v37 = vperm.slane %v4165_v22, 2  ;;  %v4529_v13 = vld [vmem:[#allocation47 + $0xb8] sm:$0xff] }
0x265d   : > { %5328 = vmatmul.msk.f32.vlgmr.msrb.gmra.mxu3 %vm1787_vm2, %v4050_v51  ;;  %4430 = vmatpush.msra.mxu1 %v4250_v17  ;;  %v4312_v51 = vld [vmem:[#allocation43 + $0x3b8] sm:$0xff]  ;;  %v4294_v17 = vld [vmem:[#allocation43 + $0x328] sm:$0xff]  ;;  %vm4632_vm2 = vcmask 523264  }
0x265e   : > { %4391 = vmatpush.msra.mxu3 %v4311_v1  ;;  %4450 = vmatpush.msra.mxu2 %v4282_v26  ;;  %v4226_v1 = vld [vmem:[#allocation43 + $0x108] sm:$0xff]  ;;  %v4168_v26 = vperm.slane %v4165_v22, 1 }
0x265f   : > { %4431 = vmatpush.msra.mxu1 %v4248_v21  ;;  %v4070_v21 = vperm.slane %v4067_v18, 1  ;;  %v4290_v2 = vld [vmem:[#allocation43 + $0x308] sm:$0xff] }
0x2660   : > { %4392 = vmatpush.msra.mxu3 %v4309_v8  ;;  %4451 = vmatpush.msra.mxu2 %v4280_v35  ;;  %v4262_v8 = vld [vmem:[#allocation43 + $0x228] sm:$0xff] }
0x2661   : > { %4432 = vmatpush.msra.mxu1 %v4246_v24  ;;  %v4179_v24 = vld [vmem:[#allocation41] sm:$0xf] }
0x2662   : > { %4393 = vmatpush.msra.mxu3 %v4307_v12  ;;  %4452 = vmatpush.msra.mxu2 %v4278_v39  ;;  %v4300_v12 = vld [vmem:[#allocation43 + $0x358] sm:$0xff]  ;;  %v4181_v39 = vperm.slane %v4179_v24, 0  ;;  %v4183_v60 = vperm.slane %v4179_v24, 2 }
0x2663   : > { %4433 = vmatpush.msra.mxu1 %v4244_v28  ;;  %v4069_v28 = vperm.slane %v4067_v18, 0 }
0x2664   : > { %4394 = vmatpush.msra.mxu3 %v4305_v16  ;;  %4453 = vmatpush.msra.mxu2 %v4276_v42  ;;  %v4296_v16 = vld [vmem:[#allocation43 + $0x338] sm:$0xff]  ;;  %v4072_v42 = vperm.slane %v4067_v18, 3 }
0x2665   : > { %4434 = vmatpush.msra.mxu1 %v4242_v34 }
0x2666   : > { %4395 = vmatpush.msra.mxu3 %v4303_v20  ;;  %4454 = vmatpush.msra.mxu2 %v4274_v46  ;;  %v4292_v20 = vld [vmem:[#allocation43 + $0x318] sm:$0xff] }
0x2667   : > { %4435 = vmatpush.msra.mxu1 %v4240_v38 }
0x2668   : > { %4396 = vmatpush.msra.mxu3 %v4301_v23  ;;  %4455 = vmatpush.msra.mxu2 %v4272_v50 }
0x2669   : > { %4436 = vmatpush.msra.mxu1 %v4238_v41 }
0x266a   : > { %4397 = vmatpush.msra.mxu3 %v4299_v27  ;;  %4456 = vmatpush.msra.mxu2 %v4270_v53  ;;  %v4520_v53 = vld [vmem:[#allocation47 + $0x70] sm:$0xff] }
0x266b   : > { %4437 = vmatpush.msra.mxu1 %v4236_v45  ;;  %v4521_v45 = vld [vmem:[#allocation47 + $0x78] sm:$0xff] }
0x266c   : > { %4398 = vmatpush.msra.mxu3 %v4297_v7  ;;  %4457 = vmatpush.msra.mxu2 %v4268_v57  ;;  %v4182_v7 = vperm.slane %v4179_v24, 1  ;;  %v4537_v57 = vld [vmem:[#allocation47 + $0xf8] sm:$0xff] }
0x266d   : > { %4438 = vmatpush.msra.mxu1 %v4234_v49  ;;  %v4170_v49 = vperm.slane %v4165_v22, 3  ;;  %v4523_v22 = vld [vmem:[#allocation47 + $0x88] sm:$0xff] }
0x266e   : > { %4399 = vmatpush.msra.mxu3 %v4295_v29  ;;  %4458 = vmatpush.msra.mxu2 %v4266_v62  ;;  %v4071_v29 = vperm.slane %v4067_v18, 2  ;;  %v4535_v62 = vld [vmem:[#allocation47 + $0xe8] sm:$0xff]  ;;  %v4506_v18 = vld [vmem:[#allocation47] sm:$0xff] }
0x266f   : > { %4439 = vmatpush.msra.mxu1 %v4232_v3 }
0x2670   : > { %4400 = vmatpush.msra.mxu3 %v4293_v30  ;;  %4459 = vmatpush.msra.mxu2 %v4264_v4  ;;  %v4533_v4 = vld [vmem:[#allocation47 + $0xd8] sm:$0xff] }
0x2671   : > { %4440 = vmatpush.msra.mxu1 %v4230_v56  ;;  %v4517_v56 = vld [vmem:[#allocation47 + $0x58] sm:$0xff] }
0x2672   : > { %4401 = vmatpush.msra.mxu3 %v4291_v31  ;;  %4460 = vmatpush.msra.mxu2 %v4262_v8  ;;  %v4511_v8 = vld [vmem:[#allocation47 + $0x28] sm:$0xff] }
0x2673   : > { %4441 = vmatpush.msra.mxu1 %v4228_v61  ;;  %v4515_v61 = vld [vmem:[#allocation47 + $0x48] sm:$0xff] }
0x2674   : > { %4402 = vmatpush.msra.mxu3 %v4289_v32  ;;  %4461 = vmatpush.msra.mxu2 %v4260_v11  ;;  %v4530_v11 = vld [vmem:[#allocation47 + $0xc0] sm:$0xff] }
0x2675   : > { %4442 = vmatpush.msra.mxu1 %v4226_v1  ;;  %v4513_v1 = vld [vmem:[#allocation47 + $0x38] sm:$0xff] }
0x2676   : > { %4467 = vmatpush.msrb.mxu3 %v4320_v36  ;;  %4462 = vmatpush.msra.mxu2 %v4258_v14  ;;  %v4508_v14 = vld [vmem:[#allocation47 + $0x10] sm:$0xff] }
0x2678   : > { %4468 = vmatpush.msrb.mxu3 %v4318_v40 }
0x267a   : > { %4469 = vmatpush.msrb.mxu3 %v4316_v43 }
0x267c   : > { %4470 = vmatpush.msrb.mxu3 %v4314_v47 }
0x267e   : > { %4471 = vmatpush.msrb.mxu3 %v4312_v51  ;;  %v4184_v51 = vperm.slane %v4179_v24, 3  ;;  %v4599_v24 = vld [vmem:[%s8452_s26 + $0x70] sm:$0xff] }
0x2680   : > { %4472 = vmatpush.msrb.mxu3 %v4310_v54  ;;  %v4519_v54 = vld [vmem:[#allocation47 + $0x68] sm:$0xff] }
0x2682   : > { %4473 = vmatpush.msrb.mxu3 %v4308_v58  ;;  %v4516_v58 = vld [vmem:[#allocation47 + $0x50] sm:$0xff] }
0x2684   : > { %4474 = vmatpush.msrb.mxu3 %v4306_v63  ;;  %v4514_v63 = vld [vmem:[#allocation47 + $0x40] sm:$0xff] }
0x2686   : > { %4475 = vmatpush.msrb.mxu3 %v4304_v5  ;;  %v4512_v5 = vld [vmem:[#allocation47 + $0x30] sm:$0xff] }
0x2688   : > { %4476 = vmatpush.msrb.mxu3 %v4302_v9  ;;  %v4531_v9 = vld [vmem:[#allocation47 + $0xc8] sm:$0xff] }
0x268a   : > { %4477 = vmatpush.msrb.mxu3 %v4300_v12  ;;  %v4509_v12 = vld [vmem:[#allocation47 + $0x18] sm:$0xff] }
0x268c   : > { %4478 = vmatpush.msrb.mxu3 %v4298_v15  ;;  %v4528_v15 = vld [vmem:[#allocation47 + $0xb0] sm:$0xff] }
0x268e   : > { %4479 = vmatpush.msrb.mxu3 %v4296_v16  ;;  %v4507_v16 = vld [vmem:[#allocation47 + $0x8] sm:$0xff] }
0x2690   : > { %4480 = vmatpush.msrb.mxu3 %v4294_v17  ;;  %v4527_v17 = vld [vmem:[#allocation47 + $0xa8] sm:$0xff] }
0x2692   : > { %4481 = vmatpush.msrb.mxu3 %v4292_v20  ;;  %v4525_v20 = vld [vmem:[#allocation47 + $0x98] sm:$0xff] }
0x2694   : > { %4482 = vmatpush.msrb.mxu3 %v4290_v2  ;;  %v4522_v2 = vld [vmem:[#allocation47 + $0x80] sm:$0xff] }
0x26d2   : > { %v4117_v23 = vpop.f32.mrf.mxu1 }
0x26d3   : > { %v4118_v25 = vadd.f32 %v4117_v23, %v4070_v21  ;;  %v4524_v21 = vld [vmem:[#allocation47 + $0x90] sm:$0xff] }
0x26d4   : > { %v4600_v23 = vld [vmem:[%s8452_s26 + $0x78] sm:$0xff] }
0x26d5   : > { %v4161_v27 = vmax.f32 %v4118_v25, 0.0  ;;  %v4321_v25 = vld [vmem:[%s8453_s0] sm:$0x3] }
0x26d7   : > { %v4176_v30 = vmul.f32 %v4168_v26, %v4161_v27  ;;  %v4598_v26 = vld [vmem:[%s8452_s26 + $0x68] sm:$0xff] }
0x26d8   : > { %v4097_v31 = vpop.f32.mrf.mxu3 }
0x26d9   : > { %v4098_v32 = vadd.f32 %v4097_v31, %v4069_v28  ;;  %v4137_v34 = vpop.f32.mrf.mxu2  ;;  %v4190_v35 = vadd.f32 %v4182_v7, %v4176_v30  ;;  %v4323_v28 = vperm.slane %v4321_v25, 0  ;;  %v4597_v7 = vld [vmem:[%s8452_s26 + $0x60] sm:$0xff]  ;;  %v4595_v31 = vld [vmem:[%s8452_s26 + $0x50] sm:$0xff] }
0x26da   : > { %v4138_v36 = vadd.f32 %v4137_v34, %v4071_v29  ;;  %v4596_v29 = vld [vmem:[%s8452_s26 + $0x58] sm:$0xff]  ;;  %v4489_v34 = vld [vmem:[#allocation44] sm:$0x3] }
0x26db   : > { %v4160_v38 = vmax.f32 %v4098_v32, 0.0  ;;  %4363 = vmatmul.f32.vlgmr.msrb.gmra.mxu1 %v4190_v35 }
0x26dc   : > { %v4162_v40 = vmax.f32 %v4138_v36, 0.0  ;;  %4559 = vmatpush.msrb.mxu1 %v4537_v57 }
0x26dd   : > { %v4175_v41 = vmul.f32 %v4167_v33, %v4160_v38  ;;  %v4490_v38 = vmul.f32 0.999995, %v4489_v34 }
0x26de   : > { %v4177_v43 = vmul.f32 %v4169_v37, %v4162_v40  ;;  %4560 = vmatpush.msrb.mxu1 %v4536_v59  ;;  %v4324_v37 = vperm.slane %v4321_v25, 1  ;;  %v4593_v59 = vld [vmem:[%s8452_s26 + $0x40] sm:$0xff] }
0x26df   : > { %v4189_v44 = vadd.f32 %v4181_v39, %v4175_v41  ;;  %v4498_v41 = vld [vmem:[#allocation46] sm:$0x3] }
0x26e0   : > { %v4157_v46 = vpop.f32.mrf.mxu3  ;;  %v4191_v47 = vadd.f32 %v4183_v60, %v4177_v43  ;;  %4561 = vmatpush.msrb.mxu1 %v4535_v62  ;;  %v4591_v62 = vld [vmem:[%s8452_s26 + $0x30] sm:$0xff]  ;;  %v4623_v25 = vld [vmem:[%s8454_s6] sm:$0xff] }
0x26e1   : > { %v4158_v48 = vadd.f32 %v4157_v46, %v4072_v42  ;;  %4343 = vmatmul.f32.vlgmr.msra.gmra.mxu0 %v4189_v44  ;;  %v4500_v46 = vperm.slane %v4498_v41, 0 }
0x26e2   : > { %4383 = vmatmul.f32.vlgmr.msrb.gmra.mxu2 %v4191_v47  ;;  %4539 = vmatpush.msra.mxu0 %v4521_v45 }
0x26e3   : > { %v4163_v50 = vmax.f32 %v4158_v48, 0.0  ;;  %4443 = vmatmul.f32.vlgmr.msra.gmra.mxu1 %v4190_v35  ;;  %4602 = vmatpush.msrb.mxu2 %v4600_v23  ;;  %v4594_v35 = vld [vmem:[%s8452_s26 + $0x48] sm:$0xff]  ;;  %v4625_v23 = vld [vmem:[%s8454_s6 + $0x10] sm:$0xff] }
0x26e4   : > { %4540 = vmatpush.msra.mxu0 %v4520_v53  ;;  %4562 = vmatpush.msrb.mxu1 %v4534_v0  ;;  %v4589_v0 = vld [vmem:[%s8452_s26 + $0x20] sm:$0xff] }
0x26e5   : > { %v4178_v52 = vmul.f32 %v4170_v49, %v4163_v50  ;;  %4603 = vmatpush.msrb.mxu2 %v4599_v24  ;;  %v4624_v24 = vld [vmem:[%s8454_s6 + $0x8] sm:$0xff] }
0x26e6   : > { %4541 = vmatpush.msra.mxu0 %v4519_v54  ;;  %4563 = vmatpush.msrb.mxu1 %v4533_v4  ;;  %v4493_v54 = vperm.slane %v4490_v38, 1  ;;  %v4587_v4 = vld [vmem:[%s8452_s26 + $0x10] sm:$0xff] }
0x26e7   : > { %v4192_v3 = vadd.f32 %v4184_v51, %v4178_v52  ;;  %4604 = vmatpush.msrb.mxu2 %v4598_v26  ;;  %v4601_v26 = vld [vmem:[#allocation53] sm:$0x1] }
0x26e8   : > { %4542 = vmatpush.msra.mxu0 %v4518_v55  ;;  %4564 = vmatpush.msrb.mxu1 %v4532_v6  ;;  %v4585_v6 = vld [vmem:[%s8452_s26] sm:$0xff] }
0x26e9   : > { %4403 = vmatmul.f32.vlgmr.msra.gmra.mxu3 %v4192_v3  ;;  %4423 = vmatmul.f32.vlgmr.msrb.gmra.mxu0 %v4189_v44  ;;  %v4492_v44 = vperm.slane %v4490_v38, 0 }
0x26ea   : > { %4463 = vmatmul.f32.vlgmr.msra.gmra.mxu2 %v4191_v47  ;;  %4543 = vmatpush.msra.mxu0 %v4517_v56  ;;  %v4501_v56 = vperm.slane %v4498_v41, 1 }
0x26eb   : > { %4565 = vmatpush.msrb.mxu1 %v4531_v9  ;;  %4605 = vmatpush.msrb.mxu2 %v4597_v7  ;;  %v4629_v9 = vld [vmem:[%s8454_s6 + $0x30] sm:$0xff] }
0x26ec   : > { %4544 = vmatpush.msra.mxu0 %v4516_v58 }
0x26ed   : > { %4566 = vmatpush.msrb.mxu1 %v4530_v11  ;;  %4606 = vmatpush.msrb.mxu2 %v4596_v29  ;;  %v4627_v11 = vld [vmem:[%s8454_s6 + $0x20] sm:$0xff]  ;;  %v4631_v29 = vld [vmem:[#allocation55] sm:$0x1] }
0x26ee   : > { %4545 = vmatpush.msra.mxu0 %v4515_v61  ;;  %v4592_v61 = vld [vmem:[%s8452_s26 + $0x38] sm:$0xff] }
0x26ef   : > { %4567 = vmatpush.msrb.mxu1 %v4529_v13  ;;  %4607 = vmatpush.msrb.mxu2 %v4595_v31  ;;  %v4538_v13 = vld [vmem:[#allocation49] sm:$0x1] }
0x26f0   : > { %4546 = vmatpush.msra.mxu0 %v4514_v63  ;;  %v4590_v63 = vld [vmem:[%s8452_s26 + $0x28] sm:$0xff] }
0x26f1   : > { %4483 = vmatmul.f32.vlgmr.msrb.gmra.mxu3 %v4192_v3  ;;  %4568 = vmatpush.msrb.mxu1 %v4528_v15  ;;  %v4580_v15 = vld [vmem:[#allocation50] sm:$0x1] }
0x26f2   : > { %4547 = vmatpush.msra.mxu0 %v4513_v1  ;;  %4608 = vmatpush.msrb.mxu2 %v4594_v35  ;;  %v4588_v1 = vld [vmem:[%s8452_s26 + $0x18] sm:$0xff] }
0x26f3   : > { %4569 = vmatpush.msrb.mxu1 %v4527_v17 }
0x26f4   : > { %4548 = vmatpush.msra.mxu0 %v4512_v5  ;;  %4609 = vmatpush.msrb.mxu2 %v4593_v59  ;;  %v4586_v5 = vld [vmem:[%s8452_s26 + $0x8] sm:$0xff] }
0x26f5   : > { %4570 = vmatpush.msrb.mxu1 %v4526_v19  ;;  %v4581_v19 = vmul.f32 0.999995, %v4580_v15 }
0x26f6   : > { %4549 = vmatpush.msra.mxu0 %v4511_v8  ;;  %4610 = vmatpush.msrb.mxu2 %v4592_v61  ;;  %v4630_v8 = vld [vmem:[%s8454_s6 + $0x38] sm:$0xff] }
0x26f7   : > { %4571 = vmatpush.msrb.mxu1 %v4525_v20  ;;  %4644 = vmatpush.msra.mxu3 %v4630_v8 }
0x26f8   : > { %4550 = vmatpush.msra.mxu0 %v4510_v10  ;;  %4611 = vmatpush.msrb.mxu2 %v4591_v62  ;;  %v4628_v10 = vld [vmem:[%s8454_s6 + $0x28] sm:$0xff] }
0x26f9   : > { %4572 = vmatpush.msrb.mxu1 %v4524_v21  ;;  %4645 = vmatpush.msra.mxu3 %v4629_v9  ;;  %v4583_v21 = vld [vmem:[#allocation52] sm:$0x1] }
0x26fa   : > { %4551 = vmatpush.msra.mxu0 %v4509_v12  ;;  %4612 = vmatpush.msrb.mxu2 %v4590_v63  ;;  %v4626_v12 = vld [vmem:[%s8454_s6 + $0x18] sm:$0xff] }
0x26fb   : > { %4573 = vmatpush.msrb.mxu1 %v4523_v22  ;;  %4646 = vmatpush.msra.mxu3 %v4628_v10 }
0x26fc   : > { %4552 = vmatpush.msra.mxu0 %v4508_v14  ;;  %4613 = vmatpush.msrb.mxu2 %v4589_v0 }
0x26fd   : > { %4574 = vmatpush.msrb.mxu1 %v4522_v2  ;;  %4647 = vmatpush.msra.mxu3 %v4627_v11 }
0x26fe   : > { %4553 = vmatpush.msra.mxu0 %v4507_v16  ;;  %4614 = vmatpush.msrb.mxu2 %v4588_v1 }
0x26ff   : > { %4648 = vmatpush.msra.mxu3 %v4626_v12 }
0x2700   : > { %4554 = vmatpush.msra.mxu0 %v4506_v18  ;;  %4615 = vmatpush.msrb.mxu2 %v4587_v4 }
0x2701   : > { %4649 = vmatpush.msra.mxu3 %v4625_v23 }
0x2702   : > { %4616 = vmatpush.msrb.mxu2 %v4586_v5 }
0x2703   : > { %4650 = vmatpush.msra.mxu3 %v4624_v24 }
0x2704   : > { %4617 = vmatpush.msrb.mxu2 %v4585_v6 }
0x2705   : > { %4651 = vmatpush.msra.mxu3 %v4623_v25 }
0x2758   : > { %v4364_v32 = vpop.f32.mrf.mxu1 }
0x275e   : > { %v4344_v27 = vpop.f32.mrf.mxu0 }
0x275f   : > { %v4345_v30 = vadd.f32 %v4344_v27, %v4323_v28 }
0x2760   : > { %v4444_v47 = vpop.f32.mrf.mxu1 }
0x2761   : > { %v4365_v36 = vadd.f32 %v4364_v32, %v4345_v30 }
0x2765   : > { %v4384_v33 = vpop.f32.mrf.mxu2 }
0x2766   : > { %v4424_v39 = vpop.f32.mrf.mxu0  ;;  %v4385_v40 = vadd.f32 %v4384_v33, %v4365_v36 }
0x2767   : > { %v4425_v42 = vadd.f32 %v4424_v39, %v4324_v37 }
0x2769   : > { %v4445_v50 = vadd.f32 %v4444_v47, %v4425_v42 }
0x276c   : > { %v4404_v60 = vpop.f32.mrf.mxu3 }
0x276d   : > { %v4405_v43 = vadd.f32 %v4404_v60, %v4385_v40  ;;  %v4464_v48 = vpop.f32.mrf.mxu2 }
0x276e   : > { %v4465_v52 = vadd.f32 %v4464_v48, %v4445_v50 }
0x276f   : > { %v4487_v45 = vmax.f32 %v4405_v43, 0.0 }
0x2771   : > { %v4496_v49 = vmul.f32 %v4492_v44, %v4487_v45 }
0x2773   : > { %v4504_v51 = vadd.f32 %v4500_v46, %v4496_v49 }
0x2774   : > { %v4484_v3 = vpop.f32.mrf.mxu3 }
0x2775   : > { %v4485_v53 = vadd.f32 %v4484_v3, %v4465_v52  ;;  %4555 = vmatmul.f32.vlgmr.msra.gmra.mxu0 %v4504_v51 }
0x2777   : > { %v4488_v55 = vmax.f32 %v4485_v53, 0.0 }
0x2779   : > { %v4497_v57 = vmul.f32 %v4493_v54, %v4488_v55 }
0x277b   : > { %v4505_v58 = vadd.f32 %v4501_v56, %v4497_v57 }
0x277d   : > { %4575 = vmatmul.f32.vlgmr.msrb.gmra.mxu1 %v4505_v58 }
0x27f2   : > { %v4556_v14 = vpop.f32.mrf.mxu0 }
0x27f3   : > { %v4557_v16 = vadd.f32 %v4556_v14, %v4538_v13 }
0x27fa   : > { %v4576_v17 = vpop.f32.mrf.mxu1 }
0x27fb   : > { %v4577_v18 = vadd.f32 %v4576_v17, %v4557_v16 }
0x27fd   : > { %v4579_v20 = vmax.f32 %v4577_v18, 0.0 }
0x27ff   : > { %v4582_v22 = vmul.f32 %v4581_v19, %v4579_v20 }
0x2801   : > { %v4584_v2 = vadd.f32 %v4583_v21, %v4582_v22 }
0x2803   : > { %4618 = vmatmul.f32.vlgmr.msrb.gmra.mxu2 %v4584_v2 }
0x2886   : > { %v4619_v27 = vpop.f32.mrf.mxu2 }
0x2887   : > { %v4620_v28 = vadd.f32 %v4619_v27, %v4601_v26 }
0x2889   : > { %v4622_v7 = vmax.f32 %v4620_v28, 0.0 }
0x288b   : > { %5329 = vmatmul.msk.f32.vlgmr.msra.gmra.mxu3 %vm4632_vm2, %v4622_v7 }
0x290e   : > { %v4653_v30 = vpop.f32.mrf.mxu3 }
0x290f   : > { %v4654_v31 = vadd.f32 %v4653_v30, %v4631_v29 }
0x2911   : > { %5892 = vtanh.f32 %v4654_v31  ;;  %v5330_v35 = vmul.f32 -1.442695, %v4654_v31 }
0x2913   : > { %5894 = vpow2.f32 %v5330_v35 }
0x2917   : > { %v5893_v32 = vpop.eup %5892 }
0x2918   : > { %4690 = vrot.lane.b32.xlu0 %v5893_v32, %s7148_s4  ;;  %v4677_v33 = vmul.f32 0.3, %v5893_v32  ;;  %v4683_v34 = vmul.f32 0.2, %v5893_v32  ;;  %v4676_v51 = vmul.f32 0.4, %v5893_v32 }
0x2919   : > { %v5895_v36 = vpop.eup %5894 }
0x291a   : > { %4679 = vrot.lane.b32.xlu1 %v4677_v33, %s7149_s3  ;;  %v4660_v37 = vadd.f32 1.0, %v5895_v36 }
0x291c   : > { %5896 = vrcp.f32 %v4660_v37  ;;  %v4672_v42 = vand.u32 2147483648, %v4660_v37  ;;  %vm4666_vm5 = vweird.f32 %v4660_v37  ;;  %v4670_v43 = vand.u32 2147483647, %v4660_v37 }
0x291e   : > { %v4673_v45 = vor.u32 1.1754944e-38, %v4672_v42  ;;  %vm4671_vm7 = vcmp.eq.f32.partialorder %v4670_v43, 8.507059e+37 }
0x2922   : > { %4685 = vrot.lane.b32.xlu1 %v4683_v34, %s7150_s8  ;;  %v5897_v38 = vpop.eup %5896 }
0x2923   : > { %v4662_v39 = vmul.f32 %v5897_v38, %v4660_v37  ;;  %vm4667_vm4 = vweird.f32 %v5897_v38 }
0x2924   : > { %vm4668_vm6 = vmor %vm4666_vm5, %vm4667_vm4 }
0x2925   : > { %v4663_v40 = vsub.f32 1.0, %v4662_v39 }
0x2927   : > { %v4664_v60 = vmul.f32 %v5897_v38, %v4663_v40 }
0x2929   : > { %v4665_v41 = vadd.f32 %v5897_v38, %v4664_v60 }
0x292b   : > { %v4669_v44 = vsel %vm4668_vm6, %v5897_v38, %v4665_v41 }
0x292c   : > { %v4674_v47 = vsel %vm4671_vm7, %v4673_v45, %v4669_v44 }
0x298a   : > { %v4691_v46 = vpop.permute.xlu0 %4690 }
0x298b   : > { %v4693_v48 = vmul.f32 %v4691_v46, %v4674_v47 }
0x298c   : > { %v4680_v50 = vpop.permute.xlu1 %4679 }
0x298d   : > { %v4694_v49 = vmul.f32 0.1, %v4693_v48  ;;  %v4682_v3 = vadd.f32 %v4680_v50, %v4676_v51 }
0x298f   : > { %4696 = vrot.lane.b32.xlu2 %v4694_v49, %s7097_s1 }
0x2994   : > { %v4686_v52 = vpop.permute.xlu1 %4685 }
0x2995   : > { %v4688_v53 = vadd.f32 %v4686_v52, %v4682_v3 }
0x29e9   : > { %v4697_v54 = vpop.permute.xlu2 %4696 }
0x29ea   : > { %v4699_v55 = vadd.f32 %v4697_v54, %v4688_v53 }
0x29ec   : > { %4701 = vst.msk [vmem:[%s1737_s7] sm:$0x1] %vm4700_vm0, %v4699_v55 }
0x29ed PF: > { %s8456_s11 = sld [smem:[#allocation107_spill]]  ;;  %s8459_s7 = smov %s6962_s10 }
0x29ee   : > { %s8457_s0 = sld [smem:[#allocation106_spill]] }
0x29ef   : > { %s8458_s4 = sld [smem:[#allocation108_spill]] }
0x29f3   : > { %p109_p2 = scmp.ge.s32.totalorder %s8456_s11, 4  }
0x29f5   : > { %s8460_s10 = smov %s8458_s4  ;;  %111 = sbr.rel (!%p109_p2) target bundleno = 99 (0x63), region = 492 }
0x29fa   :  { %4719 = vsyncpa [#allocation7], 1 }
0x29fb   :  { %4721 = vsyncpa [#allocation7 + $0x1], 1 }
0x29fc   :  { %4722 = vsyncpa [#allocation9], 1 }
0x29fd   :  { %4723 = vsyncpa [#allocation12], 1 }
0x29fe   :  { %4724 = vsyncpa [#allocation15], 1 }
0x29ff   :  { %4725 = vsyncpa [#allocation18], 1 }
0x2a00   :  { %4726 = vsyncpa [#allocation21], 1 }
0x2a01   :  { %4727 = vsyncpa [#allocation24], 1 }
0x2a02   :  { %4728 = vsyncpa [#allocation27], 1 }
0x2a03   :  { %4729 = vsyncpa [#allocation30], 1 }
0x2a04   :  { %4730 = vsyncpa [#allocation33], 1 }
0x2a05   :  { %4731 = vsyncpa [#allocation36], 1 }
0x2a06   :  { %4732 = vsyncpa [#allocation39], 1 }
0x2a07   :  { %4733 = vsyncpa [#allocation42], 1 }
0x2a08   :  { %4734 = vsyncpa [#allocation45], 1 }
0x2a09   :  { %4735 = vsyncpa [#allocation48], 1 }
0x2a0a   :  { %4736 = vsyncpa [#allocation51], 1 }
0x2a0b   :  { %4737 = vsyncpa [#allocation54], 1 }

</bundles_post_ra>
